<compile_context>
chip_gen: v5e
topology: v5e:2x2
jax: 0.10.0
libtpu: 0.0.40
codegen_flags: <defaults>
</compile_context>

<pallas_src>
import jax
import jax.numpy as jnp
from jax.experimental import pallas as pl
from jax.experimental.pallas import tpu as pltpu

_LANE = 128
_SUBLANE = 8


# ------------------------------- small helpers ------------------------------

def _round_up(x, m):
    return ((x + m - 1) // m) * m


def _pad2d(a, rows, cols):
    return jnp.pad(a, ((0, rows - a.shape[0]), (0, cols - a.shape[1])))


def _choose_tile(m, max_tile=512):
    """Pad m to a 128 multiple and pick a row-tile TM that divides it (TM<=max)."""
    m_pad = _round_up(m, _LANE)
    tile = min(max_tile, m_pad)
    return _round_up(m_pad, tile), tile


# ------------------------------- Pallas kernels ------------------------------

def _conv_relu_pool_kernel(c0_ref, c1_ref, c2_ref, c3_ref, w_ref, b_ref, o_ref):
    """Fused conv(as matmul) + bias + ReLU + 2x2 maxpool.

    c{d}: (TM, K) im2col rows for pool-window position d; w: (K, 128); b: (1, 128).
    """
    w = w_ref[...]
    acc = jnp.dot(c0_ref[...], w, preferred_element_type=jnp.float32)
    acc = jnp.maximum(acc, jnp.dot(c1_ref[...], w, preferred_element_type=jnp.float32))
    acc = jnp.maximum(acc, jnp.dot(c2_ref[...], w, preferred_element_type=jnp.float32))
    acc = jnp.maximum(acc, jnp.dot(c3_ref[...], w, preferred_element_type=jnp.float32))
    o_ref[...] = jnp.maximum(acc + b_ref[...], 0.0).astype(o_ref.dtype)


def _fc_head_kernel(x_ref, w1_ref, b1_ref, w2_ref, b2_ref, w3_ref, b3_ref, o_ref):
    """Fused fc1 -> ReLU -> fc2 -> ReLU -> fc3 (all weights VMEM-resident)."""
    h = jnp.dot(x_ref[...], w1_ref[...], preferred_element_type=jnp.float32)
    h = jnp.maximum(h + b1_ref[...], 0.0)
    h = jnp.dot(h, w2_ref[...], preferred_element_type=jnp.float32)
    h = jnp.maximum(h + b2_ref[...], 0.0)
    o = jnp.dot(h, w3_ref[...], preferred_element_type=jnp.float32) + b3_ref[...]
    o_ref[...] = o.astype(o_ref.dtype)


# ------------------------------- stage wrappers ------------------------------

def conv_relu_pool(x_nhwc, w_pad, b_pad, cout):
    """Valid 5x5 conv + bias + ReLU + 2x2/2 maxpool, fully fused in one kernel.

    x_nhwc: (B, H, W, Cin) f32. w_pad: (K_pad, 128) pre-permuted/padded weight with
    row order (kh, kw, cin). b_pad: (1, 128). Returns (B, PH, PW, cout) NHWC.
    """
    B, H, W, C = x_nhwc.shape
    KH = KW = 5
    OH, OW = H - KH + 1, W - KW + 1
    PH, PW = OH // 2, OW // 2

    # Patch extraction (thin JAX glue on tiny tensors).
    # TODO(synk): move patch construction in-kernel (shifted pl.ds windows on a
    # VMEM-resident NHWC tile) to avoid the ~25x activation replication for
    # large-batch use.
    slabs = [x_nhwc[:, i:i + OH, j:j + OW, :] for i in range(KH) for j in range(KW)]
    cols = jnp.stack(slabs, axis=3).reshape(B, OH, OW, KH * KW * C)

    K = KH * KW * C
    K_pad, N_pad = w_pad.shape
    M = B * PH * PW
    M_pad, TM = _choose_tile(M)

    # One im2col matrix per 2x2 pool-window position (dy, dx), zero-padded to
    # aligned (M_pad, K_pad).
    pool_cols = []
    for dy in range(2):
        for dx in range(2):
            c = cols[:, dy::2, dx::2, :].reshape(M, K)
            pool_cols.append(jnp.pad(c, ((0, M_pad - M), (0, K_pad - K))))

    cols_spec = pl.BlockSpec((TM, K_pad), lambda i: (i, 0))
    out = pl.pallas_call(
        _conv_relu_pool_kernel,
        out_shape=jax.ShapeDtypeStruct((M_pad, N_pad), jnp.float32),
        grid=(M_pad // TM,),
        in_specs=[cols_spec] * 4 + [
            pl.BlockSpec((K_pad, N_pad), lambda i: (0, 0)),   # resident weight
            pl.BlockSpec((1, N_pad), lambda i: (0, 0)),       # resident bias
        ],
        out_specs=pl.BlockSpec((TM, N_pad), lambda i: (i, 0)),
        compiler_params=pltpu.CompilerParams(dimension_semantics=("parallel",)),
    )(*pool_cols, w_pad, b_pad)

    return out[:M, :cout].reshape(B, PH, PW, cout)


def fc_head(x_flat, p, num_classes):
    """Fused fc1->fc2->fc3 head. x_flat: (B, 400) f32 (NHWC flatten order)."""
    B, K = x_flat.shape
    K_pad = p["fc1_w"].shape[0]
    B_pad = _round_up(B, _SUBLANE)
    TB = min(256, B_pad)
    B_pad = _round_up(B_pad, TB)
    x_p = jnp.pad(x_flat, ((0, B_pad - B), (0, K_pad - K)))

    resident = lambda i: (0, 0)
    out = pl.pallas_call(
        _fc_head_kernel,
        out_shape=jax.ShapeDtypeStruct((B_pad, _LANE), jnp.float32),
        grid=(B_pad // TB,),
        in_specs=[
            pl.BlockSpec((TB, K_pad), lambda i: (i, 0)),
            pl.BlockSpec(p["fc1_w"].shape, resident),
            pl.BlockSpec(p["fc1_b"].shape, resident),
            pl.BlockSpec(p["fc2_w"].shape, resident),
            pl.BlockSpec(p["fc2_b"].shape, resident),
            pl.BlockSpec(p["fc3_w"].shape, resident),
            pl.BlockSpec(p["fc3_b"].shape, resident),
        ],
        out_specs=pl.BlockSpec((TB, _LANE), lambda i: (i, 0)),
        compiler_params=pltpu.CompilerParams(dimension_semantics=("parallel",)),
    )(x_p, p["fc1_w"], p["fc1_b"], p["fc2_w"], p["fc2_b"], p["fc3_w"], p["fc3_b"])

    return out[:B, :num_classes]


# --------------------------- parameters & weight prep ------------------------

def init_lenet_params(num_classes=10):
    """Deterministic synthetic parameters (PyTorch-default-like uniform init)."""
    key = jax.random.PRNGKey(42)
    ks = jax.random.split(key, 10)

    def uni(k, shape, fan_in):
        bound = 1.0 / jnp.sqrt(jnp.float32(fan_in))
        return jax.random.uniform(k, shape, jnp.float32, -bound, bound)

    return {
        "conv1_w": uni(ks[0], (6, 3, 5, 5), 3 * 5 * 5),
        "conv1_b": uni(ks[1], (6,), 3 * 5 * 5),
        "conv2_w": uni(ks[2], (16, 6, 5, 5), 6 * 5 * 5),
        "conv2_b": uni(ks[3], (16,), 6 * 5 * 5),
        "fc1_w": uni(ks[4], (120, 16 * 5 * 5), 16 * 5 * 5),
        "fc1_b": uni(ks[5], (120,), 16 * 5 * 5),
        "fc2_w": uni(ks[6], (84, 120), 120),
        "fc2_b": uni(ks[7], (84,), 120),
        "fc3_w": uni(ks[8], (num_classes, 84), 84),
        "fc3_b": uni(ks[9], (num_classes,), 84),
    }


def prepare_params(params):
    """One-time permute/transpose/zero-pad of torch-convention params."""
    def conv_prep(w, b):
        cout, cin, kh, kw = w.shape
        k = kh * kw * cin
        # matmul weight with row order (kh, kw, cin) to match NHWC im2col columns
        w_mat = jnp.transpose(w, (2, 3, 1, 0)).reshape(k, cout)
        return (_pad2d(w_mat, _round_up(k, _LANE), _LANE),
                _pad2d(b.reshape(1, cout), 1, _LANE))

    c1w, c1b = conv_prep(params["conv1_w"], params["conv1_b"])
    c2w, c2b = conv_prep(params["conv2_w"], params["conv2_b"])

    # fc1: fold torch's NCHW flatten order (c, ph, pw) into the weight so the
    # NHWC activation flatten (ph, pw, c) matches x.view(B, -1) exactly.
    f1 = params["fc1_w"].reshape(-1, 16, 5, 5).transpose(0, 2, 3, 1).reshape(-1, 400)
    return {
        "conv1_w": c1w, "conv1_b": c1b,
        "conv2_w": c2w, "conv2_b": c2b,
        "fc1_w": _pad2d(f1.T, _round_up(400, _LANE), _LANE),
        "fc1_b": _pad2d(params["fc1_b"].reshape(1, -1), 1, _LANE),
        "fc2_w": _pad2d(params["fc2_w"].T, _LANE, _LANE),
        "fc2_b": _pad2d(params["fc2_b"].reshape(1, -1), 1, _LANE),
        "fc3_w": _pad2d(params["fc3_w"].T, _LANE, _LANE),
        "fc3_b": _pad2d(params["fc3_b"].reshape(1, -1), 1, _LANE),
    }


# -------------------------------- LeNet forward ------------------------------

def lenet_forward(prepped, x, num_classes=10):
    # x: (B, 3, 32, 32) float32, NCHW (PyTorch convention)
    x = jnp.transpose(x, (0, 2, 3, 1))                                   # NHWC once
    x = conv_relu_pool(x, prepped["conv1_w"], prepped["conv1_b"], 6)     # (B,14,14,6)
    x = conv_relu_pool(x, prepped["conv2_w"], prepped["conv2_b"], 16)    # (B,5,5,16)
    B = x.shape[0]
    x = x.reshape(B, -1)   # (B, 400), NHWC order; fc1_w pre-permuted to match torch .view
    return fc_head(x, prepped, num_classes)                              # (B, num_classes)


# --------------------------- pure-JAX reference (check) ----------------------

def lenet_reference(params, x):
    dn = ("NCHW", "OIHW", "NCHW")
    hp = jax.lax.Precision.HIGHEST

    def conv(x, w, b):
        y = jax.lax.conv_general_dilated(x, w, (1, 1), "VALID",
                                         dimension_numbers=dn, precision=hp)
        return jax.nn.relu(y + b[None, :, None, None])

    def pool(x):
        return jnp.maximum(jnp.maximum(x[:, :, 0::2, 0::2], x[:, :, 0::2, 1::2]),
                           jnp.maximum(x[:, :, 1::2, 0::2], x[:, :, 1::2, 1::2]))

    x = pool(conv(x, params["conv1_w"], params["conv1_b"]))
    x = pool(conv(x, params["conv2_w"], params["conv2_b"]))
    x = x.reshape(x.shape[0], -1)
    x = jax.nn.relu(jnp.dot(x, params["fc1_w"].T, precision=hp) + params["fc1_b"])
    x = jax.nn.relu(jnp.dot(x, params["fc2_w"].T, precision=hp) + params["fc2_b"])
    return jnp.dot(x, params["fc3_w"].T, precision=hp) + params["fc3_b"]


if __name__ == "__main__":
    params = init_lenet_params(num_classes=10)
    prepped = prepare_params(params)
    x = jax.random.normal(jax.random.PRNGKey(0), (2, 3, 32, 32), dtype=jnp.float32)

    out = jax.jit(lenet_forward)(prepped, x)
    out = jax.block_until_ready(out)

    assert out.shape == (2, 10), out.shape
    assert out.dtype == jnp.float32, out.dtype

    ref = lenet_reference(params, x)
    assert bool(jnp.allclose(out, ref, atol=3e-2, rtol=3e-2)), (
        "mismatch vs reference: max abs err = %f" % float(jnp.max(jnp.abs(out - ref))))

    print("KERNEL_OK")
</pallas_src>

<mosaic_0001>
module attributes {stable_mosaic.version = 11 : i64} {
  func.func @_conv_relu_pool_kernel(%arg0: i32, %arg1: memref<512x128xf32, #tpu.memory_space<vmem>>, %arg2: memref<512x128xf32, #tpu.memory_space<vmem>>, %arg3: memref<512x128xf32, #tpu.memory_space<vmem>>, %arg4: memref<512x128xf32, #tpu.memory_space<vmem>>, %arg5: memref<128x128xf32, #tpu.memory_space<vmem>>, %arg6: memref<1x128xf32, #tpu.memory_space<vmem>>, %arg7: memref<512x128xf32, #tpu.memory_space<vmem>>) attributes {dimension_semantics = [#tpu.dimension_semantics<parallel>], iteration_bounds = array<i64: 1>, scalar_prefetch = 0 : i64, scratch_operands = 0 : i64, tpu.core_type = #tpu.core_type<tc>, window_params = [{transform_indices = @transform_0, window_bounds = array<i64: 512, 128>}, {transform_indices = @transform_1, window_bounds = array<i64: 512, 128>}, {transform_indices = @transform_2, window_bounds = array<i64: 512, 128>}, {transform_indices = @transform_3, window_bounds = array<i64: 512, 128>}, {pipeline_mode = #tpu.pipeline_mode<synchronous>, transform_indices = @transform_4, window_bounds = array<i64: 128, 128>}, {pipeline_mode = #tpu.pipeline_mode<synchronous>, transform_indices = @transform_5, window_bounds = array<i64: 1, 128>}, {transform_indices = @transform_6, window_bounds = array<i64: 512, 128>}]} {
    %c0 = arith.constant 0 : index
    %c0_0 = arith.constant 0 : index
    %0 = vector.load %arg5[%c0, %c0_0] : memref<128x128xf32, #tpu.memory_space<vmem>>, vector<128x128xf32>
    %c0_1 = arith.constant 0 : index
    %c0_2 = arith.constant 0 : index
    %1 = vector.load %arg1[%c0_1, %c0_2] : memref<512x128xf32, #tpu.memory_space<vmem>>, vector<512x128xf32>
    %cst = arith.constant dense<0.000000e+00> : vector<512x128xf32>
    %2 = tpu.matmul %1, %0, %cst {dimension_numbers = #tpu.dot_dimension_numbers<[1], [0], [0], [1], [0, 0, 1, 1], [], []>} : vector<512x128xf32>, vector<128x128xf32>, vector<512x128xf32> -> vector<512x128xf32>
    %c0_3 = arith.constant 0 : index
    %c0_4 = arith.constant 0 : index
    %3 = vector.load %arg2[%c0_3, %c0_4] : memref<512x128xf32, #tpu.memory_space<vmem>>, vector<512x128xf32>
    %cst_5 = arith.constant dense<0.000000e+00> : vector<512x128xf32>
    %4 = tpu.matmul %3, %0, %cst_5 {dimension_numbers = #tpu.dot_dimension_numbers<[1], [0], [0], [1], [0, 0, 1, 1], [], []>} : vector<512x128xf32>, vector<128x128xf32>, vector<512x128xf32> -> vector<512x128xf32>
    %5 = arith.maximumf %2, %4 : vector<512x128xf32>
    %c0_6 = arith.constant 0 : index
    %c0_7 = arith.constant 0 : index
    %6 = vector.load %arg3[%c0_6, %c0_7] : memref<512x128xf32, #tpu.memory_space<vmem>>, vector<512x128xf32>
    %cst_8 = arith.constant dense<0.000000e+00> : vector<512x128xf32>
    %7 = tpu.matmul %6, %0, %cst_8 {dimension_numbers = #tpu.dot_dimension_numbers<[1], [0], [0], [1], [0, 0, 1, 1], [], []>} : vector<512x128xf32>, vector<128x128xf32>, vector<512x128xf32> -> vector<512x128xf32>
    %8 = arith.maximumf %5, %7 : vector<512x128xf32>
    %c0_9 = arith.constant 0 : index
    %c0_10 = arith.constant 0 : index
    %9 = vector.load %arg4[%c0_9, %c0_10] : memref<512x128xf32, #tpu.memory_space<vmem>>, vector<512x128xf32>
    %cst_11 = arith.constant dense<0.000000e+00> : vector<512x128xf32>
    %10 = tpu.matmul %9, %0, %cst_11 {dimension_numbers = #tpu.dot_dimension_numbers<[1], [0], [0], [1], [0, 0, 1, 1], [], []>} : vector<512x128xf32>, vector<128x128xf32>, vector<512x128xf32> -> vector<512x128xf32>
    %11 = arith.maximumf %8, %10 : vector<512x128xf32>
    %c0_12 = arith.constant 0 : index
    %c0_13 = arith.constant 0 : index
    %12 = vector.load %arg6[%c0_12, %c0_13] : memref<1x128xf32, #tpu.memory_space<vmem>>, vector<1x128xf32>
    %13 = vector.broadcast %12 : vector<1x128xf32> to vector<512x128xf32>
    %14 = arith.addf %11, %13 : vector<512x128xf32>
    %cst_14 = arith.constant 0.000000e+00 : f32
    %15 = vector.broadcast %cst_14 : f32 to vector<512x128xf32>
    %16 = arith.maximumf %14, %15 : vector<512x128xf32>
    %c0_15 = arith.constant 0 : index
    %c0_16 = arith.constant 0 : index
    %17 = vector.load %arg7[%c0_15, %c0_16] : memref<512x128xf32, #tpu.memory_space<vmem>>, vector<512x128xf32>
    tpu.vector_store %arg7[%c0_15, %c0_16], %16 {strides = array<i32>} : memref<512x128xf32, #tpu.memory_space<vmem>>, vector<512x128xf32>,
    return
  }
  func.func @transform_0(%arg0: i32) -> (i32, i32) {
    %c0_i32 = arith.constant 0 : i32
    %c0_i32_0 = arith.constant 0 : i32
    return %arg0, %c0_i32 : i32, i32
  }
  func.func @transform_1(%arg0: i32) -> (i32, i32) {
    %c0_i32 = arith.constant 0 : i32
    %c0_i32_0 = arith.constant 0 : i32
    return %arg0, %c0_i32 : i32, i32
  }
  func.func @transform_2(%arg0: i32) -> (i32, i32) {
    %c0_i32 = arith.constant 0 : i32
    %c0_i32_0 = arith.constant 0 : i32
    return %arg0, %c0_i32 : i32, i32
  }
  func.func @transform_3(%arg0: i32) -> (i32, i32) {
    %c0_i32 = arith.constant 0 : i32
    %c0_i32_0 = arith.constant 0 : i32
    return %arg0, %c0_i32 : i32, i32
  }
  func.func @transform_4(%arg0: i32) -> (i32, i32) {
    %c0_i32 = arith.constant 0 : i32
    %c0_i32_0 = arith.constant 0 : i32
    %c0_i32_1 = arith.constant 0 : i32
    return %c0_i32, %c0_i32_0 : i32, i32
  }
  func.func @transform_5(%arg0: i32) -> (i32, i32) {
    %c0_i32 = arith.constant 0 : i32
    %c0_i32_0 = arith.constant 0 : i32
    %c0_i32_1 = arith.constant 0 : i32
    return %c0_i32, %c0_i32_0 : i32, i32
  }
  func.func @transform_6(%arg0: i32) -> (i32, i32) {
    %c0_i32 = arith.constant 0 : i32
    %c0_i32_0 = arith.constant 0 : i32
    return %arg0, %c0_i32 : i32, i32
  }
}

module attributes {stable_mosaic.version = 11 : i64} {
  func.func @_conv_relu_pool_kernel(%arg0: i32, %arg1: memref<128x256xf32, #tpu.memory_space<vmem>>, %arg2: memref<128x256xf32, #tpu.memory_space<vmem>>, %arg3: memref<128x256xf32, #tpu.memory_space<vmem>>, %arg4: memref<128x256xf32, #tpu.memory_space<vmem>>, %arg5: memref<256x128xf32, #tpu.memory_space<vmem>>, %arg6: memref<1x128xf32, #tpu.memory_space<vmem>>, %arg7: memref<128x128xf32, #tpu.memory_space<vmem>>) attributes {dimension_semantics = [#tpu.dimension_semantics<parallel>], iteration_bounds = array<i64: 1>, scalar_prefetch = 0 : i64, scratch_operands = 0 : i64, tpu.core_type = #tpu.core_type<tc>, window_params = [{transform_indices = @transform_0, window_bounds = array<i64: 128, 256>}, {transform_indices = @transform_1, window_bounds = array<i64: 128, 256>}, {transform_indices = @transform_2, window_bounds = array<i64: 128, 256>}, {transform_indices = @transform_3, window_bounds = array<i64: 128, 256>}, {pipeline_mode = #tpu.pipeline_mode<synchronous>, transform_indices = @transform_4, window_bounds = array<i64: 256, 128>}, {pipeline_mode = #tpu.pipeline_mode<synchronous>, transform_indices = @transform_5, window_bounds = array<i64: 1, 128>}, {transform_indices = @transform_6, window_bounds = array<i64: 128, 128>}]} {
    %c0 = arith.constant 0 : index
    %c0_0 = arith.constant 0 : index
    %0 = vector.load %arg5[%c0, %c0_0] : memref<256x128xf32, #tpu.memory_space<vmem>>, vector<256x128xf32>
    %c0_1 = arith.constant 0 : index
    %c0_2 = arith.constant 0 : index
    %1 = vector.load %arg1[%c0_1, %c0_2] : memref<128x256xf32, #tpu.memory_space<vmem>>, vector<128x256xf32>
    %cst = arith.constant dense<0.000000e+00> : vector<128x128xf32>
    %2 = tpu.matmul %1, %0, %cst {dimension_numbers = #tpu.dot_dimension_numbers<[1], [0], [0], [1], [0, 0, 1, 1], [], []>} : vector<128x256xf32>, vector<256x128xf32>, vector<128x128xf32> -> vector<128x128xf32>
    %c0_3 = arith.constant 0 : index
    %c0_4 = arith.constant 0 : index
    %3 = vector.load %arg2[%c0_3, %c0_4] : memref<128x256xf32, #tpu.memory_space<vmem>>, vector<128x256xf32>
    %cst_5 = arith.constant dense<0.000000e+00> : vector<128x128xf32>
    %4 = tpu.matmul %3, %0, %cst_5 {dimension_numbers = #tpu.dot_dimension_numbers<[1], [0], [0], [1], [0, 0, 1, 1], [], []>} : vector<128x256xf32>, vector<256x128xf32>, vector<128x128xf32> -> vector<128x128xf32>
    %5 = arith.maximumf %2, %4 : vector<128x128xf32>
    %c0_6 = arith.constant 0 : index
    %c0_7 = arith.constant 0 : index
    %6 = vector.load %arg3[%c0_6, %c0_7] : memref<128x256xf32, #tpu.memory_space<vmem>>, vector<128x256xf32>
    %cst_8 = arith.constant dense<0.000000e+00> : vector<128x128xf32>
    %7 = tpu.matmul %6, %0, %cst_8 {dimension_numbers = #tpu.dot_dimension_numbers<[1], [0], [0], [1], [0, 0, 1, 1], [], []>} : vector<128x256xf32>, vector<256x128xf32>, vector<128x128xf32> -> vector<128x128xf32>
    %8 = arith.maximumf %5, %7 : vector<128x128xf32>
    %c0_9 = arith.constant 0 : index
    %c0_10 = arith.constant 0 : index
    %9 = vector.load %arg4[%c0_9, %c0_10] : memref<128x256xf32, #tpu.memory_space<vmem>>, vector<128x256xf32>
    %cst_11 = arith.constant dense<0.000000e+00> : vector<128x128xf32>
    %10 = tpu.matmul %9, %0, %cst_11 {dimension_numbers = #tpu.dot_dimension_numbers<[1], [0], [0], [1], [0, 0, 1, 1], [], []>} : vector<128x256xf32>, vector<256x128xf32>, vector<128x128xf32> -> vector<128x128xf32>
    %11 = arith.maximumf %8, %10 : vector<128x128xf32>
    %c0_12 = arith.constant 0 : index
    %c0_13 = arith.constant 0 : index
    %12 = vector.load %arg6[%c0_12, %c0_13] : memref<1x128xf32, #tpu.memory_space<vmem>>, vector<1x128xf32>
    %13 = vector.broadcast %12 : vector<1x128xf32> to vector<128x128xf32>
    %14 = arith.addf %11, %13 : vector<128x128xf32>
    %cst_14 = arith.constant 0.000000e+00 : f32
    %15 = vector.broadcast %cst_14 : f32 to vector<128x128xf32>
    %16 = arith.maximumf %14, %15 : vector<128x128xf32>
    %c0_15 = arith.constant 0 : index
    %c0_16 = arith.constant 0 : index
    %17 = vector.load %arg7[%c0_15, %c0_16] : memref<128x128xf32, #tpu.memory_space<vmem>>, vector<128x128xf32>
    tpu.vector_store %arg7[%c0_15, %c0_16], %16 {strides = array<i32>} : memref<128x128xf32, #tpu.memory_space<vmem>>, vector<128x128xf32>,
    return
  }
  func.func @transform_0(%arg0: i32) -> (i32, i32) {
    %c0_i32 = arith.constant 0 : i32
    %c0_i32_0 = arith.constant 0 : i32
    return %arg0, %c0_i32 : i32, i32
  }
  func.func @transform_1(%arg0: i32) -> (i32, i32) {
    %c0_i32 = arith.constant 0 : i32
    %c0_i32_0 = arith.constant 0 : i32
    return %arg0, %c0_i32 : i32, i32
  }
  func.func @transform_2(%arg0: i32) -> (i32, i32) {
    %c0_i32 = arith.constant 0 : i32
    %c0_i32_0 = arith.constant 0 : i32
    return %arg0, %c0_i32 : i32, i32
  }
  func.func @transform_3(%arg0: i32) -> (i32, i32) {
    %c0_i32 = arith.constant 0 : i32
    %c0_i32_0 = arith.constant 0 : i32
    return %arg0, %c0_i32 : i32, i32
  }
  func.func @transform_4(%arg0: i32) -> (i32, i32) {
    %c0_i32 = arith.constant 0 : i32
    %c0_i32_0 = arith.constant 0 : i32
    %c0_i32_1 = arith.constant 0 : i32
    return %c0_i32, %c0_i32_0 : i32, i32
  }
  func.func @transform_5(%arg0: i32) -> (i32, i32) {
    %c0_i32 = arith.constant 0 : i32
    %c0_i32_0 = arith.constant 0 : i32
    %c0_i32_1 = arith.constant 0 : i32
    return %c0_i32, %c0_i32_0 : i32, i32
  }
  func.func @transform_6(%arg0: i32) -> (i32, i32) {
    %c0_i32 = arith.constant 0 : i32
    %c0_i32_0 = arith.constant 0 : i32
    return %arg0, %c0_i32 : i32, i32
  }
}

module attributes {stable_mosaic.version = 11 : i64} {
  func.func @_fc_head_kernel(%arg0: i32, %arg1: memref<8x512xf32, #tpu.memory_space<vmem>>, %arg2: memref<512x128xf32, #tpu.memory_space<vmem>>, %arg3: memref<1x128xf32, #tpu.memory_space<vmem>>, %arg4: memref<128x128xf32, #tpu.memory_space<vmem>>, %arg5: memref<1x128xf32, #tpu.memory_space<vmem>>, %arg6: memref<128x128xf32, #tpu.memory_space<vmem>>, %arg7: memref<1x128xf32, #tpu.memory_space<vmem>>, %arg8: memref<8x128xf32, #tpu.memory_space<vmem>>) attributes {dimension_semantics = [#tpu.dimension_semantics<parallel>], iteration_bounds = array<i64: 1>, scalar_prefetch = 0 : i64, scratch_operands = 0 : i64, tpu.core_type = #tpu.core_type<tc>, window_params = [{transform_indices = @transform_0, window_bounds = array<i64: 8, 512>}, {pipeline_mode = #tpu.pipeline_mode<synchronous>, transform_indices = @transform_1, window_bounds = array<i64: 512, 128>}, {pipeline_mode = #tpu.pipeline_mode<synchronous>, transform_indices = @transform_2, window_bounds = array<i64: 1, 128>}, {pipeline_mode = #tpu.pipeline_mode<synchronous>, transform_indices = @transform_3, window_bounds = array<i64: 128, 128>}, {pipeline_mode = #tpu.pipeline_mode<synchronous>, transform_indices = @transform_4, window_bounds = array<i64: 1, 128>}, {pipeline_mode = #tpu.pipeline_mode<synchronous>, transform_indices = @transform_5, window_bounds = array<i64: 128, 128>}, {pipeline_mode = #tpu.pipeline_mode<synchronous>, transform_indices = @transform_6, window_bounds = array<i64: 1, 128>}, {transform_indices = @transform_7, window_bounds = array<i64: 8, 128>}]} {
    %c0 = arith.constant 0 : index
    %c0_0 = arith.constant 0 : index
    %0 = vector.load %arg1[%c0, %c0_0] : memref<8x512xf32, #tpu.memory_space<vmem>>, vector<8x512xf32>
    %c0_1 = arith.constant 0 : index
    %c0_2 = arith.constant 0 : index
    %1 = vector.load %arg2[%c0_1, %c0_2] : memref<512x128xf32, #tpu.memory_space<vmem>>, vector<512x128xf32>
    %cst = arith.constant dense<0.000000e+00> : vector<8x128xf32>
    %2 = tpu.matmul %0, %1, %cst {dimension_numbers = #tpu.dot_dimension_numbers<[1], [0], [0], [1], [0, 0, 1, 1], [], []>} : vector<8x512xf32>, vector<512x128xf32>, vector<8x128xf32> -> vector<8x128xf32>
    %c0_3 = arith.constant 0 : index
    %c0_4 = arith.constant 0 : index
    %3 = vector.load %arg3[%c0_3, %c0_4] : memref<1x128xf32, #tpu.memory_space<vmem>>, vector<1x128xf32>
    %4 = vector.broadcast %3 : vector<1x128xf32> to vector<8x128xf32>
    %5 = arith.addf %2, %4 : vector<8x128xf32>
    %cst_5 = arith.constant 0.000000e+00 : f32
    %6 = vector.broadcast %cst_5 : f32 to vector<8x128xf32>
    %7 = arith.maximumf %5, %6 : vector<8x128xf32>
    %c0_6 = arith.constant 0 : index
    %c0_7 = arith.constant 0 : index
    %8 = vector.load %arg4[%c0_6, %c0_7] : memref<128x128xf32, #tpu.memory_space<vmem>>, vector<128x128xf32>
    %cst_8 = arith.constant dense<0.000000e+00> : vector<8x128xf32>
    %9 = tpu.matmul %7, %8, %cst_8 {dimension_numbers = #tpu.dot_dimension_numbers<[1], [0], [0], [1], [0, 0, 1, 1], [], []>} : vector<8x128xf32>, vector<128x128xf32>, vector<8x128xf32> -> vector<8x128xf32>
    %c0_9 = arith.constant 0 : index
    %c0_10 = arith.constant 0 : index
    %10 = vector.load %arg5[%c0_9, %c0_10] : memref<1x128xf32, #tpu.memory_space<vmem>>, vector<1x128xf32>
    %11 = vector.broadcast %10 : vector<1x128xf32> to vector<8x128xf32>
    %12 = arith.addf %9, %11 : vector<8x128xf32>
    %cst_11 = arith.constant 0.000000e+00 : f32
    %13 = vector.broadcast %cst_11 : f32 to vector<8x128xf32>
    %14 = arith.maximumf %12, %13 : vector<8x128xf32>
    %c0_12 = arith.constant 0 : index
    %c0_13 = arith.constant 0 : index
    %15 = vector.load %arg6[%c0_12, %c0_13] : memref<128x128xf32, #tpu.memory_space<vmem>>, vector<128x128xf32>
    %cst_14 = arith.constant dense<0.000000e+00> : vector<8x128xf32>
    %16 = tpu.matmul %14, %15, %cst_14 {dimension_numbers = #tpu.dot_dimension_numbers<[1], [0], [0], [1], [0, 0, 1, 1], [], []>} : vector<8x128xf32>, vector<128x128xf32>, vector<8x128xf32> -> vector<8x128xf32>
    %c0_15 = arith.constant 0 : index
    %c0_16 = arith.constant 0 : index
    %17 = vector.load %arg7[%c0_15, %c0_16] : memref<1x128xf32, #tpu.memory_space<vmem>>, vector<1x128xf32>
    %18 = vector.broadcast %17 : vector<1x128xf32> to vector<8x128xf32>
    %19 = arith.addf %16, %18 : vector<8x128xf32>
    %c0_17 = arith.constant 0 : index
    %c0_18 = arith.constant 0 : index
    %20 = vector.load %arg8[%c0_17, %c0_18] : memref<8x128xf32, #tpu.memory_space<vmem>>, vector<8x128xf32>
    tpu.vector_store %arg8[%c0_17, %c0_18], %19 {strides = array<i32>} : memref<8x128xf32, #tpu.memory_space<vmem>>, vector<8x128xf32>,
    return
  }
  func.func @transform_0(%arg0: i32) -> (i32, i32) {
    %c0_i32 = arith.constant 0 : i32
    %c0_i32_0 = arith.constant 0 : i32
    return %arg0, %c0_i32 : i32, i32
  }
  func.func @transform_1(%arg0: i32) -> (i32, i32) {
    %c0_i32 = arith.constant 0 : i32
    %c0_i32_0 = arith.constant 0 : i32
    %c0_i32_1 = arith.constant 0 : i32
    return %c0_i32, %c0_i32_0 : i32, i32
  }
  func.func @transform_2(%arg0: i32) -> (i32, i32) {
    %c0_i32 = arith.constant 0 : i32
    %c0_i32_0 = arith.constant 0 : i32
    %c0_i32_1 = arith.constant 0 : i32
    return %c0_i32, %c0_i32_0 : i32, i32
  }
  func.func @transform_3(%arg0: i32) -> (i32, i32) {
    %c0_i32 = arith.constant 0 : i32
    %c0_i32_0 = arith.constant 0 : i32
    %c0_i32_1 = arith.constant 0 : i32
    return %c0_i32, %c0_i32_0 : i32, i32
  }
  func.func @transform_4(%arg0: i32) -> (i32, i32) {
    %c0_i32 = arith.constant 0 : i32
    %c0_i32_0 = arith.constant 0 : i32
    %c0_i32_1 = arith.constant 0 : i32
    return %c0_i32, %c0_i32_0 : i32, i32
  }
  func.func @transform_5(%arg0: i32) -> (i32, i32) {
    %c0_i32 = arith.constant 0 : i32
    %c0_i32_0 = arith.constant 0 : i32
    %c0_i32_1 = arith.constant 0 : i32
    return %c0_i32, %c0_i32_0 : i32, i32
  }
  func.func @transform_6(%arg0: i32) -> (i32, i32) {
    %c0_i32 = arith.constant 0 : i32
    %c0_i32_0 = arith.constant 0 : i32
    %c0_i32_1 = arith.constant 0 : i32
    return %c0_i32, %c0_i32_0 : i32, i32
  }
  func.func @transform_7(%arg0: i32) -> (i32, i32) {
    %c0_i32 = arith.constant 0 : i32
    %c0_i32_0 = arith.constant 0 : i32
    return %arg0, %c0_i32 : i32, i32
  }
}

</mosaic_0001>

<bundles_post_ra>
// kernel: lenet_forward.3
= control target key start
LH: loop header
LB: loop body
LE: loop exit
PB: predicated region body
PF: predicated region fallthrough
CT: control target
= control target key end

     0   :  { %s2642_s4 = inlined_call_operand.vmem [shape: f32[128,128], index: 4, kind: input, shape index: {}]   ;;  %s2643_s2 = inlined_call_operand.vmem [shape: f32[512,128], index: 2, kind: input, shape index: {}]   ;;  %s2644_s3 = inlined_call_operand.vmem [shape: f32[512,128], index: 3, kind: input, shape index: {}]   ;;  %s2645_s0 = inlined_call_operand.vmem [shape: f32[512,128], index: 0, kind: input, shape index: {}]   ;;  %s2646_s1 = inlined_call_operand.vmem [shape: f32[512,128], index: 1, kind: input, shape index: {}]   ;;  %s2647_s5 = inlined_call_operand.vmem [shape: f32[1,128], index: 5, kind: input, shape index: {}]   ;;  %s2648_s6 = inlined_call_operand.vmem [shape: f32[512,128], index: 6, kind: output, shape index: {}]  }
   0x1   :  { %v38_v0 = vld [vmem:[%s2642_s4 + $0x78] sm:$0xff]  ;;  %v37_v1 = vld [vmem:[%s2642_s4 + $0x70] sm:$0xff]  ;;  %v36_v2 = vld [vmem:[%s2642_s4 + $0x68] sm:$0xff] }
   0x2   :  { %713 = vmatpush.msra.mxu2 %v38_v0  ;;  %1050 = vmatpush.msra.mxu3 %v38_v0  ;;  %v35_v3 = vld [vmem:[%s2642_s4 + $0x60] sm:$0xff]  ;;  %v34_v4 = vld [vmem:[%s2642_s4 + $0x58] sm:$0xff]  ;;  %v33_v5 = vld [vmem:[%s2642_s4 + $0x50] sm:$0xff] }
   0x3   :  { %103 = vmatpush.msra.mxu0 %v38_v0  ;;  %376 = vmatpush.msra.mxu1 %v38_v0  ;;  %v32_v6 = vld [vmem:[%s2642_s4 + $0x48] sm:$0xff]  ;;  %v31_v7 = vld [vmem:[%s2642_s4 + $0x40] sm:$0xff]  ;;  %v30_v8 = vld [vmem:[%s2642_s4 + $0x38] sm:$0xff] }
   0x4   :  { %714 = vmatpush.msra.mxu2 %v37_v1  ;;  %1051 = vmatpush.msra.mxu3 %v37_v1  ;;  %v29_v9 = vld [vmem:[%s2642_s4 + $0x30] sm:$0xff]  ;;  %v28_v10 = vld [vmem:[%s2642_s4 + $0x28] sm:$0xff]  ;;  %v27_v11 = vld [vmem:[%s2642_s4 + $0x20] sm:$0xff] }
   0x5   :  { %104 = vmatpush.msra.mxu0 %v37_v1  ;;  %377 = vmatpush.msra.mxu1 %v37_v1  ;;  %v26_v12 = vld [vmem:[%s2642_s4 + $0x18] sm:$0xff]  ;;  %v25_v13 = vld [vmem:[%s2642_s4 + $0x10] sm:$0xff]  ;;  %v24_v14 = vld [vmem:[%s2642_s4 + $0x8] sm:$0xff] }
   0x6   :  { %715 = vmatpush.msra.mxu2 %v36_v2  ;;  %1052 = vmatpush.msra.mxu3 %v36_v2  ;;  %v23_v15 = vld [vmem:[%s2642_s4] sm:$0xff]  ;;  %v650_v20 = vld [vmem:[%s2643_s2 + $0x8] sm:$0xff]  ;;  %v651_v24 = vld [vmem:[%s2643_s2 + $0x10] sm:$0xff] }
   0x7   :  { %105 = vmatpush.msra.mxu0 %v36_v2  ;;  %378 = vmatpush.msra.mxu1 %v36_v2  ;;  %v649_v16 = vld [vmem:[%s2643_s2] sm:$0xff]  ;;  %v987_v21 = vld [vmem:[%s2644_s3 + $0x8] sm:$0xff]  ;;  %v988_v25 = vld [vmem:[%s2644_s3 + $0x10] sm:$0xff] }
   0x8   :  { %716 = vmatpush.msra.mxu2 %v35_v3  ;;  %1053 = vmatpush.msra.mxu3 %v35_v3  ;;  %v986_v17 = vld [vmem:[%s2644_s3] sm:$0xff]  ;;  %v40_v22 = vld [vmem:[%s2645_s0 + $0x8] sm:$0xff]  ;;  %v41_v26 = vld [vmem:[%s2645_s0 + $0x10] sm:$0xff] }
   0x9   :  { %106 = vmatpush.msra.mxu0 %v35_v3  ;;  %379 = vmatpush.msra.mxu1 %v35_v3  ;;  %v39_v18 = vld [vmem:[%s2645_s0] sm:$0xff]  ;;  %v313_v23 = vld [vmem:[%s2646_s1 + $0x8] sm:$0xff]  ;;  %v314_v27 = vld [vmem:[%s2646_s1 + $0x10] sm:$0xff] }
   0xa   :  { %717 = vmatpush.msra.mxu2 %v34_v4  ;;  %1054 = vmatpush.msra.mxu3 %v34_v4  ;;  %v312_v19 = vld [vmem:[%s2646_s1] sm:$0xff]  ;;  %v652_v28 = vld [vmem:[%s2643_s2 + $0x18] sm:$0xff]  ;;  %v654_v36 = vld [vmem:[%s2643_s2 + $0x28] sm:$0xff] }
   0xb   :  { %107 = vmatpush.msra.mxu0 %v34_v4  ;;  %380 = vmatpush.msra.mxu1 %v34_v4  ;;  %v989_v29 = vld [vmem:[%s2644_s3 + $0x18] sm:$0xff]  ;;  %v653_v32 = vld [vmem:[%s2643_s2 + $0x20] sm:$0xff]  ;;  %v991_v37 = vld [vmem:[%s2644_s3 + $0x28] sm:$0xff] }
   0xc   :  { %718 = vmatpush.msra.mxu2 %v33_v5  ;;  %1055 = vmatpush.msra.mxu3 %v33_v5  ;;  %v42_v30 = vld [vmem:[%s2645_s0 + $0x18] sm:$0xff]  ;;  %v990_v33 = vld [vmem:[%s2644_s3 + $0x20] sm:$0xff]  ;;  %v44_v38 = vld [vmem:[%s2645_s0 + $0x28] sm:$0xff] }
   0xd   :  { %108 = vmatpush.msra.mxu0 %v33_v5  ;;  %381 = vmatpush.msra.mxu1 %v33_v5  ;;  %v315_v31 = vld [vmem:[%s2646_s1 + $0x18] sm:$0xff]  ;;  %v43_v34 = vld [vmem:[%s2645_s0 + $0x20] sm:$0xff]  ;;  %v317_v39 = vld [vmem:[%s2646_s1 + $0x28] sm:$0xff] }
   0xe   :  { %719 = vmatpush.msra.mxu2 %v32_v6  ;;  %1056 = vmatpush.msra.mxu3 %v32_v6  ;;  %v316_v35 = vld [vmem:[%s2646_s1 + $0x20] sm:$0xff]  ;;  %v655_v40 = vld [vmem:[%s2643_s2 + $0x30] sm:$0xff]  ;;  %v656_v44 = vld [vmem:[%s2643_s2 + $0x38] sm:$0xff] }
   0xf   :  { %109 = vmatpush.msra.mxu0 %v32_v6  ;;  %382 = vmatpush.msra.mxu1 %v32_v6  ;;  %v992_v41 = vld [vmem:[%s2644_s3 + $0x30] sm:$0xff]  ;;  %v993_v45 = vld [vmem:[%s2644_s3 + $0x38] sm:$0xff]  ;;  %v657_v48 = vld [vmem:[%s2643_s2 + $0x40] sm:$0xff] }
  0x10   :  { %720 = vmatpush.msra.mxu2 %v31_v7  ;;  %1057 = vmatpush.msra.mxu3 %v31_v7  ;;  %v45_v42 = vld [vmem:[%s2645_s0 + $0x30] sm:$0xff]  ;;  %v46_v46 = vld [vmem:[%s2645_s0 + $0x38] sm:$0xff]  ;;  %v994_v49 = vld [vmem:[%s2644_s3 + $0x40] sm:$0xff] }
  0x11   :  { %110 = vmatpush.msra.mxu0 %v31_v7  ;;  %383 = vmatpush.msra.mxu1 %v31_v7  ;;  %v318_v43 = vld [vmem:[%s2646_s1 + $0x30] sm:$0xff]  ;;  %v319_v47 = vld [vmem:[%s2646_s1 + $0x38] sm:$0xff]  ;;  %v47_v50 = vld [vmem:[%s2645_s0 + $0x40] sm:$0xff] }
  0x12   :  { %721 = vmatpush.msra.mxu2 %v30_v8  ;;  %1058 = vmatpush.msra.mxu3 %v30_v8  ;;  %v320_v51 = vld [vmem:[%s2646_s1 + $0x40] sm:$0xff]  ;;  %v658_v52 = vld [vmem:[%s2643_s2 + $0x48] sm:$0xff]  ;;  %v659_v56 = vld [vmem:[%s2643_s2 + $0x50] sm:$0xff] }
  0x13   :  { %111 = vmatpush.msra.mxu0 %v30_v8  ;;  %384 = vmatpush.msra.mxu1 %v30_v8  ;;  %v995_v53 = vld [vmem:[%s2644_s3 + $0x48] sm:$0xff]  ;;  %v996_v57 = vld [vmem:[%s2644_s3 + $0x50] sm:$0xff]  ;;  %v660_v60 = vld [vmem:[%s2643_s2 + $0x58] sm:$0xff] }
  0x14   :  { %722 = vmatpush.msra.mxu2 %v29_v9  ;;  %1059 = vmatpush.msra.mxu3 %v29_v9  ;;  %v48_v54 = vld [vmem:[%s2645_s0 + $0x48] sm:$0xff]  ;;  %v49_v58 = vld [vmem:[%s2645_s0 + $0x50] sm:$0xff]  ;;  %v997_v61 = vld [vmem:[%s2644_s3 + $0x58] sm:$0xff] }
  0x15   :  { %112 = vmatpush.msra.mxu0 %v29_v9  ;;  %385 = vmatpush.msra.mxu1 %v29_v9  ;;  %v321_v55 = vld [vmem:[%s2646_s1 + $0x48] sm:$0xff]  ;;  %v322_v59 = vld [vmem:[%s2646_s1 + $0x50] sm:$0xff]  ;;  %v50_v62 = vld [vmem:[%s2645_s0 + $0x58] sm:$0xff] }
  0x16   :  { %723 = vmatpush.msra.mxu2 %v28_v10  ;;  %1060 = vmatpush.msra.mxu3 %v28_v10  ;;  %v323_v63 = vld [vmem:[%s2646_s1 + $0x58] sm:$0xff]  ;;  %v661_v0 = vld [vmem:[%s2643_s2 + $0x60] sm:$0xff]  ;;  %v662_v4 = vld [vmem:[%s2643_s2 + $0x68] sm:$0xff] }
  0x17   :  { %113 = vmatpush.msra.mxu0 %v28_v10  ;;  %386 = vmatpush.msra.mxu1 %v28_v10  ;;  %v998_v1 = vld [vmem:[%s2644_s3 + $0x60] sm:$0xff]  ;;  %v999_v5 = vld [vmem:[%s2644_s3 + $0x68] sm:$0xff]  ;;  %v663_v8 = vld [vmem:[%s2643_s2 + $0x70] sm:$0xff] }
  0x18   :  { %724 = vmatpush.msra.mxu2 %v27_v11  ;;  %1061 = vmatpush.msra.mxu3 %v27_v11  ;;  %v51_v2 = vld [vmem:[%s2645_s0 + $0x60] sm:$0xff]  ;;  %v52_v6 = vld [vmem:[%s2645_s0 + $0x68] sm:$0xff]  ;;  %v1000_v9 = vld [vmem:[%s2644_s3 + $0x70] sm:$0xff] }
  0x19   :  { %114 = vmatpush.msra.mxu0 %v27_v11  ;;  %387 = vmatpush.msra.mxu1 %v27_v11  ;;  %v324_v3 = vld [vmem:[%s2646_s1 + $0x60] sm:$0xff]  ;;  %v325_v7 = vld [vmem:[%s2646_s1 + $0x68] sm:$0xff]  ;;  %v53_v10 = vld [vmem:[%s2645_s0 + $0x70] sm:$0xff] }
  0x1a   :  { %725 = vmatpush.msra.mxu2 %v26_v12  ;;  %1062 = vmatpush.msra.mxu3 %v26_v12  ;;  %v326_v11 = vld [vmem:[%s2646_s1 + $0x70] sm:$0xff] }
  0x1b   :  { %115 = vmatpush.msra.mxu0 %v26_v12  ;;  %388 = vmatpush.msra.mxu1 %v26_v12  ;;  %v664_v12 = vld [vmem:[%s2643_s2 + $0x78] sm:$0xff] }
  0x1c   :  { %726 = vmatpush.msra.mxu2 %v25_v13  ;;  %1063 = vmatpush.msra.mxu3 %v25_v13 }
  0x1d   :  { %116 = vmatpush.msra.mxu0 %v25_v13  ;;  %389 = vmatpush.msra.mxu1 %v25_v13  ;;  %v1001_v13 = vld [vmem:[%s2644_s3 + $0x78] sm:$0xff] }
  0x1e   :  { %727 = vmatpush.msra.mxu2 %v24_v14  ;;  %1064 = vmatpush.msra.mxu3 %v24_v14 }
  0x1f   :  { %117 = vmatpush.msra.mxu0 %v24_v14  ;;  %390 = vmatpush.msra.mxu1 %v24_v14  ;;  %v54_v14 = vld [vmem:[%s2645_s0 + $0x78] sm:$0xff] }
  0x20   :  { %728 = vmatpush.msra.mxu2 %v23_v15  ;;  %1065 = vmatpush.msra.mxu3 %v23_v15 }
  0x21   :  { %729 = vmatmul.f32.vlgmr.msra.gmra.mxu2 %v649_v16  ;;  %1066 = vmatmul.f32.vlgmr.msra.gmra.mxu3 %v986_v17  ;;  %v665_v16 = vld [vmem:[%s2643_s2 + $0x80] sm:$0xff] }
  0x22   :  { %118 = vmatpush.msra.mxu0 %v23_v15  ;;  %391 = vmatpush.msra.mxu1 %v23_v15  ;;  %v327_v15 = vld [vmem:[%s2646_s1 + $0x78] sm:$0xff]  ;;  %v1002_v17 = vld [vmem:[%s2644_s3 + $0x80] sm:$0xff] }
  0x23   :  { %119 = vmatmul.f32.vlgmr.msra.gmra.mxu0 %v39_v18  ;;  %392 = vmatmul.f32.vlgmr.msra.gmra.mxu1 %v312_v19 }
  0x29   :  { %732 = vmatmul.f32.gmra.mxu2 %v650_v20  ;;  %1069 = vmatmul.f32.gmra.mxu3 %v987_v21  ;;  %v55_v20 = vld [vmem:[%s2645_s0 + $0x80] sm:$0xff] }
  0x2a   :  { %v328_v21 = vld [vmem:[%s2646_s1 + $0x80] sm:$0xff] }
  0x2b   :  { %122 = vmatmul.f32.gmra.mxu0 %v40_v22  ;;  %395 = vmatmul.f32.gmra.mxu1 %v313_v23 }
  0x31   :  { %735 = vmatmul.f32.gmra.mxu2 %v651_v24  ;;  %1072 = vmatmul.f32.gmra.mxu3 %v988_v25 }
  0x33   :  { %125 = vmatmul.f32.gmra.mxu0 %v41_v26  ;;  %398 = vmatmul.f32.gmra.mxu1 %v314_v27  ;;  %v1815_v26 = vld [vmem:[%s2647_s5] ss:$0 sm:$0xff]  ;;  %v666_v27 = vld [vmem:[%s2643_s2 + $0x88] sm:$0xff] }
  0x39   :  { %738 = vmatmul.f32.gmra.mxu2 %v652_v28  ;;  %1075 = vmatmul.f32.gmra.mxu3 %v989_v29  ;;  %v1003_v28 = vld [vmem:[%s2644_s3 + $0x88] sm:$0xff] }
  0x3b   :  { %128 = vmatmul.f32.gmra.mxu0 %v42_v30  ;;  %401 = vmatmul.f32.gmra.mxu1 %v315_v31 }
  0x41   :  { %741 = vmatmul.f32.gmra.mxu2 %v653_v32  ;;  %1078 = vmatmul.f32.gmra.mxu3 %v990_v33  ;;  %v56_v32 = vld [vmem:[%s2645_s0 + $0x88] sm:$0xff] }
  0x42   :  { %v329_v33 = vld [vmem:[%s2646_s1 + $0x88] sm:$0xff] }
  0x43   :  { %131 = vmatmul.f32.gmra.mxu0 %v43_v34  ;;  %404 = vmatmul.f32.gmra.mxu1 %v316_v35 }
  0x49   :  { %744 = vmatmul.f32.gmra.mxu2 %v654_v36  ;;  %1081 = vmatmul.f32.gmra.mxu3 %v991_v37 }
  0x4b   :  { %134 = vmatmul.f32.gmra.mxu0 %v44_v38  ;;  %407 = vmatmul.f32.gmra.mxu1 %v317_v39 }
  0x51   :  { %747 = vmatmul.f32.gmra.mxu2 %v655_v40  ;;  %1084 = vmatmul.f32.gmra.mxu3 %v992_v41  ;;  %v667_v40 = vld [vmem:[%s2643_s2 + $0x90] sm:$0xff] }
  0x52   :  { %v1004_v41 = vld [vmem:[%s2644_s3 + $0x90] sm:$0xff] }
  0x53   :  { %137 = vmatmul.f32.gmra.mxu0 %v45_v42  ;;  %410 = vmatmul.f32.gmra.mxu1 %v318_v43 }
  0x59   :  { %750 = vmatmul.f32.gmra.mxu2 %v656_v44  ;;  %1087 = vmatmul.f32.gmra.mxu3 %v993_v45  ;;  %v57_v45 = vld [vmem:[%s2645_s0 + $0x90] sm:$0xff] }
  0x5b   :  { %140 = vmatmul.f32.gmra.mxu0 %v46_v46  ;;  %413 = vmatmul.f32.gmra.mxu1 %v319_v47  ;;  %v330_v46 = vld [vmem:[%s2646_s1 + $0x90] sm:$0xff] }
  0x61   :  { %753 = vmatmul.f32.gmra.mxu2 %v657_v48  ;;  %1090 = vmatmul.f32.gmra.mxu3 %v994_v49 }
  0x63   :  { %143 = vmatmul.f32.gmra.mxu0 %v47_v50  ;;  %416 = vmatmul.f32.gmra.mxu1 %v320_v51 }
  0x69   :  { %756 = vmatmul.f32.gmra.mxu2 %v658_v52  ;;  %1093 = vmatmul.f32.gmra.mxu3 %v995_v53  ;;  %v668_v53 = vld [vmem:[%s2643_s2 + $0x98] sm:$0xff] }
  0x6b   :  { %146 = vmatmul.f32.gmra.mxu0 %v48_v54  ;;  %419 = vmatmul.f32.gmra.mxu1 %v321_v55  ;;  %v1005_v54 = vld [vmem:[%s2644_s3 + $0x98] sm:$0xff] }
  0x71   :  { %759 = vmatmul.f32.gmra.mxu2 %v659_v56  ;;  %1096 = vmatmul.f32.gmra.mxu3 %v996_v57 }
  0x73   :  { %149 = vmatmul.f32.gmra.mxu0 %v49_v58  ;;  %422 = vmatmul.f32.gmra.mxu1 %v322_v59  ;;  %v58_v58 = vld [vmem:[%s2645_s0 + $0x98] sm:$0xff] }
  0x74   :  { %v331_v59 = vld [vmem:[%s2646_s1 + $0x98] sm:$0xff] }
  0x79   :  { %762 = vmatmul.f32.gmra.mxu2 %v660_v60  ;;  %1099 = vmatmul.f32.gmra.mxu3 %v997_v61 }
  0x7b   :  { %152 = vmatmul.f32.gmra.mxu0 %v50_v62  ;;  %425 = vmatmul.f32.gmra.mxu1 %v323_v63 }
  0x81   :  { %765 = vmatmul.f32.gmra.mxu2 %v661_v0  ;;  %1102 = vmatmul.f32.gmra.mxu3 %v998_v1 }
  0x83   :  { %155 = vmatmul.f32.gmra.mxu0 %v51_v2  ;;  %428 = vmatmul.f32.gmra.mxu1 %v324_v3  ;;  %v669_v2 = vld [vmem:[%s2643_s2 + $0xa0] sm:$0xff] }
  0x84   :  { %v1006_v3 = vld [vmem:[%s2644_s3 + $0xa0] sm:$0xff] }
  0x89   :  { %768 = vmatmul.f32.gmra.mxu2 %v662_v4  ;;  %1105 = vmatmul.f32.gmra.mxu3 %v999_v5 }
  0x8b   :  { %158 = vmatmul.f32.gmra.mxu0 %v52_v6  ;;  %431 = vmatmul.f32.gmra.mxu1 %v325_v7  ;;  %v59_v7 = vld [vmem:[%s2645_s0 + $0xa0] sm:$0xff] }
  0x91   :  { %771 = vmatmul.f32.gmra.mxu2 %v663_v8  ;;  %1108 = vmatmul.f32.gmra.mxu3 %v1000_v9  ;;  %v332_v8 = vld [vmem:[%s2646_s1 + $0xa0] sm:$0xff] }
  0x93   :  { %161 = vmatmul.f32.gmra.mxu0 %v53_v10  ;;  %434 = vmatmul.f32.gmra.mxu1 %v326_v11 }
  0x99   :  { %774 = vmatmul.f32.gmra.mxu2 %v664_v12  ;;  %1111 = vmatmul.f32.gmra.mxu3 %v1001_v13 }
  0x9b   :  { %164 = vmatmul.f32.gmra.mxu0 %v54_v14  ;;  %437 = vmatmul.f32.gmra.mxu1 %v327_v15  ;;  %v670_v15 = vld [vmem:[%s2643_s2 + $0xa8] sm:$0xff] }
  0xa0   :  { %v120_v18 = vpop.f32.mrf.mxu0  ;;  %v393_v19 = vpop.f32.mrf.mxu1 }
  0xa1   :  { %777 = vmatmul.f32.gmra.mxu2 %v665_v16  ;;  %v585_v22 = vmax.f32 %v120_v18, %v393_v19  ;;  %1114 = vmatmul.f32.gmra.mxu3 %v1002_v17  ;;  %v1007_v16 = vld [vmem:[%s2644_s3 + $0xa8] sm:$0xff] }
  0xa3   :  { %167 = vmatmul.f32.gmra.mxu0 %v55_v20  ;;  %440 = vmatmul.f32.gmra.mxu1 %v328_v21  ;;  %v60_v20 = vld [vmem:[%s2645_s0 + $0xa8] sm:$0xff] }
  0xa4   :  { %v730_v23 = vpop.f32.mrf.mxu2  ;;  %v1067_v24 = vpop.f32.mrf.mxu3  ;;  %v333_v21 = vld [vmem:[%s2646_s1 + $0xa8] sm:$0xff] }
  0xa5   :  { %v922_v25 = vmax.f32 %v585_v22, %v730_v23 }
  0xa7   :  { %v1259_v29 = vmax.f32 %v922_v25, %v1067_v24 }
  0xa8   :  { %v123_v30 = vpop.f32.mrf.mxu0  ;;  %v396_v31 = vpop.f32.mrf.mxu1 }
  0xa9   :  { %v1327_v34 = vadd.f32 %v1815_v26, %v1259_v29  ;;  %780 = vmatmul.f32.gmra.mxu2 %v666_v27  ;;  %v586_v35 = vmax.f32 %v123_v30, %v396_v31  ;;  %1117 = vmatmul.f32.gmra.mxu3 %v1003_v28  ;;  %v671_v29 = vld [vmem:[%s2643_s2 + $0xb0] sm:$0xff] }
  0xaa   :  { %v1008_v30 = vld [vmem:[%s2644_s3 + $0xb0] sm:$0xff] }
  0xab   :  { %v1391_v36 = vmax.f32 %v1327_v34, 0.0  ;;  %170 = vmatmul.f32.gmra.mxu0 %v56_v32  ;;  %443 = vmatmul.f32.gmra.mxu1 %v329_v33  ;;  %v61_v34 = vld [vmem:[%s2645_s0 + $0xb0] sm:$0xff] }
  0xac   :  { %v733_v37 = vpop.f32.mrf.mxu2  ;;  %v1070_v38 = vpop.f32.mrf.mxu3 }
  0xad   :  { %1455 = vst [vmem:[%s2648_s6] sm:$0xff] %v1391_v36  ;;  %v923_v39 = vmax.f32 %v586_v35, %v733_v37  ;;  %v334_v35 = vld [vmem:[%s2646_s1 + $0xb0] sm:$0xff] }
  0xaf   :  { %v1260_v42 = vmax.f32 %v923_v39, %v1070_v38 }
  0xb0   :  { %v126_v43 = vpop.f32.mrf.mxu0  ;;  %v399_v44 = vpop.f32.mrf.mxu1 }
  0xb1   :  { %v1328_v47 = vadd.f32 %v1815_v26, %v1260_v42  ;;  %783 = vmatmul.f32.gmra.mxu2 %v667_v40  ;;  %v587_v48 = vmax.f32 %v126_v43, %v399_v44  ;;  %1120 = vmatmul.f32.gmra.mxu3 %v1004_v41  ;;  %v672_v42 = vld [vmem:[%s2643_s2 + $0xb8] sm:$0xff] }
  0xb2   :  { %v1009_v43 = vld [vmem:[%s2644_s3 + $0xb8] sm:$0xff] }
  0xb3   :  { %v1392_v49 = vmax.f32 %v1328_v47, 0.0  ;;  %173 = vmatmul.f32.gmra.mxu0 %v57_v45  ;;  %446 = vmatmul.f32.gmra.mxu1 %v330_v46  ;;  %v62_v47 = vld [vmem:[%s2645_s0 + $0xb8] sm:$0xff] }
  0xb4   :  { %v736_v50 = vpop.f32.mrf.mxu2  ;;  %v1073_v51 = vpop.f32.mrf.mxu3 }
  0xb5   :  { %1456 = vst [vmem:[%s2648_s6 + $0x8] sm:$0xff] %v1392_v49  ;;  %v924_v52 = vmax.f32 %v587_v48, %v736_v50  ;;  %v335_v48 = vld [vmem:[%s2646_s1 + $0xb8] sm:$0xff] }
  0xb7   :  { %v1261_v55 = vmax.f32 %v924_v52, %v1073_v51 }
  0xb8   :  { %v129_v56 = vpop.f32.mrf.mxu0  ;;  %v402_v57 = vpop.f32.mrf.mxu1 }
  0xb9   :  { %v1329_v60 = vadd.f32 %v1815_v26, %v1261_v55  ;;  %786 = vmatmul.f32.gmra.mxu2 %v668_v53  ;;  %v588_v61 = vmax.f32 %v129_v56, %v402_v57  ;;  %1123 = vmatmul.f32.gmra.mxu3 %v1005_v54  ;;  %v673_v55 = vld [vmem:[%s2643_s2 + $0xc0] sm:$0xff] }
  0xba   :  { %v1010_v56 = vld [vmem:[%s2644_s3 + $0xc0] sm:$0xff] }
  0xbb   :  { %v1393_v62 = vmax.f32 %v1329_v60, 0.0  ;;  %176 = vmatmul.f32.gmra.mxu0 %v58_v58  ;;  %449 = vmatmul.f32.gmra.mxu1 %v331_v59  ;;  %v63_v60 = vld [vmem:[%s2645_s0 + $0xc0] sm:$0xff] }
  0xbc   :  { %v739_v63 = vpop.f32.mrf.mxu2  ;;  %v1076_v0 = vpop.f32.mrf.mxu3 }
  0xbd   :  { %1457 = vst [vmem:[%s2648_s6 + $0x10] sm:$0xff] %v1393_v62  ;;  %v925_v1 = vmax.f32 %v588_v61, %v739_v63  ;;  %v336_v61 = vld [vmem:[%s2646_s1 + $0xc0] sm:$0xff] }
  0xbf   :  { %v1262_v4 = vmax.f32 %v925_v1, %v1076_v0 }
  0xc0   :  { %v132_v5 = vpop.f32.mrf.mxu0  ;;  %v405_v6 = vpop.f32.mrf.mxu1 }
  0xc1   :  { %v1330_v9 = vadd.f32 %v1815_v26, %v1262_v4  ;;  %789 = vmatmul.f32.gmra.mxu2 %v669_v2  ;;  %v589_v10 = vmax.f32 %v132_v5, %v405_v6  ;;  %1126 = vmatmul.f32.gmra.mxu3 %v1006_v3  ;;  %v674_v4 = vld [vmem:[%s2643_s2 + $0xc8] sm:$0xff] }
  0xc2   :  { %v1011_v5 = vld [vmem:[%s2644_s3 + $0xc8] sm:$0xff] }
  0xc3   :  { %v1394_v11 = vmax.f32 %v1330_v9, 0.0  ;;  %179 = vmatmul.f32.gmra.mxu0 %v59_v7  ;;  %452 = vmatmul.f32.gmra.mxu1 %v332_v8  ;;  %v64_v9 = vld [vmem:[%s2645_s0 + $0xc8] sm:$0xff] }
  0xc4   :  { %v742_v12 = vpop.f32.mrf.mxu2  ;;  %v1079_v13 = vpop.f32.mrf.mxu3 }
  0xc5   :  { %1458 = vst [vmem:[%s2648_s6 + $0x18] sm:$0xff] %v1394_v11  ;;  %v926_v14 = vmax.f32 %v589_v10, %v742_v12  ;;  %v337_v10 = vld [vmem:[%s2646_s1 + $0xc8] sm:$0xff] }
  0xc7   :  { %v1263_v17 = vmax.f32 %v926_v14, %v1079_v13 }
  0xc8   :  { %v135_v18 = vpop.f32.mrf.mxu0  ;;  %v408_v19 = vpop.f32.mrf.mxu1 }
  0xc9   :  { %v1331_v22 = vadd.f32 %v1815_v26, %v1263_v17  ;;  %792 = vmatmul.f32.gmra.mxu2 %v670_v15  ;;  %v590_v23 = vmax.f32 %v135_v18, %v408_v19  ;;  %1129 = vmatmul.f32.gmra.mxu3 %v1007_v16  ;;  %v675_v17 = vld [vmem:[%s2643_s2 + $0xd0] sm:$0xff] }
  0xca   :  { %v1012_v18 = vld [vmem:[%s2644_s3 + $0xd0] sm:$0xff] }
  0xcb   :  { %v1395_v24 = vmax.f32 %v1331_v22, 0.0  ;;  %182 = vmatmul.f32.gmra.mxu0 %v60_v20  ;;  %455 = vmatmul.f32.gmra.mxu1 %v333_v21  ;;  %v65_v22 = vld [vmem:[%s2645_s0 + $0xd0] sm:$0xff] }
  0xcc   :  { %v745_v25 = vpop.f32.mrf.mxu2  ;;  %v1082_v27 = vpop.f32.mrf.mxu3 }
  0xcd   :  { %1459 = vst [vmem:[%s2648_s6 + $0x20] sm:$0xff] %v1395_v24  ;;  %v927_v28 = vmax.f32 %v590_v23, %v745_v25  ;;  %v338_v23 = vld [vmem:[%s2646_s1 + $0xd0] sm:$0xff] }
  0xcf   :  { %v1264_v31 = vmax.f32 %v927_v28, %v1082_v27 }
  0xd0   :  { %v138_v32 = vpop.f32.mrf.mxu0  ;;  %v411_v33 = vpop.f32.mrf.mxu1 }
  0xd1   :  { %v1332_v36 = vadd.f32 %v1815_v26, %v1264_v31  ;;  %795 = vmatmul.f32.gmra.mxu2 %v671_v29  ;;  %v591_v37 = vmax.f32 %v138_v32, %v411_v33  ;;  %1132 = vmatmul.f32.gmra.mxu3 %v1008_v30  ;;  %v676_v31 = vld [vmem:[%s2643_s2 + $0xd8] sm:$0xff] }
  0xd2   :  { %v1013_v32 = vld [vmem:[%s2644_s3 + $0xd8] sm:$0xff] }
  0xd3   :  { %v1396_v38 = vmax.f32 %v1332_v36, 0.0  ;;  %185 = vmatmul.f32.gmra.mxu0 %v61_v34  ;;  %458 = vmatmul.f32.gmra.mxu1 %v334_v35  ;;  %v66_v36 = vld [vmem:[%s2645_s0 + $0xd8] sm:$0xff] }
  0xd4   :  { %v748_v39 = vpop.f32.mrf.mxu2  ;;  %v1085_v40 = vpop.f32.mrf.mxu3 }
  0xd5   :  { %1460 = vst [vmem:[%s2648_s6 + $0x28] sm:$0xff] %v1396_v38  ;;  %v928_v41 = vmax.f32 %v591_v37, %v748_v39  ;;  %v339_v37 = vld [vmem:[%s2646_s1 + $0xd8] sm:$0xff] }
  0xd7   :  { %v1265_v44 = vmax.f32 %v928_v41, %v1085_v40 }
  0xd8   :  { %v141_v45 = vpop.f32.mrf.mxu0  ;;  %v414_v46 = vpop.f32.mrf.mxu1 }
  0xd9   :  { %v1333_v49 = vadd.f32 %v1815_v26, %v1265_v44  ;;  %798 = vmatmul.f32.gmra.mxu2 %v672_v42  ;;  %v592_v50 = vmax.f32 %v141_v45, %v414_v46  ;;  %1135 = vmatmul.f32.gmra.mxu3 %v1009_v43  ;;  %v677_v44 = vld [vmem:[%s2643_s2 + $0xe0] sm:$0xff] }
  0xda   :  { %v1014_v45 = vld [vmem:[%s2644_s3 + $0xe0] sm:$0xff] }
  0xdb   :  { %v1397_v51 = vmax.f32 %v1333_v49, 0.0  ;;  %188 = vmatmul.f32.gmra.mxu0 %v62_v47  ;;  %461 = vmatmul.f32.gmra.mxu1 %v335_v48  ;;  %v67_v49 = vld [vmem:[%s2645_s0 + $0xe0] sm:$0xff] }
  0xdc   :  { %v751_v52 = vpop.f32.mrf.mxu2  ;;  %v1088_v53 = vpop.f32.mrf.mxu3 }
  0xdd   :  { %1461 = vst [vmem:[%s2648_s6 + $0x30] sm:$0xff] %v1397_v51  ;;  %v929_v54 = vmax.f32 %v592_v50, %v751_v52  ;;  %v340_v50 = vld [vmem:[%s2646_s1 + $0xe0] sm:$0xff] }
  0xdf   :  { %v1266_v57 = vmax.f32 %v929_v54, %v1088_v53 }
  0xe0   :  { %v144_v58 = vpop.f32.mrf.mxu0  ;;  %v417_v59 = vpop.f32.mrf.mxu1 }
  0xe1   :  { %v1334_v62 = vadd.f32 %v1815_v26, %v1266_v57  ;;  %801 = vmatmul.f32.gmra.mxu2 %v673_v55  ;;  %v593_v63 = vmax.f32 %v144_v58, %v417_v59  ;;  %1138 = vmatmul.f32.gmra.mxu3 %v1010_v56  ;;  %v678_v57 = vld [vmem:[%s2643_s2 + $0xe8] sm:$0xff] }
  0xe2   :  { %v1015_v58 = vld [vmem:[%s2644_s3 + $0xe8] sm:$0xff] }
  0xe3   :  { %v1398_v0 = vmax.f32 %v1334_v62, 0.0  ;;  %191 = vmatmul.f32.gmra.mxu0 %v63_v60  ;;  %464 = vmatmul.f32.gmra.mxu1 %v336_v61  ;;  %v68_v62 = vld [vmem:[%s2645_s0 + $0xe8] sm:$0xff] }
  0xe4   :  { %v754_v1 = vpop.f32.mrf.mxu2  ;;  %v1091_v2 = vpop.f32.mrf.mxu3 }
  0xe5   :  { %1462 = vst [vmem:[%s2648_s6 + $0x38] sm:$0xff] %v1398_v0  ;;  %v930_v3 = vmax.f32 %v593_v63, %v754_v1  ;;  %v341_v63 = vld [vmem:[%s2646_s1 + $0xe8] sm:$0xff] }
  0xe7   :  { %v1267_v6 = vmax.f32 %v930_v3, %v1091_v2 }
  0xe8   :  { %v147_v7 = vpop.f32.mrf.mxu0  ;;  %v420_v8 = vpop.f32.mrf.mxu1 }
  0xe9   :  { %v1335_v11 = vadd.f32 %v1815_v26, %v1267_v6  ;;  %804 = vmatmul.f32.gmra.mxu2 %v674_v4  ;;  %v594_v12 = vmax.f32 %v147_v7, %v420_v8  ;;  %1141 = vmatmul.f32.gmra.mxu3 %v1011_v5  ;;  %v679_v6 = vld [vmem:[%s2643_s2 + $0xf0] sm:$0xff] }
  0xea   :  { %v1016_v7 = vld [vmem:[%s2644_s3 + $0xf0] sm:$0xff] }
  0xeb   :  { %v1399_v13 = vmax.f32 %v1335_v11, 0.0  ;;  %194 = vmatmul.f32.gmra.mxu0 %v64_v9  ;;  %467 = vmatmul.f32.gmra.mxu1 %v337_v10  ;;  %v69_v11 = vld [vmem:[%s2645_s0 + $0xf0] sm:$0xff] }
  0xec   :  { %v757_v14 = vpop.f32.mrf.mxu2  ;;  %v1094_v15 = vpop.f32.mrf.mxu3 }
  0xed   :  { %1463 = vst [vmem:[%s2648_s6 + $0x40] sm:$0xff] %v1399_v13  ;;  %v931_v16 = vmax.f32 %v594_v12, %v757_v14  ;;  %v342_v12 = vld [vmem:[%s2646_s1 + $0xf0] sm:$0xff] }
  0xef   :  { %v1268_v19 = vmax.f32 %v931_v16, %v1094_v15 }
  0xf0   :  { %v150_v20 = vpop.f32.mrf.mxu0  ;;  %v423_v21 = vpop.f32.mrf.mxu1 }
  0xf1   :  { %v1336_v24 = vadd.f32 %v1815_v26, %v1268_v19  ;;  %807 = vmatmul.f32.gmra.mxu2 %v675_v17  ;;  %v595_v25 = vmax.f32 %v150_v20, %v423_v21  ;;  %1144 = vmatmul.f32.gmra.mxu3 %v1012_v18  ;;  %v680_v19 = vld [vmem:[%s2643_s2 + $0xf8] sm:$0xff] }
  0xf2   :  { %v1017_v20 = vld [vmem:[%s2644_s3 + $0xf8] sm:$0xff] }
  0xf3   :  { %v1400_v27 = vmax.f32 %v1336_v24, 0.0  ;;  %197 = vmatmul.f32.gmra.mxu0 %v65_v22  ;;  %470 = vmatmul.f32.gmra.mxu1 %v338_v23  ;;  %v70_v24 = vld [vmem:[%s2645_s0 + $0xf8] sm:$0xff] }
  0xf4   :  { %v760_v28 = vpop.f32.mrf.mxu2  ;;  %v1097_v29 = vpop.f32.mrf.mxu3 }
  0xf5   :  { %1464 = vst [vmem:[%s2648_s6 + $0x48] sm:$0xff] %v1400_v27  ;;  %v932_v30 = vmax.f32 %v595_v25, %v760_v28  ;;  %v343_v25 = vld [vmem:[%s2646_s1 + $0xf8] sm:$0xff] }
  0xf7   :  { %v1269_v33 = vmax.f32 %v932_v30, %v1097_v29 }
  0xf8   :  { %v153_v34 = vpop.f32.mrf.mxu0  ;;  %v426_v35 = vpop.f32.mrf.mxu1 }
  0xf9   :  { %v1337_v38 = vadd.f32 %v1815_v26, %v1269_v33  ;;  %810 = vmatmul.f32.gmra.mxu2 %v676_v31  ;;  %v596_v39 = vmax.f32 %v153_v34, %v426_v35  ;;  %1147 = vmatmul.f32.gmra.mxu3 %v1013_v32  ;;  %v681_v33 = vld [vmem:[%s2643_s2 + $0x100] sm:$0xff] }
  0xfa   :  { %v1018_v34 = vld [vmem:[%s2644_s3 + $0x100] sm:$0xff] }
  0xfb   :  { %v1401_v40 = vmax.f32 %v1337_v38, 0.0  ;;  %200 = vmatmul.f32.gmra.mxu0 %v66_v36  ;;  %473 = vmatmul.f32.gmra.mxu1 %v339_v37  ;;  %v71_v38 = vld [vmem:[%s2645_s0 + $0x100] sm:$0xff] }
  0xfc   :  { %v763_v41 = vpop.f32.mrf.mxu2  ;;  %v1100_v42 = vpop.f32.mrf.mxu3 }
  0xfd   :  { %1465 = vst [vmem:[%s2648_s6 + $0x50] sm:$0xff] %v1401_v40  ;;  %v933_v43 = vmax.f32 %v596_v39, %v763_v41  ;;  %v344_v39 = vld [vmem:[%s2646_s1 + $0x100] sm:$0xff] }
  0xff   :  { %v1270_v46 = vmax.f32 %v933_v43, %v1100_v42 }
 0x100   :  { %v156_v47 = vpop.f32.mrf.mxu0  ;;  %v429_v48 = vpop.f32.mrf.mxu1 }
 0x101   :  { %v1338_v51 = vadd.f32 %v1815_v26, %v1270_v46  ;;  %813 = vmatmul.f32.gmra.mxu2 %v677_v44  ;;  %v597_v52 = vmax.f32 %v156_v47, %v429_v48  ;;  %1150 = vmatmul.f32.gmra.mxu3 %v1014_v45  ;;  %v682_v46 = vld [vmem:[%s2643_s2 + $0x108] sm:$0xff] }
 0x102   :  { %v1019_v47 = vld [vmem:[%s2644_s3 + $0x108] sm:$0xff] }
 0x103   :  { %v1402_v53 = vmax.f32 %v1338_v51, 0.0  ;;  %203 = vmatmul.f32.gmra.mxu0 %v67_v49  ;;  %476 = vmatmul.f32.gmra.mxu1 %v340_v50  ;;  %v72_v51 = vld [vmem:[%s2645_s0 + $0x108] sm:$0xff] }
 0x104   :  { %v766_v54 = vpop.f32.mrf.mxu2  ;;  %v1103_v55 = vpop.f32.mrf.mxu3 }
 0x105   :  { %1466 = vst [vmem:[%s2648_s6 + $0x58] sm:$0xff] %v1402_v53  ;;  %v934_v56 = vmax.f32 %v597_v52, %v766_v54  ;;  %v345_v52 = vld [vmem:[%s2646_s1 + $0x108] sm:$0xff] }
 0x107   :  { %v1271_v59 = vmax.f32 %v934_v56, %v1103_v55 }
 0x108   :  { %v159_v60 = vpop.f32.mrf.mxu0  ;;  %v432_v61 = vpop.f32.mrf.mxu1 }
 0x109   :  { %v1339_v0 = vadd.f32 %v1815_v26, %v1271_v59  ;;  %816 = vmatmul.f32.gmra.mxu2 %v678_v57  ;;  %v598_v1 = vmax.f32 %v159_v60, %v432_v61  ;;  %1153 = vmatmul.f32.gmra.mxu3 %v1015_v58  ;;  %v683_v59 = vld [vmem:[%s2643_s2 + $0x110] sm:$0xff] }
 0x10a   :  { %v1020_v60 = vld [vmem:[%s2644_s3 + $0x110] sm:$0xff] }
 0x10b   :  { %v1403_v2 = vmax.f32 %v1339_v0, 0.0  ;;  %206 = vmatmul.f32.gmra.mxu0 %v68_v62  ;;  %479 = vmatmul.f32.gmra.mxu1 %v341_v63  ;;  %v73_v0 = vld [vmem:[%s2645_s0 + $0x110] sm:$0xff] }
 0x10c   :  { %v769_v3 = vpop.f32.mrf.mxu2  ;;  %v1106_v4 = vpop.f32.mrf.mxu3 }
 0x10d   :  { %1467 = vst [vmem:[%s2648_s6 + $0x60] sm:$0xff] %v1403_v2  ;;  %v935_v5 = vmax.f32 %v598_v1, %v769_v3  ;;  %v346_v1 = vld [vmem:[%s2646_s1 + $0x110] sm:$0xff] }
 0x10f   :  { %v1272_v8 = vmax.f32 %v935_v5, %v1106_v4 }
 0x110   :  { %v162_v9 = vpop.f32.mrf.mxu0  ;;  %v435_v10 = vpop.f32.mrf.mxu1 }
 0x111   :  { %v1340_v13 = vadd.f32 %v1815_v26, %v1272_v8  ;;  %819 = vmatmul.f32.gmra.mxu2 %v679_v6  ;;  %v599_v14 = vmax.f32 %v162_v9, %v435_v10  ;;  %1156 = vmatmul.f32.gmra.mxu3 %v1016_v7  ;;  %v684_v8 = vld [vmem:[%s2643_s2 + $0x118] sm:$0xff] }
 0x112   :  { %v1021_v9 = vld [vmem:[%s2644_s3 + $0x118] sm:$0xff] }
 0x113   :  { %v1404_v15 = vmax.f32 %v1340_v13, 0.0  ;;  %209 = vmatmul.f32.gmra.mxu0 %v69_v11  ;;  %482 = vmatmul.f32.gmra.mxu1 %v342_v12  ;;  %v74_v13 = vld [vmem:[%s2645_s0 + $0x118] sm:$0xff] }
 0x114   :  { %v772_v16 = vpop.f32.mrf.mxu2  ;;  %v1109_v17 = vpop.f32.mrf.mxu3 }
 0x115   :  { %1468 = vst [vmem:[%s2648_s6 + $0x68] sm:$0xff] %v1404_v15  ;;  %v936_v18 = vmax.f32 %v599_v14, %v772_v16  ;;  %v347_v14 = vld [vmem:[%s2646_s1 + $0x118] sm:$0xff] }
 0x117   :  { %v1273_v21 = vmax.f32 %v936_v18, %v1109_v17 }
 0x118   :  { %v165_v22 = vpop.f32.mrf.mxu0  ;;  %v438_v23 = vpop.f32.mrf.mxu1 }
 0x119   :  { %v1341_v27 = vadd.f32 %v1815_v26, %v1273_v21  ;;  %822 = vmatmul.f32.gmra.mxu2 %v680_v19  ;;  %v600_v28 = vmax.f32 %v165_v22, %v438_v23  ;;  %1159 = vmatmul.f32.gmra.mxu3 %v1017_v20  ;;  %v685_v21 = vld [vmem:[%s2643_s2 + $0x120] sm:$0xff] }
 0x11a   :  { %v1022_v22 = vld [vmem:[%s2644_s3 + $0x120] sm:$0xff] }
 0x11b   :  { %v1405_v29 = vmax.f32 %v1341_v27, 0.0  ;;  %212 = vmatmul.f32.gmra.mxu0 %v70_v24  ;;  %485 = vmatmul.f32.gmra.mxu1 %v343_v25  ;;  %v75_v27 = vld [vmem:[%s2645_s0 + $0x120] sm:$0xff] }
 0x11c   :  { %v775_v30 = vpop.f32.mrf.mxu2  ;;  %v1112_v31 = vpop.f32.mrf.mxu3 }
 0x11d   :  { %1469 = vst [vmem:[%s2648_s6 + $0x70] sm:$0xff] %v1405_v29  ;;  %v937_v32 = vmax.f32 %v600_v28, %v775_v30  ;;  %v348_v28 = vld [vmem:[%s2646_s1 + $0x120] sm:$0xff] }
 0x11f   :  { %v1274_v35 = vmax.f32 %v937_v32, %v1112_v31 }
 0x120   :  { %v168_v36 = vpop.f32.mrf.mxu0  ;;  %v441_v37 = vpop.f32.mrf.mxu1 }
 0x121   :  { %v1342_v40 = vadd.f32 %v1815_v26, %v1274_v35  ;;  %825 = vmatmul.f32.gmra.mxu2 %v681_v33  ;;  %v601_v41 = vmax.f32 %v168_v36, %v441_v37  ;;  %1162 = vmatmul.f32.gmra.mxu3 %v1018_v34  ;;  %v686_v35 = vld [vmem:[%s2643_s2 + $0x128] sm:$0xff] }
 0x122   :  { %v1023_v36 = vld [vmem:[%s2644_s3 + $0x128] sm:$0xff] }
 0x123   :  { %v1406_v42 = vmax.f32 %v1342_v40, 0.0  ;;  %215 = vmatmul.f32.gmra.mxu0 %v71_v38  ;;  %488 = vmatmul.f32.gmra.mxu1 %v344_v39  ;;  %v76_v40 = vld [vmem:[%s2645_s0 + $0x128] sm:$0xff] }
 0x124   :  { %v778_v43 = vpop.f32.mrf.mxu2  ;;  %v1115_v44 = vpop.f32.mrf.mxu3 }
 0x125   :  { %1470 = vst [vmem:[%s2648_s6 + $0x78] sm:$0xff] %v1406_v42  ;;  %v938_v45 = vmax.f32 %v601_v41, %v778_v43  ;;  %v349_v41 = vld [vmem:[%s2646_s1 + $0x128] sm:$0xff] }
 0x127   :  { %v1275_v48 = vmax.f32 %v938_v45, %v1115_v44 }
 0x128   :  { %v171_v49 = vpop.f32.mrf.mxu0  ;;  %v444_v50 = vpop.f32.mrf.mxu1 }
 0x129   :  { %v1343_v53 = vadd.f32 %v1815_v26, %v1275_v48  ;;  %828 = vmatmul.f32.gmra.mxu2 %v682_v46  ;;  %v602_v54 = vmax.f32 %v171_v49, %v444_v50  ;;  %1165 = vmatmul.f32.gmra.mxu3 %v1019_v47  ;;  %v687_v48 = vld [vmem:[%s2643_s2 + $0x130] sm:$0xff] }
 0x12a   :  { %v1024_v49 = vld [vmem:[%s2644_s3 + $0x130] sm:$0xff] }
 0x12b   :  { %v1407_v55 = vmax.f32 %v1343_v53, 0.0  ;;  %218 = vmatmul.f32.gmra.mxu0 %v72_v51  ;;  %491 = vmatmul.f32.gmra.mxu1 %v345_v52  ;;  %v77_v53 = vld [vmem:[%s2645_s0 + $0x130] sm:$0xff] }
 0x12c   :  { %v781_v56 = vpop.f32.mrf.mxu2  ;;  %v1118_v57 = vpop.f32.mrf.mxu3 }
 0x12d   :  { %1471 = vst [vmem:[%s2648_s6 + $0x80] sm:$0xff] %v1407_v55  ;;  %v939_v58 = vmax.f32 %v602_v54, %v781_v56  ;;  %v350_v54 = vld [vmem:[%s2646_s1 + $0x130] sm:$0xff] }
 0x12f   :  { %v1276_v61 = vmax.f32 %v939_v58, %v1118_v57 }
 0x130   :  { %v174_v62 = vpop.f32.mrf.mxu0  ;;  %v447_v63 = vpop.f32.mrf.mxu1 }
 0x131   :  { %v1344_v2 = vadd.f32 %v1815_v26, %v1276_v61  ;;  %831 = vmatmul.f32.gmra.mxu2 %v683_v59  ;;  %v603_v3 = vmax.f32 %v174_v62, %v447_v63  ;;  %1168 = vmatmul.f32.gmra.mxu3 %v1020_v60  ;;  %v688_v61 = vld [vmem:[%s2643_s2 + $0x138] sm:$0xff] }
 0x132   :  { %v1025_v62 = vld [vmem:[%s2644_s3 + $0x138] sm:$0xff] }
 0x133   :  { %v1408_v4 = vmax.f32 %v1344_v2, 0.0  ;;  %221 = vmatmul.f32.gmra.mxu0 %v73_v0  ;;  %494 = vmatmul.f32.gmra.mxu1 %v346_v1  ;;  %v78_v2 = vld [vmem:[%s2645_s0 + $0x138] sm:$0xff] }
 0x134   :  { %v784_v5 = vpop.f32.mrf.mxu2  ;;  %v1121_v6 = vpop.f32.mrf.mxu3 }
 0x135   :  { %1472 = vst [vmem:[%s2648_s6 + $0x88] sm:$0xff] %v1408_v4  ;;  %v940_v7 = vmax.f32 %v603_v3, %v784_v5  ;;  %v351_v3 = vld [vmem:[%s2646_s1 + $0x138] sm:$0xff] }
 0x137   :  { %v1277_v10 = vmax.f32 %v940_v7, %v1121_v6 }
 0x138   :  { %v177_v11 = vpop.f32.mrf.mxu0  ;;  %v450_v12 = vpop.f32.mrf.mxu1 }
 0x139   :  { %v1345_v15 = vadd.f32 %v1815_v26, %v1277_v10  ;;  %834 = vmatmul.f32.gmra.mxu2 %v684_v8  ;;  %v604_v16 = vmax.f32 %v177_v11, %v450_v12  ;;  %1171 = vmatmul.f32.gmra.mxu3 %v1021_v9  ;;  %v689_v10 = vld [vmem:[%s2643_s2 + $0x140] sm:$0xff] }
 0x13a   :  { %v1026_v11 = vld [vmem:[%s2644_s3 + $0x140] sm:$0xff] }
 0x13b   :  { %v1409_v17 = vmax.f32 %v1345_v15, 0.0  ;;  %224 = vmatmul.f32.gmra.mxu0 %v74_v13  ;;  %497 = vmatmul.f32.gmra.mxu1 %v347_v14  ;;  %v79_v15 = vld [vmem:[%s2645_s0 + $0x140] sm:$0xff] }
 0x13c   :  { %v787_v18 = vpop.f32.mrf.mxu2  ;;  %v1124_v19 = vpop.f32.mrf.mxu3 }
 0x13d   :  { %1473 = vst [vmem:[%s2648_s6 + $0x90] sm:$0xff] %v1409_v17  ;;  %v941_v20 = vmax.f32 %v604_v16, %v787_v18  ;;  %v352_v16 = vld [vmem:[%s2646_s1 + $0x140] sm:$0xff] }
 0x13f   :  { %v1278_v23 = vmax.f32 %v941_v20, %v1124_v19 }
 0x140   :  { %v180_v24 = vpop.f32.mrf.mxu0  ;;  %v453_v25 = vpop.f32.mrf.mxu1 }
 0x141   :  { %v1346_v29 = vadd.f32 %v1815_v26, %v1278_v23  ;;  %837 = vmatmul.f32.gmra.mxu2 %v685_v21  ;;  %v605_v30 = vmax.f32 %v180_v24, %v453_v25  ;;  %1174 = vmatmul.f32.gmra.mxu3 %v1022_v22  ;;  %v690_v23 = vld [vmem:[%s2643_s2 + $0x148] sm:$0xff] }
 0x142   :  { %v1027_v24 = vld [vmem:[%s2644_s3 + $0x148] sm:$0xff] }
 0x143   :  { %v1410_v31 = vmax.f32 %v1346_v29, 0.0  ;;  %227 = vmatmul.f32.gmra.mxu0 %v75_v27  ;;  %500 = vmatmul.f32.gmra.mxu1 %v348_v28  ;;  %v80_v29 = vld [vmem:[%s2645_s0 + $0x148] sm:$0xff] }
 0x144   :  { %v790_v32 = vpop.f32.mrf.mxu2  ;;  %v1127_v33 = vpop.f32.mrf.mxu3 }
 0x145   :  { %1474 = vst [vmem:[%s2648_s6 + $0x98] sm:$0xff] %v1410_v31  ;;  %v942_v34 = vmax.f32 %v605_v30, %v790_v32  ;;  %v353_v30 = vld [vmem:[%s2646_s1 + $0x148] sm:$0xff] }
 0x147   :  { %v1279_v37 = vmax.f32 %v942_v34, %v1127_v33 }
 0x148   :  { %v183_v38 = vpop.f32.mrf.mxu0  ;;  %v456_v39 = vpop.f32.mrf.mxu1 }
 0x149   :  { %v1347_v42 = vadd.f32 %v1815_v26, %v1279_v37  ;;  %840 = vmatmul.f32.gmra.mxu2 %v686_v35  ;;  %v606_v43 = vmax.f32 %v183_v38, %v456_v39  ;;  %1177 = vmatmul.f32.gmra.mxu3 %v1023_v36  ;;  %v691_v37 = vld [vmem:[%s2643_s2 + $0x150] sm:$0xff] }
 0x14a   :  { %v1028_v38 = vld [vmem:[%s2644_s3 + $0x150] sm:$0xff] }
 0x14b   :  { %v1411_v44 = vmax.f32 %v1347_v42, 0.0  ;;  %230 = vmatmul.f32.gmra.mxu0 %v76_v40  ;;  %503 = vmatmul.f32.gmra.mxu1 %v349_v41  ;;  %v81_v42 = vld [vmem:[%s2645_s0 + $0x150] sm:$0xff] }
 0x14c   :  { %v793_v45 = vpop.f32.mrf.mxu2  ;;  %v1130_v46 = vpop.f32.mrf.mxu3 }
 0x14d   :  { %1475 = vst [vmem:[%s2648_s6 + $0xa0] sm:$0xff] %v1411_v44  ;;  %v943_v47 = vmax.f32 %v606_v43, %v793_v45  ;;  %v354_v43 = vld [vmem:[%s2646_s1 + $0x150] sm:$0xff] }
 0x14f   :  { %v1280_v50 = vmax.f32 %v943_v47, %v1130_v46 }
 0x150   :  { %v186_v51 = vpop.f32.mrf.mxu0  ;;  %v459_v52 = vpop.f32.mrf.mxu1 }
 0x151   :  { %v1348_v55 = vadd.f32 %v1815_v26, %v1280_v50  ;;  %843 = vmatmul.f32.gmra.mxu2 %v687_v48  ;;  %v607_v56 = vmax.f32 %v186_v51, %v459_v52  ;;  %1180 = vmatmul.f32.gmra.mxu3 %v1024_v49  ;;  %v692_v50 = vld [vmem:[%s2643_s2 + $0x158] sm:$0xff] }
 0x152   :  { %v1029_v51 = vld [vmem:[%s2644_s3 + $0x158] sm:$0xff] }
 0x153   :  { %v1412_v57 = vmax.f32 %v1348_v55, 0.0  ;;  %233 = vmatmul.f32.gmra.mxu0 %v77_v53  ;;  %506 = vmatmul.f32.gmra.mxu1 %v350_v54  ;;  %v82_v55 = vld [vmem:[%s2645_s0 + $0x158] sm:$0xff] }
 0x154   :  { %v796_v58 = vpop.f32.mrf.mxu2  ;;  %v1133_v59 = vpop.f32.mrf.mxu3 }
 0x155   :  { %1476 = vst [vmem:[%s2648_s6 + $0xa8] sm:$0xff] %v1412_v57  ;;  %v944_v60 = vmax.f32 %v607_v56, %v796_v58  ;;  %v355_v56 = vld [vmem:[%s2646_s1 + $0x158] sm:$0xff] }
 0x157   :  { %v1281_v63 = vmax.f32 %v944_v60, %v1133_v59 }
 0x158   :  { %v189_v0 = vpop.f32.mrf.mxu0  ;;  %v462_v1 = vpop.f32.mrf.mxu1 }
 0x159   :  { %v1349_v4 = vadd.f32 %v1815_v26, %v1281_v63  ;;  %846 = vmatmul.f32.gmra.mxu2 %v688_v61  ;;  %v608_v5 = vmax.f32 %v189_v0, %v462_v1  ;;  %1183 = vmatmul.f32.gmra.mxu3 %v1025_v62  ;;  %v693_v63 = vld [vmem:[%s2643_s2 + $0x160] sm:$0xff] }
 0x15a   :  { %v1030_v0 = vld [vmem:[%s2644_s3 + $0x160] sm:$0xff] }
 0x15b   :  { %v1413_v6 = vmax.f32 %v1349_v4, 0.0  ;;  %236 = vmatmul.f32.gmra.mxu0 %v78_v2  ;;  %509 = vmatmul.f32.gmra.mxu1 %v351_v3  ;;  %v83_v4 = vld [vmem:[%s2645_s0 + $0x160] sm:$0xff] }
 0x15c   :  { %v799_v7 = vpop.f32.mrf.mxu2  ;;  %v1136_v8 = vpop.f32.mrf.mxu3 }
 0x15d   :  { %1477 = vst [vmem:[%s2648_s6 + $0xb0] sm:$0xff] %v1413_v6  ;;  %v945_v9 = vmax.f32 %v608_v5, %v799_v7  ;;  %v356_v5 = vld [vmem:[%s2646_s1 + $0x160] sm:$0xff] }
 0x15f   :  { %v1282_v12 = vmax.f32 %v945_v9, %v1136_v8 }
 0x160   :  { %v192_v13 = vpop.f32.mrf.mxu0  ;;  %v465_v14 = vpop.f32.mrf.mxu1 }
 0x161   :  { %v1350_v17 = vadd.f32 %v1815_v26, %v1282_v12  ;;  %849 = vmatmul.f32.gmra.mxu2 %v689_v10  ;;  %v609_v18 = vmax.f32 %v192_v13, %v465_v14  ;;  %1186 = vmatmul.f32.gmra.mxu3 %v1026_v11  ;;  %v694_v12 = vld [vmem:[%s2643_s2 + $0x168] sm:$0xff] }
 0x163   :  { %v1414_v19 = vmax.f32 %v1350_v17, 0.0  ;;  %239 = vmatmul.f32.gmra.mxu0 %v79_v15  ;;  %512 = vmatmul.f32.gmra.mxu1 %v352_v16  ;;  %v84_v16 = vld [vmem:[%s2645_s0 + $0x168] sm:$0xff] }
 0x164   :  { %v802_v20 = vpop.f32.mrf.mxu2  ;;  %v1139_v21 = vpop.f32.mrf.mxu3  ;;  %v357_v17 = vld [vmem:[%s2646_s1 + $0x168] sm:$0xff] }
 0x165   :  { %1478 = vst [vmem:[%s2648_s6 + $0xb8] sm:$0xff] %v1414_v19  ;;  %v946_v22 = vmax.f32 %v609_v18, %v802_v20  ;;  %v2280_v18 = vld [vmem:[%s2647_s5] ss:$0 sm:$0xff] }
 0x167   :  { %v1283_v25 = vmax.f32 %v946_v22, %v1139_v21 }
 0x168   :  { %v195_v27 = vpop.f32.mrf.mxu0  ;;  %v468_v28 = vpop.f32.mrf.mxu1 }
 0x169   :  { %v1351_v31 = vadd.f32 %v1815_v26, %v1283_v25  ;;  %852 = vmatmul.f32.gmra.mxu2 %v690_v23  ;;  %v610_v32 = vmax.f32 %v195_v27, %v468_v28  ;;  %1189 = vmatmul.f32.gmra.mxu3 %v1027_v24  ;;  %v695_v25 = vld [vmem:[%s2643_s2 + $0x170] sm:$0xff] }
 0x16a   :  { %v1032_v27 = vld [vmem:[%s2644_s3 + $0x170] sm:$0xff] }
 0x16b   :  { %v1415_v33 = vmax.f32 %v1351_v31, 0.0  ;;  %242 = vmatmul.f32.gmra.mxu0 %v80_v29  ;;  %515 = vmatmul.f32.gmra.mxu1 %v353_v30  ;;  %v85_v31 = vld [vmem:[%s2645_s0 + $0x170] sm:$0xff] }
 0x16c   :  { %v805_v34 = vpop.f32.mrf.mxu2  ;;  %v1142_v35 = vpop.f32.mrf.mxu3 }
 0x16d   :  { %1479 = vst [vmem:[%s2648_s6 + $0xc0] sm:$0xff] %v1415_v33  ;;  %v947_v36 = vmax.f32 %v610_v32, %v805_v34  ;;  %v358_v32 = vld [vmem:[%s2646_s1 + $0x170] sm:$0xff] }
 0x16f   :  { %v1284_v39 = vmax.f32 %v947_v36, %v1142_v35 }
 0x170   :  { %v198_v40 = vpop.f32.mrf.mxu0  ;;  %v471_v41 = vpop.f32.mrf.mxu1 }
 0x171   :  { %v1352_v44 = vadd.f32 %v1815_v26, %v1284_v39  ;;  %855 = vmatmul.f32.gmra.mxu2 %v691_v37  ;;  %v611_v45 = vmax.f32 %v198_v40, %v471_v41  ;;  %1192 = vmatmul.f32.gmra.mxu3 %v1028_v38  ;;  %v696_v39 = vld [vmem:[%s2643_s2 + $0x178] sm:$0xff] }
 0x172   :  { %v1033_v40 = vld [vmem:[%s2644_s3 + $0x178] sm:$0xff] }
 0x173   :  { %v1416_v46 = vmax.f32 %v1352_v44, 0.0  ;;  %245 = vmatmul.f32.gmra.mxu0 %v81_v42  ;;  %518 = vmatmul.f32.gmra.mxu1 %v354_v43  ;;  %v86_v44 = vld [vmem:[%s2645_s0 + $0x178] sm:$0xff] }
 0x174   :  { %v808_v47 = vpop.f32.mrf.mxu2  ;;  %v1145_v48 = vpop.f32.mrf.mxu3 }
 0x175   :  { %1480 = vst [vmem:[%s2648_s6 + $0xc8] sm:$0xff] %v1416_v46  ;;  %v948_v49 = vmax.f32 %v611_v45, %v808_v47  ;;  %v359_v45 = vld [vmem:[%s2646_s1 + $0x178] sm:$0xff] }
 0x177   :  { %v1285_v52 = vmax.f32 %v948_v49, %v1145_v48 }
 0x178   :  { %v201_v53 = vpop.f32.mrf.mxu0  ;;  %v474_v54 = vpop.f32.mrf.mxu1 }
 0x179   :  { %v1353_v57 = vadd.f32 %v1815_v26, %v1285_v52  ;;  %858 = vmatmul.f32.gmra.mxu2 %v692_v50  ;;  %v612_v58 = vmax.f32 %v201_v53, %v474_v54  ;;  %1195 = vmatmul.f32.gmra.mxu3 %v1029_v51  ;;  %v697_v52 = vld [vmem:[%s2643_s2 + $0x180] sm:$0xff] }
 0x17a   :  { %v1034_v53 = vld [vmem:[%s2644_s3 + $0x180] sm:$0xff] }
 0x17b   :  { %v1417_v59 = vmax.f32 %v1353_v57, 0.0  ;;  %248 = vmatmul.f32.gmra.mxu0 %v82_v55  ;;  %521 = vmatmul.f32.gmra.mxu1 %v355_v56  ;;  %v87_v57 = vld [vmem:[%s2645_s0 + $0x180] sm:$0xff] }
 0x17c   :  { %v811_v60 = vpop.f32.mrf.mxu2  ;;  %v1148_v61 = vpop.f32.mrf.mxu3 }
 0x17d   :  { %1481 = vst [vmem:[%s2648_s6 + $0xd0] sm:$0xff] %v1417_v59  ;;  %v949_v62 = vmax.f32 %v612_v58, %v811_v60  ;;  %v360_v58 = vld [vmem:[%s2646_s1 + $0x180] sm:$0xff] }
 0x17f   :  { %v1286_v1 = vmax.f32 %v949_v62, %v1148_v61 }
 0x180   :  { %v204_v2 = vpop.f32.mrf.mxu0  ;;  %v477_v3 = vpop.f32.mrf.mxu1 }
 0x181   :  { %v1354_v6 = vadd.f32 %v1815_v26, %v1286_v1  ;;  %861 = vmatmul.f32.gmra.mxu2 %v693_v63  ;;  %v613_v7 = vmax.f32 %v204_v2, %v477_v3  ;;  %1198 = vmatmul.f32.gmra.mxu3 %v1030_v0  ;;  %v1031_v26 = vld [vmem:[%s2644_s3 + $0x168] sm:$0xff] }
 0x182   :  { %v698_v1 = vld [vmem:[%s2643_s2 + $0x188] sm:$0xff] }
 0x183   :  { %v1418_v8 = vmax.f32 %v1354_v6, 0.0  ;;  %251 = vmatmul.f32.gmra.mxu0 %v83_v4  ;;  %524 = vmatmul.f32.gmra.mxu1 %v356_v5  ;;  %v1035_v2 = vld [vmem:[%s2644_s3 + $0x188] sm:$0xff] }
 0x184   :  { %v814_v9 = vpop.f32.mrf.mxu2  ;;  %v1151_v10 = vpop.f32.mrf.mxu3  ;;  %v88_v6 = vld [vmem:[%s2645_s0 + $0x188] sm:$0xff] }
 0x185   :  { %1482 = vst [vmem:[%s2648_s6 + $0xd8] sm:$0xff] %v1418_v8  ;;  %v950_v11 = vmax.f32 %v613_v7, %v814_v9  ;;  %v361_v7 = vld [vmem:[%s2646_s1 + $0x188] sm:$0xff] }
 0x187   :  { %v1287_v13 = vmax.f32 %v950_v11, %v1151_v10 }
 0x188   :  { %v207_v14 = vpop.f32.mrf.mxu0  ;;  %v480_v15 = vpop.f32.mrf.mxu1 }
 0x189   :  { %v1355_v19 = vadd.f32 %v2280_v18, %v1287_v13  ;;  %864 = vmatmul.f32.gmra.mxu2 %v694_v12  ;;  %v614_v20 = vmax.f32 %v207_v14, %v480_v15  ;;  %1201 = vmatmul.f32.gmra.mxu3 %v1031_v26  ;;  %v699_v13 = vld [vmem:[%s2643_s2 + $0x190] sm:$0xff] }
 0x18a   :  { %v1036_v14 = vld [vmem:[%s2644_s3 + $0x190] sm:$0xff] }
 0x18b   :  { %v1419_v21 = vmax.f32 %v1355_v19, 0.0  ;;  %254 = vmatmul.f32.gmra.mxu0 %v84_v16  ;;  %527 = vmatmul.f32.gmra.mxu1 %v357_v17  ;;  %v89_v19 = vld [vmem:[%s2645_s0 + $0x190] sm:$0xff] }
 0x18c   :  { %v817_v22 = vpop.f32.mrf.mxu2  ;;  %v1154_v23 = vpop.f32.mrf.mxu3 }
 0x18d   :  { %1483 = vst [vmem:[%s2648_s6 + $0xe0] sm:$0xff] %v1419_v21  ;;  %v951_v24 = vmax.f32 %v614_v20, %v817_v22  ;;  %v362_v20 = vld [vmem:[%s2646_s1 + $0x190] sm:$0xff] }
 0x18f   :  { %v1288_v28 = vmax.f32 %v951_v24, %v1154_v23 }
 0x190   :  { %v210_v29 = vpop.f32.mrf.mxu0  ;;  %v483_v30 = vpop.f32.mrf.mxu1 }
 0x191   :  { %v1356_v33 = vadd.f32 %v2280_v18, %v1288_v28  ;;  %867 = vmatmul.f32.gmra.mxu2 %v695_v25  ;;  %v615_v34 = vmax.f32 %v210_v29, %v483_v30  ;;  %1204 = vmatmul.f32.gmra.mxu3 %v1032_v27  ;;  %v700_v28 = vld [vmem:[%s2643_s2 + $0x198] sm:$0xff] }
 0x192   :  { %v1037_v29 = vld [vmem:[%s2644_s3 + $0x198] sm:$0xff] }
 0x193   :  { %v1420_v35 = vmax.f32 %v1356_v33, 0.0  ;;  %257 = vmatmul.f32.gmra.mxu0 %v85_v31  ;;  %530 = vmatmul.f32.gmra.mxu1 %v358_v32  ;;  %v90_v33 = vld [vmem:[%s2645_s0 + $0x198] sm:$0xff] }
 0x194   :  { %v820_v36 = vpop.f32.mrf.mxu2  ;;  %v1157_v37 = vpop.f32.mrf.mxu3 }
 0x195   :  { %1484 = vst [vmem:[%s2648_s6 + $0xe8] sm:$0xff] %v1420_v35  ;;  %v952_v38 = vmax.f32 %v615_v34, %v820_v36  ;;  %v363_v34 = vld [vmem:[%s2646_s1 + $0x198] sm:$0xff] }
 0x197   :  { %v1289_v41 = vmax.f32 %v952_v38, %v1157_v37 }
 0x198   :  { %v213_v42 = vpop.f32.mrf.mxu0  ;;  %v486_v43 = vpop.f32.mrf.mxu1 }
 0x199   :  { %v1357_v46 = vadd.f32 %v2280_v18, %v1289_v41  ;;  %870 = vmatmul.f32.gmra.mxu2 %v696_v39  ;;  %v616_v47 = vmax.f32 %v213_v42, %v486_v43  ;;  %1207 = vmatmul.f32.gmra.mxu3 %v1033_v40  ;;  %v701_v41 = vld [vmem:[%s2643_s2 + $0x1a0] sm:$0xff] }
 0x19a   :  { %v1038_v42 = vld [vmem:[%s2644_s3 + $0x1a0] sm:$0xff] }
 0x19b   :  { %v1421_v48 = vmax.f32 %v1357_v46, 0.0  ;;  %260 = vmatmul.f32.gmra.mxu0 %v86_v44  ;;  %533 = vmatmul.f32.gmra.mxu1 %v359_v45  ;;  %v91_v46 = vld [vmem:[%s2645_s0 + $0x1a0] sm:$0xff] }
 0x19c   :  { %v823_v49 = vpop.f32.mrf.mxu2  ;;  %v1160_v50 = vpop.f32.mrf.mxu3 }
 0x19d   :  { %1485 = vst [vmem:[%s2648_s6 + $0xf0] sm:$0xff] %v1421_v48  ;;  %v953_v51 = vmax.f32 %v616_v47, %v823_v49  ;;  %v364_v47 = vld [vmem:[%s2646_s1 + $0x1a0] sm:$0xff] }
 0x19f   :  { %v1290_v54 = vmax.f32 %v953_v51, %v1160_v50 }
 0x1a0   :  { %v216_v55 = vpop.f32.mrf.mxu0  ;;  %v489_v56 = vpop.f32.mrf.mxu1 }
 0x1a1   :  { %v1358_v59 = vadd.f32 %v2280_v18, %v1290_v54  ;;  %873 = vmatmul.f32.gmra.mxu2 %v697_v52  ;;  %v617_v60 = vmax.f32 %v216_v55, %v489_v56  ;;  %1210 = vmatmul.f32.gmra.mxu3 %v1034_v53  ;;  %v702_v54 = vld [vmem:[%s2643_s2 + $0x1a8] sm:$0xff] }
 0x1a2   :  { %v1039_v55 = vld [vmem:[%s2644_s3 + $0x1a8] sm:$0xff] }
 0x1a3   :  { %v1422_v61 = vmax.f32 %v1358_v59, 0.0  ;;  %263 = vmatmul.f32.gmra.mxu0 %v87_v57  ;;  %536 = vmatmul.f32.gmra.mxu1 %v360_v58  ;;  %v92_v59 = vld [vmem:[%s2645_s0 + $0x1a8] sm:$0xff] }
 0x1a4   :  { %v826_v62 = vpop.f32.mrf.mxu2  ;;  %v1163_v63 = vpop.f32.mrf.mxu3 }
 0x1a5   :  { %1486 = vst [vmem:[%s2648_s6 + $0xf8] sm:$0xff] %v1422_v61  ;;  %v954_v0 = vmax.f32 %v617_v60, %v826_v62  ;;  %v365_v60 = vld [vmem:[%s2646_s1 + $0x1a8] sm:$0xff] }
 0x1a7   :  { %v1291_v3 = vmax.f32 %v954_v0, %v1163_v63 }
 0x1a8   :  { %v219_v4 = vpop.f32.mrf.mxu0  ;;  %v492_v5 = vpop.f32.mrf.mxu1 }
 0x1a9   :  { %v1359_v8 = vadd.f32 %v2280_v18, %v1291_v3  ;;  %876 = vmatmul.f32.gmra.mxu2 %v698_v1  ;;  %v618_v9 = vmax.f32 %v219_v4, %v492_v5  ;;  %1213 = vmatmul.f32.gmra.mxu3 %v1035_v2  ;;  %v703_v3 = vld [vmem:[%s2643_s2 + $0x1b0] sm:$0xff] }
 0x1aa   :  { %v1040_v4 = vld [vmem:[%s2644_s3 + $0x1b0] sm:$0xff] }
 0x1ab   :  { %v1423_v10 = vmax.f32 %v1359_v8, 0.0  ;;  %266 = vmatmul.f32.gmra.mxu0 %v88_v6  ;;  %539 = vmatmul.f32.gmra.mxu1 %v361_v7  ;;  %v93_v8 = vld [vmem:[%s2645_s0 + $0x1b0] sm:$0xff] }
 0x1ac   :  { %v829_v11 = vpop.f32.mrf.mxu2  ;;  %v1166_v12 = vpop.f32.mrf.mxu3 }
 0x1ad   :  { %1487 = vst [vmem:[%s2648_s6 + $0x100] sm:$0xff] %v1423_v10  ;;  %v955_v26 = vmax.f32 %v618_v9, %v829_v11  ;;  %v366_v9 = vld [vmem:[%s2646_s1 + $0x1b0] sm:$0xff] }
 0x1af   :  { %v1292_v15 = vmax.f32 %v955_v26, %v1166_v12 }
 0x1b0   :  { %v222_v16 = vpop.f32.mrf.mxu0  ;;  %v495_v17 = vpop.f32.mrf.mxu1 }
 0x1b1   :  { %v1360_v21 = vadd.f32 %v2280_v18, %v1292_v15  ;;  %879 = vmatmul.f32.gmra.mxu2 %v699_v13  ;;  %v619_v22 = vmax.f32 %v222_v16, %v495_v17  ;;  %1216 = vmatmul.f32.gmra.mxu3 %v1036_v14  ;;  %v704_v15 = vld [vmem:[%s2643_s2 + $0x1b8] sm:$0xff] }
 0x1b2   :  { %v1041_v16 = vld [vmem:[%s2644_s3 + $0x1b8] sm:$0xff] }
 0x1b3   :  { %v1424_v23 = vmax.f32 %v1360_v21, 0.0  ;;  %269 = vmatmul.f32.gmra.mxu0 %v89_v19  ;;  %542 = vmatmul.f32.gmra.mxu1 %v362_v20  ;;  %v94_v21 = vld [vmem:[%s2645_s0 + $0x1b8] sm:$0xff] }
 0x1b4   :  { %v832_v24 = vpop.f32.mrf.mxu2  ;;  %v1169_v25 = vpop.f32.mrf.mxu3 }
 0x1b5   :  { %1488 = vst [vmem:[%s2648_s6 + $0x108] sm:$0xff] %v1424_v23  ;;  %v956_v27 = vmax.f32 %v619_v22, %v832_v24  ;;  %v367_v22 = vld [vmem:[%s2646_s1 + $0x1b8] sm:$0xff] }
 0x1b7   :  { %v1293_v30 = vmax.f32 %v956_v27, %v1169_v25 }
 0x1b8   :  { %v225_v31 = vpop.f32.mrf.mxu0  ;;  %v498_v32 = vpop.f32.mrf.mxu1 }
 0x1b9   :  { %v1361_v35 = vadd.f32 %v2280_v18, %v1293_v30  ;;  %882 = vmatmul.f32.gmra.mxu2 %v700_v28  ;;  %v620_v36 = vmax.f32 %v225_v31, %v498_v32  ;;  %1219 = vmatmul.f32.gmra.mxu3 %v1037_v29  ;;  %v705_v30 = vld [vmem:[%s2643_s2 + $0x1c0] sm:$0xff] }
 0x1ba   :  { %v1042_v31 = vld [vmem:[%s2644_s3 + $0x1c0] sm:$0xff] }
 0x1bb   :  { %v1425_v37 = vmax.f32 %v1361_v35, 0.0  ;;  %272 = vmatmul.f32.gmra.mxu0 %v90_v33  ;;  %545 = vmatmul.f32.gmra.mxu1 %v363_v34  ;;  %v95_v35 = vld [vmem:[%s2645_s0 + $0x1c0] sm:$0xff] }
 0x1bc   :  { %v835_v38 = vpop.f32.mrf.mxu2  ;;  %v1172_v39 = vpop.f32.mrf.mxu3 }
 0x1bd   :  { %1489 = vst [vmem:[%s2648_s6 + $0x110] sm:$0xff] %v1425_v37  ;;  %v957_v40 = vmax.f32 %v620_v36, %v835_v38  ;;  %v368_v36 = vld [vmem:[%s2646_s1 + $0x1c0] sm:$0xff] }
 0x1bf   :  { %v1294_v43 = vmax.f32 %v957_v40, %v1172_v39 }
 0x1c0   :  { %v228_v44 = vpop.f32.mrf.mxu0  ;;  %v501_v45 = vpop.f32.mrf.mxu1 }
 0x1c1   :  { %v1362_v48 = vadd.f32 %v2280_v18, %v1294_v43  ;;  %885 = vmatmul.f32.gmra.mxu2 %v701_v41  ;;  %v621_v49 = vmax.f32 %v228_v44, %v501_v45  ;;  %1222 = vmatmul.f32.gmra.mxu3 %v1038_v42  ;;  %v706_v43 = vld [vmem:[%s2643_s2 + $0x1c8] sm:$0xff] }
 0x1c2   :  { %v1043_v44 = vld [vmem:[%s2644_s3 + $0x1c8] sm:$0xff] }
 0x1c3   :  { %v1426_v50 = vmax.f32 %v1362_v48, 0.0  ;;  %275 = vmatmul.f32.gmra.mxu0 %v91_v46  ;;  %548 = vmatmul.f32.gmra.mxu1 %v364_v47  ;;  %v96_v48 = vld [vmem:[%s2645_s0 + $0x1c8] sm:$0xff] }
 0x1c4   :  { %v838_v51 = vpop.f32.mrf.mxu2  ;;  %v1175_v52 = vpop.f32.mrf.mxu3 }
 0x1c5   :  { %1490 = vst [vmem:[%s2648_s6 + $0x118] sm:$0xff] %v1426_v50  ;;  %v958_v53 = vmax.f32 %v621_v49, %v838_v51  ;;  %v369_v49 = vld [vmem:[%s2646_s1 + $0x1c8] sm:$0xff] }
 0x1c7   :  { %v1295_v56 = vmax.f32 %v958_v53, %v1175_v52 }
 0x1c8   :  { %v231_v57 = vpop.f32.mrf.mxu0  ;;  %v504_v58 = vpop.f32.mrf.mxu1 }
 0x1c9   :  { %v1363_v61 = vadd.f32 %v2280_v18, %v1295_v56  ;;  %888 = vmatmul.f32.gmra.mxu2 %v702_v54  ;;  %v622_v62 = vmax.f32 %v231_v57, %v504_v58  ;;  %1225 = vmatmul.f32.gmra.mxu3 %v1039_v55  ;;  %v707_v56 = vld [vmem:[%s2643_s2 + $0x1d0] sm:$0xff] }
 0x1ca   :  { %v1044_v57 = vld [vmem:[%s2644_s3 + $0x1d0] sm:$0xff] }
 0x1cb   :  { %v1427_v63 = vmax.f32 %v1363_v61, 0.0  ;;  %278 = vmatmul.f32.gmra.mxu0 %v92_v59  ;;  %551 = vmatmul.f32.gmra.mxu1 %v365_v60  ;;  %v97_v61 = vld [vmem:[%s2645_s0 + $0x1d0] sm:$0xff] }
 0x1cc   :  { %v841_v0 = vpop.f32.mrf.mxu2  ;;  %v1178_v1 = vpop.f32.mrf.mxu3 }
 0x1cd   :  { %1491 = vst [vmem:[%s2648_s6 + $0x120] sm:$0xff] %v1427_v63  ;;  %v959_v2 = vmax.f32 %v622_v62, %v841_v0  ;;  %v370_v62 = vld [vmem:[%s2646_s1 + $0x1d0] sm:$0xff] }
 0x1cf   :  { %v1296_v5 = vmax.f32 %v959_v2, %v1178_v1 }
 0x1d0   :  { %v234_v6 = vpop.f32.mrf.mxu0  ;;  %v507_v7 = vpop.f32.mrf.mxu1 }
 0x1d1   :  { %v1364_v10 = vadd.f32 %v2280_v18, %v1296_v5  ;;  %891 = vmatmul.f32.gmra.mxu2 %v703_v3  ;;  %v623_v11 = vmax.f32 %v234_v6, %v507_v7  ;;  %1228 = vmatmul.f32.gmra.mxu3 %v1040_v4  ;;  %v708_v5 = vld [vmem:[%s2643_s2 + $0x1d8] sm:$0xff] }
 0x1d2   :  { %v1045_v6 = vld [vmem:[%s2644_s3 + $0x1d8] sm:$0xff] }
 0x1d3   :  { %v1428_v12 = vmax.f32 %v1364_v10, 0.0  ;;  %281 = vmatmul.f32.gmra.mxu0 %v93_v8  ;;  %554 = vmatmul.f32.gmra.mxu1 %v366_v9  ;;  %v98_v10 = vld [vmem:[%s2645_s0 + $0x1d8] sm:$0xff] }
 0x1d4   :  { %v844_v26 = vpop.f32.mrf.mxu2  ;;  %v1181_v13 = vpop.f32.mrf.mxu3 }
 0x1d5   :  { %1492 = vst [vmem:[%s2648_s6 + $0x128] sm:$0xff] %v1428_v12  ;;  %v960_v14 = vmax.f32 %v623_v11, %v844_v26  ;;  %v371_v11 = vld [vmem:[%s2646_s1 + $0x1d8] sm:$0xff] }
 0x1d7   :  { %v1297_v17 = vmax.f32 %v960_v14, %v1181_v13 }
 0x1d8   :  { %v237_v19 = vpop.f32.mrf.mxu0  ;;  %v510_v20 = vpop.f32.mrf.mxu1 }
 0x1d9   :  { %v1365_v23 = vadd.f32 %v2280_v18, %v1297_v17  ;;  %894 = vmatmul.f32.gmra.mxu2 %v704_v15  ;;  %v624_v24 = vmax.f32 %v237_v19, %v510_v20  ;;  %1231 = vmatmul.f32.gmra.mxu3 %v1041_v16  ;;  %v709_v17 = vld [vmem:[%s2643_s2 + $0x1e0] sm:$0xff] }
 0x1da   :  { %v1046_v19 = vld [vmem:[%s2644_s3 + $0x1e0] sm:$0xff] }
 0x1db   :  { %v1429_v25 = vmax.f32 %v1365_v23, 0.0  ;;  %284 = vmatmul.f32.gmra.mxu0 %v94_v21  ;;  %557 = vmatmul.f32.gmra.mxu1 %v367_v22  ;;  %v99_v23 = vld [vmem:[%s2645_s0 + $0x1e0] sm:$0xff] }
 0x1dc   :  { %v847_v27 = vpop.f32.mrf.mxu2  ;;  %v1184_v28 = vpop.f32.mrf.mxu3 }
 0x1dd   :  { %1493 = vst [vmem:[%s2648_s6 + $0x130] sm:$0xff] %v1429_v25  ;;  %v961_v29 = vmax.f32 %v624_v24, %v847_v27  ;;  %v372_v24 = vld [vmem:[%s2646_s1 + $0x1e0] sm:$0xff] }
 0x1df   :  { %v1298_v32 = vmax.f32 %v961_v29, %v1184_v28 }
 0x1e0   :  { %v240_v33 = vpop.f32.mrf.mxu0  ;;  %v513_v34 = vpop.f32.mrf.mxu1 }
 0x1e1   :  { %v1366_v37 = vadd.f32 %v2280_v18, %v1298_v32  ;;  %897 = vmatmul.f32.gmra.mxu2 %v705_v30  ;;  %v625_v38 = vmax.f32 %v240_v33, %v513_v34  ;;  %1234 = vmatmul.f32.gmra.mxu3 %v1042_v31  ;;  %v710_v32 = vld [vmem:[%s2643_s2 + $0x1e8] sm:$0xff] }
 0x1e2   :  { %v1047_v33 = vld [vmem:[%s2644_s3 + $0x1e8] sm:$0xff] }
 0x1e3   :  { %v1430_v39 = vmax.f32 %v1366_v37, 0.0  ;;  %287 = vmatmul.f32.gmra.mxu0 %v95_v35  ;;  %560 = vmatmul.f32.gmra.mxu1 %v368_v36  ;;  %v100_v37 = vld [vmem:[%s2645_s0 + $0x1e8] sm:$0xff] }
 0x1e4   :  { %v850_v40 = vpop.f32.mrf.mxu2  ;;  %v1187_v41 = vpop.f32.mrf.mxu3 }
 0x1e5   :  { %1494 = vst [vmem:[%s2648_s6 + $0x138] sm:$0xff] %v1430_v39  ;;  %v962_v42 = vmax.f32 %v625_v38, %v850_v40  ;;  %v373_v38 = vld [vmem:[%s2646_s1 + $0x1e8] sm:$0xff] }
 0x1e7   :  { %v1299_v45 = vmax.f32 %v962_v42, %v1187_v41 }
 0x1e8   :  { %v243_v46 = vpop.f32.mrf.mxu0  ;;  %v516_v47 = vpop.f32.mrf.mxu1 }
 0x1e9   :  { %v1367_v50 = vadd.f32 %v2280_v18, %v1299_v45  ;;  %900 = vmatmul.f32.gmra.mxu2 %v706_v43  ;;  %v626_v51 = vmax.f32 %v243_v46, %v516_v47  ;;  %1237 = vmatmul.f32.gmra.mxu3 %v1043_v44  ;;  %v711_v45 = vld [vmem:[%s2643_s2 + $0x1f0] sm:$0xff] }
 0x1ea   :  { %v1048_v46 = vld [vmem:[%s2644_s3 + $0x1f0] sm:$0xff] }
 0x1eb   :  { %v1431_v52 = vmax.f32 %v1367_v50, 0.0  ;;  %290 = vmatmul.f32.gmra.mxu0 %v96_v48  ;;  %563 = vmatmul.f32.gmra.mxu1 %v369_v49  ;;  %v101_v50 = vld [vmem:[%s2645_s0 + $0x1f0] sm:$0xff] }
 0x1ec   :  { %v853_v53 = vpop.f32.mrf.mxu2  ;;  %v1190_v54 = vpop.f32.mrf.mxu3 }
 0x1ed   :  { %1495 = vst [vmem:[%s2648_s6 + $0x140] sm:$0xff] %v1431_v52  ;;  %v963_v55 = vmax.f32 %v626_v51, %v853_v53  ;;  %v374_v51 = vld [vmem:[%s2646_s1 + $0x1f0] sm:$0xff] }
 0x1ef   :  { %v1300_v58 = vmax.f32 %v963_v55, %v1190_v54 }
 0x1f0   :  { %v246_v59 = vpop.f32.mrf.mxu0  ;;  %v519_v60 = vpop.f32.mrf.mxu1 }
 0x1f1   :  { %v1368_v63 = vadd.f32 %v2280_v18, %v1300_v58  ;;  %903 = vmatmul.f32.gmra.mxu2 %v707_v56  ;;  %v627_v0 = vmax.f32 %v246_v59, %v519_v60  ;;  %1240 = vmatmul.f32.gmra.mxu3 %v1044_v57  ;;  %v712_v58 = vld [vmem:[%s2643_s2 + $0x1f8] sm:$0xff] }
 0x1f2   :  { %v1049_v59 = vld [vmem:[%s2644_s3 + $0x1f8] sm:$0xff] }
 0x1f3   :  { %v1432_v1 = vmax.f32 %v1368_v63, 0.0  ;;  %293 = vmatmul.f32.gmra.mxu0 %v97_v61  ;;  %566 = vmatmul.f32.gmra.mxu1 %v370_v62  ;;  %v102_v63 = vld [vmem:[%s2645_s0 + $0x1f8] sm:$0xff] }
 0x1f4   :  { %v856_v2 = vpop.f32.mrf.mxu2  ;;  %v1193_v3 = vpop.f32.mrf.mxu3 }
 0x1f5   :  { %1496 = vst [vmem:[%s2648_s6 + $0x148] sm:$0xff] %v1432_v1  ;;  %v964_v4 = vmax.f32 %v627_v0, %v856_v2  ;;  %v375_v0 = vld [vmem:[%s2646_s1 + $0x1f8] sm:$0xff] }
 0x1f7   :  { %v1301_v7 = vmax.f32 %v964_v4, %v1193_v3 }
 0x1f8   :  { %v249_v8 = vpop.f32.mrf.mxu0  ;;  %v522_v9 = vpop.f32.mrf.mxu1 }
 0x1f9   :  { %v1369_v12 = vadd.f32 %v2280_v18, %v1301_v7  ;;  %906 = vmatmul.f32.gmra.mxu2 %v708_v5  ;;  %v628_v26 = vmax.f32 %v249_v8, %v522_v9  ;;  %1243 = vmatmul.f32.gmra.mxu3 %v1045_v6 }
 0x1fb   :  { %v1433_v13 = vmax.f32 %v1369_v12, 0.0  ;;  %296 = vmatmul.f32.gmra.mxu0 %v98_v10  ;;  %569 = vmatmul.f32.gmra.mxu1 %v371_v11 }
 0x1fc   :  { %v859_v14 = vpop.f32.mrf.mxu2  ;;  %v1196_v15 = vpop.f32.mrf.mxu3 }
 0x1fd   :  { %1497 = vst [vmem:[%s2648_s6 + $0x150] sm:$0xff] %v1433_v13  ;;  %v965_v16 = vmax.f32 %v628_v26, %v859_v14 }
 0x1ff   :  { %v1302_v20 = vmax.f32 %v965_v16, %v1196_v15 }
 0x200   :  { %v252_v21 = vpop.f32.mrf.mxu0  ;;  %v525_v22 = vpop.f32.mrf.mxu1 }
 0x201   :  { %v1370_v25 = vadd.f32 %v2280_v18, %v1302_v20  ;;  %909 = vmatmul.f32.gmra.mxu2 %v709_v17  ;;  %v629_v27 = vmax.f32 %v252_v21, %v525_v22  ;;  %1246 = vmatmul.f32.gmra.mxu3 %v1046_v19 }
 0x203   :  { %v1434_v28 = vmax.f32 %v1370_v25, 0.0  ;;  %299 = vmatmul.f32.gmra.mxu0 %v99_v23  ;;  %572 = vmatmul.f32.gmra.mxu1 %v372_v24 }
 0x204   :  { %v862_v29 = vpop.f32.mrf.mxu2  ;;  %v1199_v30 = vpop.f32.mrf.mxu3 }
 0x205   :  { %1498 = vst [vmem:[%s2648_s6 + $0x158] sm:$0xff] %v1434_v28  ;;  %v966_v31 = vmax.f32 %v629_v27, %v862_v29 }
 0x207   :  { %v1303_v34 = vmax.f32 %v966_v31, %v1199_v30 }
 0x208   :  { %v255_v35 = vpop.f32.mrf.mxu0  ;;  %v528_v36 = vpop.f32.mrf.mxu1 }
 0x209   :  { %v1371_v39 = vadd.f32 %v2280_v18, %v1303_v34  ;;  %912 = vmatmul.f32.gmra.mxu2 %v710_v32  ;;  %v630_v40 = vmax.f32 %v255_v35, %v528_v36  ;;  %1249 = vmatmul.f32.gmra.mxu3 %v1047_v33 }
 0x20b   :  { %v1435_v41 = vmax.f32 %v1371_v39, 0.0  ;;  %302 = vmatmul.f32.gmra.mxu0 %v100_v37  ;;  %575 = vmatmul.f32.gmra.mxu1 %v373_v38 }
 0x20c   :  { %v865_v42 = vpop.f32.mrf.mxu2  ;;  %v1202_v43 = vpop.f32.mrf.mxu3 }
 0x20d   :  { %1499 = vst [vmem:[%s2648_s6 + $0x160] sm:$0xff] %v1435_v41  ;;  %v967_v44 = vmax.f32 %v630_v40, %v865_v42 }
 0x20f   :  { %v1304_v47 = vmax.f32 %v967_v44, %v1202_v43 }
 0x210   :  { %v258_v48 = vpop.f32.mrf.mxu0  ;;  %v531_v49 = vpop.f32.mrf.mxu1 }
 0x211   :  { %v1372_v52 = vadd.f32 %v2280_v18, %v1304_v47  ;;  %915 = vmatmul.f32.gmra.mxu2 %v711_v45  ;;  %v631_v53 = vmax.f32 %v258_v48, %v531_v49  ;;  %1252 = vmatmul.f32.gmra.mxu3 %v1048_v46 }
 0x213   :  { %v1436_v54 = vmax.f32 %v1372_v52, 0.0  ;;  %305 = vmatmul.f32.gmra.mxu0 %v101_v50  ;;  %578 = vmatmul.f32.gmra.mxu1 %v374_v51 }
 0x214   :  { %v868_v55 = vpop.f32.mrf.mxu2  ;;  %v1205_v56 = vpop.f32.mrf.mxu3 }
 0x215   :  { %1500 = vst [vmem:[%s2648_s6 + $0x168] sm:$0xff] %v1436_v54  ;;  %v968_v57 = vmax.f32 %v631_v53, %v868_v55 }
 0x217   :  { %v1305_v60 = vmax.f32 %v968_v57, %v1205_v56 }
 0x218   :  { %v261_v61 = vpop.f32.mrf.mxu0  ;;  %v534_v62 = vpop.f32.mrf.mxu1 }
 0x219   :  { %v1373_v1 = vadd.f32 %v2280_v18, %v1305_v60  ;;  %918 = vmatmul.f32.gmra.mxu2 %v712_v58  ;;  %v632_v2 = vmax.f32 %v261_v61, %v534_v62  ;;  %1255 = vmatmul.f32.gmra.mxu3 %v1049_v59 }
 0x21b   :  { %v1437_v3 = vmax.f32 %v1373_v1, 0.0  ;;  %308 = vmatmul.f32.gmra.mxu0 %v102_v63  ;;  %581 = vmatmul.f32.gmra.mxu1 %v375_v0 }
 0x21c   :  { %v871_v4 = vpop.f32.mrf.mxu2  ;;  %v1208_v5 = vpop.f32.mrf.mxu3 }
 0x21d   :  { %1501 = vst [vmem:[%s2648_s6 + $0x170] sm:$0xff] %v1437_v3  ;;  %v969_v6 = vmax.f32 %v632_v2, %v871_v4 }
 0x21f   :  { %v1306_v7 = vmax.f32 %v969_v6, %v1208_v5 }
 0x220   :  { %v264_v8 = vpop.f32.mrf.mxu0  ;;  %v537_v9 = vpop.f32.mrf.mxu1 }
 0x221   :  { %v1374_v10 = vadd.f32 %v2280_v18, %v1306_v7  ;;  %v633_v11 = vmax.f32 %v264_v8, %v537_v9 }
 0x223   :  { %v1438_v12 = vmax.f32 %v1374_v10, 0.0 }
 0x224   :  { %v874_v26 = vpop.f32.mrf.mxu2  ;;  %v1211_v13 = vpop.f32.mrf.mxu3 }
 0x225   :  { %1502 = vst [vmem:[%s2648_s6 + $0x178] sm:$0xff] %v1438_v12  ;;  %v970_v14 = vmax.f32 %v633_v11, %v874_v26 }
 0x227   :  { %v1307_v15 = vmax.f32 %v970_v14, %v1211_v13 }
 0x228   :  { %v267_v16 = vpop.f32.mrf.mxu0  ;;  %v540_v17 = vpop.f32.mrf.mxu1 }
 0x229   :  { %v1375_v19 = vadd.f32 %v2280_v18, %v1307_v15  ;;  %v634_v20 = vmax.f32 %v267_v16, %v540_v17 }
 0x22b   :  { %v1439_v21 = vmax.f32 %v1375_v19, 0.0 }
 0x22c   :  { %v877_v22 = vpop.f32.mrf.mxu2  ;;  %v1214_v23 = vpop.f32.mrf.mxu3 }
 0x22d   :  { %1503 = vst [vmem:[%s2648_s6 + $0x180] sm:$0xff] %v1439_v21  ;;  %v971_v24 = vmax.f32 %v634_v20, %v877_v22 }
 0x22f   :  { %v1308_v25 = vmax.f32 %v971_v24, %v1214_v23 }
 0x230   :  { %v270_v27 = vpop.f32.mrf.mxu0  ;;  %v543_v28 = vpop.f32.mrf.mxu1 }
 0x231   :  { %v1376_v29 = vadd.f32 %v2280_v18, %v1308_v25  ;;  %v635_v30 = vmax.f32 %v270_v27, %v543_v28 }
 0x233   :  { %v1440_v31 = vmax.f32 %v1376_v29, 0.0 }
 0x234   :  { %v880_v32 = vpop.f32.mrf.mxu2  ;;  %v1217_v33 = vpop.f32.mrf.mxu3 }
 0x235   :  { %1504 = vst [vmem:[%s2648_s6 + $0x188] sm:$0xff] %v1440_v31  ;;  %v972_v34 = vmax.f32 %v635_v30, %v880_v32 }
 0x237   :  { %v1309_v35 = vmax.f32 %v972_v34, %v1217_v33 }
 0x238   :  { %v273_v36 = vpop.f32.mrf.mxu0  ;;  %v546_v37 = vpop.f32.mrf.mxu1 }
 0x239   :  { %v1377_v38 = vadd.f32 %v2280_v18, %v1309_v35  ;;  %v636_v39 = vmax.f32 %v273_v36, %v546_v37 }
 0x23b   :  { %v1441_v40 = vmax.f32 %v1377_v38, 0.0 }
 0x23c   :  { %v883_v41 = vpop.f32.mrf.mxu2  ;;  %v1220_v42 = vpop.f32.mrf.mxu3 }
 0x23d   :  { %1505 = vst [vmem:[%s2648_s6 + $0x190] sm:$0xff] %v1441_v40  ;;  %v973_v43 = vmax.f32 %v636_v39, %v883_v41 }
 0x23f   :  { %v1310_v44 = vmax.f32 %v973_v43, %v1220_v42 }
 0x240   :  { %v276_v45 = vpop.f32.mrf.mxu0  ;;  %v549_v46 = vpop.f32.mrf.mxu1 }
 0x241   :  { %v1378_v47 = vadd.f32 %v2280_v18, %v1310_v44  ;;  %v637_v48 = vmax.f32 %v276_v45, %v549_v46 }
 0x243   :  { %v1442_v49 = vmax.f32 %v1378_v47, 0.0 }
 0x244   :  { %v886_v50 = vpop.f32.mrf.mxu2  ;;  %v1223_v51 = vpop.f32.mrf.mxu3 }
 0x245   :  { %1506 = vst [vmem:[%s2648_s6 + $0x198] sm:$0xff] %v1442_v49  ;;  %v974_v52 = vmax.f32 %v637_v48, %v886_v50 }
 0x247   :  { %v1311_v53 = vmax.f32 %v974_v52, %v1223_v51 }
 0x248   :  { %v279_v54 = vpop.f32.mrf.mxu0  ;;  %v552_v55 = vpop.f32.mrf.mxu1 }
 0x249   :  { %v1379_v56 = vadd.f32 %v2280_v18, %v1311_v53  ;;  %v638_v57 = vmax.f32 %v279_v54, %v552_v55 }
 0x24b   :  { %v1443_v58 = vmax.f32 %v1379_v56, 0.0 }
 0x24c   :  { %v889_v59 = vpop.f32.mrf.mxu2  ;;  %v1226_v60 = vpop.f32.mrf.mxu3 }
 0x24d   :  { %1507 = vst [vmem:[%s2648_s6 + $0x1a0] sm:$0xff] %v1443_v58  ;;  %v975_v61 = vmax.f32 %v638_v57, %v889_v59 }
 0x24f   :  { %v1312_v62 = vmax.f32 %v975_v61, %v1226_v60 }
 0x250   :  { %v282_v63 = vpop.f32.mrf.mxu0  ;;  %v555_v0 = vpop.f32.mrf.mxu1 }
 0x251   :  { %v1380_v1 = vadd.f32 %v2280_v18, %v1312_v62  ;;  %v639_v2 = vmax.f32 %v282_v63, %v555_v0 }
 0x253   :  { %v1444_v3 = vmax.f32 %v1380_v1, 0.0 }
 0x254   :  { %v892_v4 = vpop.f32.mrf.mxu2  ;;  %v1229_v5 = vpop.f32.mrf.mxu3 }
 0x255   :  { %1508 = vst [vmem:[%s2648_s6 + $0x1a8] sm:$0xff] %v1444_v3  ;;  %v976_v6 = vmax.f32 %v639_v2, %v892_v4 }
 0x257   :  { %v1313_v7 = vmax.f32 %v976_v6, %v1229_v5 }
 0x258   :  { %v285_v8 = vpop.f32.mrf.mxu0  ;;  %v558_v9 = vpop.f32.mrf.mxu1 }
 0x259   :  { %v1381_v10 = vadd.f32 %v2280_v18, %v1313_v7  ;;  %v640_v11 = vmax.f32 %v285_v8, %v558_v9 }
 0x25b   :  { %v1445_v12 = vmax.f32 %v1381_v10, 0.0 }
 0x25c   :  { %v895_v26 = vpop.f32.mrf.mxu2  ;;  %v1232_v13 = vpop.f32.mrf.mxu3 }
 0x25d   :  { %1509 = vst [vmem:[%s2648_s6 + $0x1b0] sm:$0xff] %v1445_v12  ;;  %v977_v14 = vmax.f32 %v640_v11, %v895_v26 }
 0x25f   :  { %v1314_v15 = vmax.f32 %v977_v14, %v1232_v13 }
 0x260   :  { %v288_v16 = vpop.f32.mrf.mxu0  ;;  %v561_v17 = vpop.f32.mrf.mxu1 }
 0x261   :  { %v1382_v19 = vadd.f32 %v2280_v18, %v1314_v15  ;;  %v641_v20 = vmax.f32 %v288_v16, %v561_v17 }
 0x263   :  { %v1446_v21 = vmax.f32 %v1382_v19, 0.0 }
 0x264   :  { %v898_v22 = vpop.f32.mrf.mxu2  ;;  %v1235_v23 = vpop.f32.mrf.mxu3 }
 0x265   :  { %1510 = vst [vmem:[%s2648_s6 + $0x1b8] sm:$0xff] %v1446_v21  ;;  %v978_v24 = vmax.f32 %v641_v20, %v898_v22 }
 0x267   :  { %v1315_v25 = vmax.f32 %v978_v24, %v1235_v23 }
 0x268   :  { %v291_v27 = vpop.f32.mrf.mxu0  ;;  %v564_v28 = vpop.f32.mrf.mxu1 }
 0x269   :  { %v1383_v29 = vadd.f32 %v2280_v18, %v1315_v25  ;;  %v642_v30 = vmax.f32 %v291_v27, %v564_v28 }
 0x26b   :  { %v1447_v31 = vmax.f32 %v1383_v29, 0.0 }
 0x26c   :  { %v901_v32 = vpop.f32.mrf.mxu2  ;;  %v1238_v33 = vpop.f32.mrf.mxu3 }
 0x26d   :  { %1511 = vst [vmem:[%s2648_s6 + $0x1c0] sm:$0xff] %v1447_v31  ;;  %v979_v34 = vmax.f32 %v642_v30, %v901_v32 }
 0x26f   :  { %v1316_v35 = vmax.f32 %v979_v34, %v1238_v33 }
 0x270   :  { %v294_v36 = vpop.f32.mrf.mxu0  ;;  %v567_v37 = vpop.f32.mrf.mxu1 }
 0x271   :  { %v1384_v38 = vadd.f32 %v2280_v18, %v1316_v35  ;;  %v643_v39 = vmax.f32 %v294_v36, %v567_v37 }
 0x273   :  { %v1448_v40 = vmax.f32 %v1384_v38, 0.0 }
 0x274   :  { %v904_v41 = vpop.f32.mrf.mxu2  ;;  %v1241_v42 = vpop.f32.mrf.mxu3 }
 0x275   :  { %1512 = vst [vmem:[%s2648_s6 + $0x1c8] sm:$0xff] %v1448_v40  ;;  %v980_v43 = vmax.f32 %v643_v39, %v904_v41 }
 0x277   :  { %v1317_v44 = vmax.f32 %v980_v43, %v1241_v42 }
 0x278   :  { %v297_v45 = vpop.f32.mrf.mxu0  ;;  %v570_v46 = vpop.f32.mrf.mxu1 }
 0x279   :  { %v1385_v47 = vadd.f32 %v2280_v18, %v1317_v44  ;;  %v644_v48 = vmax.f32 %v297_v45, %v570_v46 }
 0x27b   :  { %v1449_v49 = vmax.f32 %v1385_v47, 0.0 }
 0x27c   :  { %v907_v50 = vpop.f32.mrf.mxu2  ;;  %v1244_v51 = vpop.f32.mrf.mxu3 }
 0x27d   :  { %1513 = vst [vmem:[%s2648_s6 + $0x1d0] sm:$0xff] %v1449_v49  ;;  %v981_v52 = vmax.f32 %v644_v48, %v907_v50 }
 0x27f   :  { %v1318_v53 = vmax.f32 %v981_v52, %v1244_v51 }
 0x280   :  { %v300_v54 = vpop.f32.mrf.mxu0  ;;  %v573_v55 = vpop.f32.mrf.mxu1 }
 0x281   :  { %v1386_v56 = vadd.f32 %v2280_v18, %v1318_v53  ;;  %v645_v57 = vmax.f32 %v300_v54, %v573_v55 }
 0x283   :  { %v1450_v58 = vmax.f32 %v1386_v56, 0.0 }
 0x284   :  { %v910_v59 = vpop.f32.mrf.mxu2  ;;  %v1247_v60 = vpop.f32.mrf.mxu3 }
 0x285   :  { %1514 = vst [vmem:[%s2648_s6 + $0x1d8] sm:$0xff] %v1450_v58  ;;  %v982_v61 = vmax.f32 %v645_v57, %v910_v59 }
 0x287   :  { %v1319_v62 = vmax.f32 %v982_v61, %v1247_v60 }
 0x288   :  { %v303_v63 = vpop.f32.mrf.mxu0  ;;  %v576_v0 = vpop.f32.mrf.mxu1 }
 0x289   :  { %v1387_v1 = vadd.f32 %v2280_v18, %v1319_v62  ;;  %v646_v2 = vmax.f32 %v303_v63, %v576_v0 }
 0x28b   :  { %v1451_v3 = vmax.f32 %v1387_v1, 0.0 }
 0x28c   :  { %v913_v4 = vpop.f32.mrf.mxu2  ;;  %v1250_v5 = vpop.f32.mrf.mxu3 }
 0x28d   :  { %1515 = vst [vmem:[%s2648_s6 + $0x1e0] sm:$0xff] %v1451_v3  ;;  %v983_v6 = vmax.f32 %v646_v2, %v913_v4 }
 0x28f   :  { %v1320_v7 = vmax.f32 %v983_v6, %v1250_v5 }
 0x290   :  { %v306_v8 = vpop.f32.mrf.mxu0  ;;  %v579_v9 = vpop.f32.mrf.mxu1 }
 0x291   :  { %v1388_v10 = vadd.f32 %v2280_v18, %v1320_v7  ;;  %v647_v11 = vmax.f32 %v306_v8, %v579_v9 }
 0x293   :  { %v1452_v12 = vmax.f32 %v1388_v10, 0.0 }
 0x294   :  { %v916_v26 = vpop.f32.mrf.mxu2  ;;  %v1253_v13 = vpop.f32.mrf.mxu3 }
 0x295   :  { %1516 = vst [vmem:[%s2648_s6 + $0x1e8] sm:$0xff] %v1452_v12  ;;  %v984_v14 = vmax.f32 %v647_v11, %v916_v26 }
 0x297   :  { %v1321_v15 = vmax.f32 %v984_v14, %v1253_v13 }
 0x298   :  { %v309_v16 = vpop.f32.mrf.mxu0  ;;  %v582_v17 = vpop.f32.mrf.mxu1 }
 0x299   :  { %v1389_v19 = vadd.f32 %v2280_v18, %v1321_v15  ;;  %v648_v20 = vmax.f32 %v309_v16, %v582_v17 }
 0x29b   :  { %v1453_v21 = vmax.f32 %v1389_v19, 0.0 }
 0x29c   :  { %v919_v22 = vpop.f32.mrf.mxu2  ;;  %v1256_v23 = vpop.f32.mrf.mxu3 }
 0x29d   :  { %1517 = vst [vmem:[%s2648_s6 + $0x1f0] sm:$0xff] %v1453_v21  ;;  %v985_v24 = vmax.f32 %v648_v20, %v919_v22 }
 0x29f   :  { %v1322_v25 = vmax.f32 %v985_v24, %v1256_v23 }
 0x2a1   :  { %v1390_v27 = vadd.f32 %v2280_v18, %v1322_v25 }
 0x2a3   :  { %v1454_v28 = vmax.f32 %v1390_v27, 0.0 }
 0x2a5   :  { %1518 = vst [vmem:[%s2648_s6 + $0x1f8] sm:$0xff] %v1454_v28 }

// kernel: lenet_forward.4
= control target key start
LH: loop header
LB: loop body
LE: loop exit
PB: predicated region body
PF: predicated region fallthrough
CT: control target
= control target key end

     0   :  { %s1728_s4 = inlined_call_operand.vmem [shape: f32[256,128], index: 4, kind: input, shape index: {}]   ;;  %s1729_s0 = inlined_call_operand.vmem [shape: f32[128,256], index: 0, kind: input, shape index: {}]   ;;  %s1730_s1 = inlined_call_operand.vmem [shape: f32[128,256], index: 1, kind: input, shape index: {}]   ;;  %s1731_s2 = inlined_call_operand.vmem [shape: f32[128,256], index: 2, kind: input, shape index: {}]   ;;  %s1732_s3 = inlined_call_operand.vmem [shape: f32[128,256], index: 3, kind: input, shape index: {}]   ;;  %s1733_s5 = inlined_call_operand.vmem [shape: f32[1,128], index: 5, kind: input, shape index: {}]   ;;  %s1734_s6 = inlined_call_operand.vmem [shape: f32[128,128], index: 6, kind: output, shape index: {}]  }
   0x1   :  { %v846_v0 = vld [vmem:[%s1728_s4 + $0x78] sm:$0xff]  ;;  %v856_v2 = vld [vmem:[%s1728_s4 + $0x70] sm:$0xff]  ;;  %v870_v4 = vld [vmem:[%s1728_s4 + $0x68] sm:$0xff] }
   0x2   :  { %v851_v1 = vld [vmem:[%s1728_s4 + $0xf8] sm:$0xff]  ;;  %87 = vmatpush.msra.mxu0 %v846_v0  ;;  %v863_v3 = vld [vmem:[%s1728_s4 + $0xf0] sm:$0xff]  ;;  %249 = vmatpush.msra.mxu2 %v846_v0  ;;  %v875_v5 = vld [vmem:[%s1728_s4 + $0xe8] sm:$0xff] }
   0x3   :  { %152 = vmatpush.msra.mxu1 %v851_v1  ;;  %314 = vmatpush.msra.mxu3 %v851_v1  ;;  %v884_v6 = vld [vmem:[%s1728_s4 + $0x60] sm:$0xff]  ;;  %v898_v8 = vld [vmem:[%s1728_s4 + $0x58] sm:$0xff]  ;;  %v912_v10 = vld [vmem:[%s1728_s4 + $0x50] sm:$0xff] }
   0x4   :  { %88 = vmatpush.msra.mxu0 %v856_v2  ;;  %250 = vmatpush.msra.mxu2 %v856_v2  ;;  %v889_v7 = vld [vmem:[%s1728_s4 + $0xe0] sm:$0xff]  ;;  %v903_v9 = vld [vmem:[%s1728_s4 + $0xd8] sm:$0xff]  ;;  %v917_v11 = vld [vmem:[%s1728_s4 + $0xd0] sm:$0xff] }
   0x5   :  { %153 = vmatpush.msra.mxu1 %v863_v3  ;;  %315 = vmatpush.msra.mxu3 %v863_v3  ;;  %v926_v12 = vld [vmem:[%s1728_s4 + $0x48] sm:$0xff]  ;;  %v940_v14 = vld [vmem:[%s1728_s4 + $0x40] sm:$0xff]  ;;  %v954_v16 = vld [vmem:[%s1728_s4 + $0x38] sm:$0xff] }
   0x6   :  { %89 = vmatpush.msra.mxu0 %v870_v4  ;;  %251 = vmatpush.msra.mxu2 %v870_v4  ;;  %v931_v13 = vld [vmem:[%s1728_s4 + $0xc8] sm:$0xff]  ;;  %v945_v15 = vld [vmem:[%s1728_s4 + $0xc0] sm:$0xff]  ;;  %v959_v17 = vld [vmem:[%s1728_s4 + $0xb8] sm:$0xff] }
   0x7   :  { %154 = vmatpush.msra.mxu1 %v875_v5  ;;  %316 = vmatpush.msra.mxu3 %v875_v5  ;;  %v968_v18 = vld [vmem:[%s1728_s4 + $0x30] sm:$0xff]  ;;  %v982_v20 = vld [vmem:[%s1728_s4 + $0x28] sm:$0xff]  ;;  %v996_v22 = vld [vmem:[%s1728_s4 + $0x20] sm:$0xff] }
   0x8   :  { %90 = vmatpush.msra.mxu0 %v884_v6  ;;  %252 = vmatpush.msra.mxu2 %v884_v6  ;;  %v973_v19 = vld [vmem:[%s1728_s4 + $0xb0] sm:$0xff]  ;;  %v987_v21 = vld [vmem:[%s1728_s4 + $0xa8] sm:$0xff]  ;;  %v1001_v23 = vld [vmem:[%s1728_s4 + $0xa0] sm:$0xff] }
   0x9   :  { %155 = vmatpush.msra.mxu1 %v889_v7  ;;  %317 = vmatpush.msra.mxu3 %v889_v7  ;;  %v1010_v24 = vld [vmem:[%s1728_s4 + $0x18] sm:$0xff]  ;;  %v1024_v26 = vld [vmem:[%s1728_s4 + $0x10] sm:$0xff]  ;;  %v1038_v28 = vld [vmem:[%s1728_s4 + $0x8] sm:$0xff] }
   0xa   :  { %91 = vmatpush.msra.mxu0 %v898_v8  ;;  %253 = vmatpush.msra.mxu2 %v898_v8  ;;  %v1015_v25 = vld [vmem:[%s1728_s4 + $0x98] sm:$0xff]  ;;  %v1029_v27 = vld [vmem:[%s1728_s4 + $0x90] sm:$0xff]  ;;  %v1043_v29 = vld [vmem:[%s1728_s4 + $0x88] sm:$0xff] }
   0xb   :  { %156 = vmatpush.msra.mxu1 %v903_v9  ;;  %318 = vmatpush.msra.mxu3 %v903_v9  ;;  %v1052_v30 = vld [vmem:[%s1728_s4] sm:$0xff]  ;;  %v56_v33 = vld [vmem:[%s1729_s0 + $0x8] sm:$0xff]  ;;  %v57_v36 = vld [vmem:[%s1729_s0 + $0x10] sm:$0xff] }
   0xc   :  { %92 = vmatpush.msra.mxu0 %v912_v10  ;;  %254 = vmatpush.msra.mxu2 %v912_v10  ;;  %v1057_v31 = vld [vmem:[%s1728_s4 + $0x80] sm:$0xff]  ;;  %v218_v35 = vld [vmem:[%s1730_s1 + $0x8] sm:$0xff]  ;;  %v58_v37 = vld [vmem:[%s1729_s0 + $0x18] sm:$0xff] }
   0xd   :  { %157 = vmatpush.msra.mxu1 %v917_v11  ;;  %319 = vmatpush.msra.mxu3 %v917_v11  ;;  %v55_v32 = vld [vmem:[%s1729_s0] sm:$0xff]  ;;  %v219_v38 = vld [vmem:[%s1730_s1 + $0x10] sm:$0xff]  ;;  %v220_v39 = vld [vmem:[%s1730_s1 + $0x18] sm:$0xff] }
   0xe   :  { %93 = vmatpush.msra.mxu0 %v926_v12  ;;  %255 = vmatpush.msra.mxu2 %v926_v12  ;;  %v217_v34 = vld [vmem:[%s1730_s1] sm:$0xff]  ;;  %v60_v41 = vld [vmem:[%s1729_s0 + $0x28] sm:$0xff]  ;;  %v61_v44 = vld [vmem:[%s1729_s0 + $0x30] sm:$0xff] }
   0xf   :  { %158 = vmatpush.msra.mxu1 %v931_v13  ;;  %320 = vmatpush.msra.mxu3 %v931_v13  ;;  %v59_v40 = vld [vmem:[%s1729_s0 + $0x20] sm:$0xff]  ;;  %v222_v43 = vld [vmem:[%s1730_s1 + $0x28] sm:$0xff]  ;;  %v62_v45 = vld [vmem:[%s1729_s0 + $0x38] sm:$0xff] }
  0x10   :  { %94 = vmatpush.msra.mxu0 %v940_v14  ;;  %256 = vmatpush.msra.mxu2 %v940_v14  ;;  %v221_v42 = vld [vmem:[%s1730_s1 + $0x20] sm:$0xff]  ;;  %v223_v46 = vld [vmem:[%s1730_s1 + $0x30] sm:$0xff]  ;;  %v224_v47 = vld [vmem:[%s1730_s1 + $0x38] sm:$0xff] }
  0x11   :  { %159 = vmatpush.msra.mxu1 %v945_v15  ;;  %321 = vmatpush.msra.mxu3 %v945_v15  ;;  %v63_v48 = vld [vmem:[%s1729_s0 + $0x40] sm:$0xff]  ;;  %v64_v49 = vld [vmem:[%s1729_s0 + $0x48] sm:$0xff]  ;;  %v65_v52 = vld [vmem:[%s1729_s0 + $0x50] sm:$0xff] }
  0x12   :  { %95 = vmatpush.msra.mxu0 %v954_v16  ;;  %257 = vmatpush.msra.mxu2 %v954_v16  ;;  %v225_v50 = vld [vmem:[%s1730_s1 + $0x40] sm:$0xff]  ;;  %v226_v51 = vld [vmem:[%s1730_s1 + $0x48] sm:$0xff]  ;;  %v66_v53 = vld [vmem:[%s1729_s0 + $0x58] sm:$0xff] }
  0x13   :  { %160 = vmatpush.msra.mxu1 %v959_v17  ;;  %322 = vmatpush.msra.mxu3 %v959_v17  ;;  %v227_v54 = vld [vmem:[%s1730_s1 + $0x50] sm:$0xff]  ;;  %v228_v55 = vld [vmem:[%s1730_s1 + $0x58] sm:$0xff]  ;;  %v67_v56 = vld [vmem:[%s1729_s0 + $0x60] sm:$0xff] }
  0x14   :  { %96 = vmatpush.msra.mxu0 %v968_v18  ;;  %258 = vmatpush.msra.mxu2 %v968_v18  ;;  %v68_v57 = vld [vmem:[%s1729_s0 + $0x68] sm:$0xff]  ;;  %v229_v58 = vld [vmem:[%s1730_s1 + $0x60] sm:$0xff]  ;;  %v69_v60 = vld [vmem:[%s1729_s0 + $0x70] sm:$0xff] }
  0x15   :  { %161 = vmatpush.msra.mxu1 %v973_v19  ;;  %323 = vmatpush.msra.mxu3 %v973_v19  ;;  %v230_v59 = vld [vmem:[%s1730_s1 + $0x68] sm:$0xff]  ;;  %v70_v61 = vld [vmem:[%s1729_s0 + $0x78] sm:$0xff]  ;;  %v231_v62 = vld [vmem:[%s1730_s1 + $0x70] sm:$0xff] }
  0x16   :  { %97 = vmatpush.msra.mxu0 %v982_v20  ;;  %259 = vmatpush.msra.mxu2 %v982_v20  ;;  %v232_v63 = vld [vmem:[%s1730_s1 + $0x78] sm:$0xff] }
  0x17   :  { %162 = vmatpush.msra.mxu1 %v987_v21  ;;  %324 = vmatpush.msra.mxu3 %v987_v21 }
  0x18   :  { %98 = vmatpush.msra.mxu0 %v996_v22  ;;  %260 = vmatpush.msra.mxu2 %v996_v22 }
  0x19   :  { %163 = vmatpush.msra.mxu1 %v1001_v23  ;;  %325 = vmatpush.msra.mxu3 %v1001_v23 }
  0x1a   :  { %99 = vmatpush.msra.mxu0 %v1010_v24  ;;  %261 = vmatpush.msra.mxu2 %v1010_v24 }
  0x1b   :  { %164 = vmatpush.msra.mxu1 %v1015_v25  ;;  %326 = vmatpush.msra.mxu3 %v1015_v25 }
  0x1c   :  { %100 = vmatpush.msra.mxu0 %v1024_v26  ;;  %262 = vmatpush.msra.mxu2 %v1024_v26 }
  0x1d   :  { %165 = vmatpush.msra.mxu1 %v1029_v27  ;;  %327 = vmatpush.msra.mxu3 %v1029_v27 }
  0x1e   :  { %101 = vmatpush.msra.mxu0 %v1038_v28  ;;  %263 = vmatpush.msra.mxu2 %v1038_v28 }
  0x1f   :  { %166 = vmatpush.msra.mxu1 %v1043_v29  ;;  %328 = vmatpush.msra.mxu3 %v1043_v29 }
  0x20   :  { %102 = vmatpush.msra.mxu0 %v1052_v30  ;;  %264 = vmatpush.msra.mxu2 %v1052_v30 }
  0x21   :  { %167 = vmatpush.msra.mxu1 %v1057_v31  ;;  %329 = vmatpush.msra.mxu3 %v1057_v31 }
  0x22   :  { %103 = vmatmul.f32.vlgmr.msra.gmra.mxu0 %v55_v32  ;;  %168 = vmatmul.f32.vlgmr.msra.gmra.mxu1 %v56_v33 }
  0x23   :  { %265 = vmatmul.f32.vlgmr.msra.gmra.mxu2 %v217_v34  ;;  %330 = vmatmul.f32.vlgmr.msra.gmra.mxu3 %v218_v35  ;;  %v395_v34 = vld [vmem:[%s1731_s2] sm:$0xff]  ;;  %v396_v35 = vld [vmem:[%s1731_s2 + $0x8] sm:$0xff] }
  0x24   :  { %605 = vmatpush.msrb.mxu2 %v846_v0  ;;  %670 = vmatpush.msrb.mxu3 %v851_v1 }
  0x25   :  { %427 = vmatpush.msrb.mxu0 %v846_v0  ;;  %492 = vmatpush.msrb.mxu1 %v851_v1  ;;  %v71_v0 = vld [vmem:[%s1729_s0 + $0x80] sm:$0xff]  ;;  %v72_v1 = vld [vmem:[%s1729_s0 + $0x88] sm:$0xff] }
  0x26   :  { %606 = vmatpush.msrb.mxu2 %v856_v2  ;;  %671 = vmatpush.msrb.mxu3 %v863_v3 }
  0x27   :  { %428 = vmatpush.msrb.mxu0 %v856_v2  ;;  %493 = vmatpush.msrb.mxu1 %v863_v3  ;;  %v233_v2 = vld [vmem:[%s1730_s1 + $0x80] sm:$0xff]  ;;  %v234_v3 = vld [vmem:[%s1730_s1 + $0x88] sm:$0xff] }
  0x28   :  { %607 = vmatpush.msrb.mxu2 %v870_v4  ;;  %672 = vmatpush.msrb.mxu3 %v875_v5 }
  0x29   :  { %429 = vmatpush.msrb.mxu0 %v870_v4  ;;  %494 = vmatpush.msrb.mxu1 %v875_v5  ;;  %v73_v4 = vld [vmem:[%s1729_s0 + $0x90] sm:$0xff]  ;;  %v74_v5 = vld [vmem:[%s1729_s0 + $0x98] sm:$0xff] }
  0x2a   :  { %106 = vmatmul.f32.gmra.mxu0 %v57_v36  ;;  %171 = vmatmul.f32.gmra.mxu1 %v58_v37  ;;  %v573_v36 = vld [vmem:[%s1732_s3] sm:$0xff]  ;;  %v574_v37 = vld [vmem:[%s1732_s3 + $0x8] sm:$0xff] }
  0x2b   :  { %268 = vmatmul.f32.gmra.mxu2 %v219_v38  ;;  %333 = vmatmul.f32.gmra.mxu3 %v220_v39 }
  0x2c   :  { %608 = vmatpush.msrb.mxu2 %v884_v6  ;;  %673 = vmatpush.msrb.mxu3 %v889_v7 }
  0x2d   :  { %430 = vmatpush.msrb.mxu0 %v884_v6  ;;  %495 = vmatpush.msrb.mxu1 %v889_v7  ;;  %v235_v6 = vld [vmem:[%s1730_s1 + $0x90] sm:$0xff]  ;;  %v236_v7 = vld [vmem:[%s1730_s1 + $0x98] sm:$0xff] }
  0x2e   :  { %609 = vmatpush.msrb.mxu2 %v898_v8  ;;  %674 = vmatpush.msrb.mxu3 %v903_v9 }
  0x2f   :  { %431 = vmatpush.msrb.mxu0 %v898_v8  ;;  %496 = vmatpush.msrb.mxu1 %v903_v9  ;;  %v75_v8 = vld [vmem:[%s1729_s0 + $0xa0] sm:$0xff]  ;;  %v76_v9 = vld [vmem:[%s1729_s0 + $0xa8] sm:$0xff] }
  0x30   :  { %610 = vmatpush.msrb.mxu2 %v912_v10  ;;  %675 = vmatpush.msrb.mxu3 %v917_v11 }
  0x31   :  { %432 = vmatpush.msrb.mxu0 %v912_v10  ;;  %497 = vmatpush.msrb.mxu1 %v917_v11  ;;  %v237_v10 = vld [vmem:[%s1730_s1 + $0xa0] sm:$0xff]  ;;  %v238_v11 = vld [vmem:[%s1730_s1 + $0xa8] sm:$0xff] }
  0x32   :  { %109 = vmatmul.f32.gmra.mxu0 %v59_v40  ;;  %174 = vmatmul.f32.gmra.mxu1 %v60_v41 }
  0x33   :  { %271 = vmatmul.f32.gmra.mxu2 %v221_v42  ;;  %336 = vmatmul.f32.gmra.mxu3 %v222_v43  ;;  %v397_v43 = vld [vmem:[%s1731_s2 + $0x10] sm:$0xff] }
  0x34   :  { %611 = vmatpush.msrb.mxu2 %v926_v12  ;;  %676 = vmatpush.msrb.mxu3 %v931_v13 }
  0x35   :  { %433 = vmatpush.msrb.mxu0 %v926_v12  ;;  %498 = vmatpush.msrb.mxu1 %v931_v13  ;;  %v77_v12 = vld [vmem:[%s1729_s0 + $0xb0] sm:$0xff]  ;;  %v78_v13 = vld [vmem:[%s1729_s0 + $0xb8] sm:$0xff] }
  0x36   :  { %612 = vmatpush.msrb.mxu2 %v940_v14  ;;  %677 = vmatpush.msrb.mxu3 %v945_v15 }
  0x37   :  { %434 = vmatpush.msrb.mxu0 %v940_v14  ;;  %499 = vmatpush.msrb.mxu1 %v945_v15  ;;  %v239_v14 = vld [vmem:[%s1730_s1 + $0xb0] sm:$0xff]  ;;  %v240_v15 = vld [vmem:[%s1730_s1 + $0xb8] sm:$0xff] }
  0x38   :  { %613 = vmatpush.msrb.mxu2 %v954_v16  ;;  %678 = vmatpush.msrb.mxu3 %v959_v17 }
  0x39   :  { %435 = vmatpush.msrb.mxu0 %v954_v16  ;;  %500 = vmatpush.msrb.mxu1 %v959_v17  ;;  %v79_v16 = vld [vmem:[%s1729_s0 + $0xc0] sm:$0xff]  ;;  %v80_v17 = vld [vmem:[%s1729_s0 + $0xc8] sm:$0xff] }
  0x3a   :  { %112 = vmatmul.f32.gmra.mxu0 %v61_v44  ;;  %177 = vmatmul.f32.gmra.mxu1 %v62_v45  ;;  %v398_v44 = vld [vmem:[%s1731_s2 + $0x18] sm:$0xff]  ;;  %v575_v45 = vld [vmem:[%s1732_s3 + $0x10] sm:$0xff] }
  0x3b   :  { %274 = vmatmul.f32.gmra.mxu2 %v223_v46  ;;  %339 = vmatmul.f32.gmra.mxu3 %v224_v47  ;;  %v576_v46 = vld [vmem:[%s1732_s3 + $0x18] sm:$0xff] }
  0x3c   :  { %614 = vmatpush.msrb.mxu2 %v968_v18  ;;  %679 = vmatpush.msrb.mxu3 %v973_v19 }
  0x3d   :  { %436 = vmatpush.msrb.mxu0 %v968_v18  ;;  %501 = vmatpush.msrb.mxu1 %v973_v19  ;;  %v241_v18 = vld [vmem:[%s1730_s1 + $0xc0] sm:$0xff]  ;;  %v242_v19 = vld [vmem:[%s1730_s1 + $0xc8] sm:$0xff] }
  0x3e   :  { %615 = vmatpush.msrb.mxu2 %v982_v20  ;;  %680 = vmatpush.msrb.mxu3 %v987_v21 }
  0x3f   :  { %437 = vmatpush.msrb.mxu0 %v982_v20  ;;  %502 = vmatpush.msrb.mxu1 %v987_v21  ;;  %v81_v20 = vld [vmem:[%s1729_s0 + $0xd0] sm:$0xff]  ;;  %v82_v21 = vld [vmem:[%s1729_s0 + $0xd8] sm:$0xff] }
  0x40   :  { %616 = vmatpush.msrb.mxu2 %v996_v22  ;;  %681 = vmatpush.msrb.mxu3 %v1001_v23 }
  0x41   :  { %438 = vmatpush.msrb.mxu0 %v996_v22  ;;  %503 = vmatpush.msrb.mxu1 %v1001_v23  ;;  %v243_v22 = vld [vmem:[%s1730_s1 + $0xd0] sm:$0xff]  ;;  %v244_v23 = vld [vmem:[%s1730_s1 + $0xd8] sm:$0xff] }
  0x42   :  { %115 = vmatmul.f32.gmra.mxu0 %v63_v48  ;;  %180 = vmatmul.f32.gmra.mxu1 %v64_v49 }
  0x43   :  { %277 = vmatmul.f32.gmra.mxu2 %v225_v50  ;;  %342 = vmatmul.f32.gmra.mxu3 %v226_v51 }
  0x44   :  { %617 = vmatpush.msrb.mxu2 %v1010_v24  ;;  %682 = vmatpush.msrb.mxu3 %v1015_v25 }
  0x45   :  { %439 = vmatpush.msrb.mxu0 %v1010_v24  ;;  %504 = vmatpush.msrb.mxu1 %v1015_v25  ;;  %v83_v24 = vld [vmem:[%s1729_s0 + $0xe0] sm:$0xff]  ;;  %v84_v25 = vld [vmem:[%s1729_s0 + $0xe8] sm:$0xff] }
  0x46   :  { %618 = vmatpush.msrb.mxu2 %v1024_v26  ;;  %683 = vmatpush.msrb.mxu3 %v1029_v27 }
  0x47   :  { %440 = vmatpush.msrb.mxu0 %v1024_v26  ;;  %505 = vmatpush.msrb.mxu1 %v1029_v27  ;;  %v245_v26 = vld [vmem:[%s1730_s1 + $0xe0] sm:$0xff]  ;;  %v246_v27 = vld [vmem:[%s1730_s1 + $0xe8] sm:$0xff] }
  0x48   :  { %619 = vmatpush.msrb.mxu2 %v1038_v28  ;;  %684 = vmatpush.msrb.mxu3 %v1043_v29 }
  0x49   :  { %441 = vmatpush.msrb.mxu0 %v1038_v28  ;;  %506 = vmatpush.msrb.mxu1 %v1043_v29  ;;  %v85_v28 = vld [vmem:[%s1729_s0 + $0xf0] sm:$0xff]  ;;  %v86_v29 = vld [vmem:[%s1729_s0 + $0xf8] sm:$0xff] }
  0x4a   :  { %118 = vmatmul.f32.gmra.mxu0 %v65_v52  ;;  %183 = vmatmul.f32.gmra.mxu1 %v66_v53  ;;  %v399_v52 = vld [vmem:[%s1731_s2 + $0x20] sm:$0xff]  ;;  %v400_v53 = vld [vmem:[%s1731_s2 + $0x28] sm:$0xff] }
  0x4b   :  { %280 = vmatmul.f32.gmra.mxu2 %v227_v54  ;;  %345 = vmatmul.f32.gmra.mxu3 %v228_v55  ;;  %v577_v54 = vld [vmem:[%s1732_s3 + $0x20] sm:$0xff]  ;;  %v578_v55 = vld [vmem:[%s1732_s3 + $0x28] sm:$0xff] }
  0x4c   :  { %620 = vmatpush.msrb.mxu2 %v1052_v30  ;;  %685 = vmatpush.msrb.mxu3 %v1057_v31 }
  0x4d   :  { %442 = vmatpush.msrb.mxu0 %v1052_v30  ;;  %507 = vmatpush.msrb.mxu1 %v1057_v31  ;;  %v247_v30 = vld [vmem:[%s1730_s1 + $0xf0] sm:$0xff]  ;;  %v248_v31 = vld [vmem:[%s1730_s1 + $0xf8] sm:$0xff] }
  0x52   :  { %121 = vmatmul.f32.gmra.mxu0 %v67_v56  ;;  %186 = vmatmul.f32.gmra.mxu1 %v68_v57 }
  0x53   :  { %283 = vmatmul.f32.gmra.mxu2 %v229_v58  ;;  %348 = vmatmul.f32.gmra.mxu3 %v230_v59 }
  0x5a   :  { %124 = vmatmul.f32.gmra.mxu0 %v69_v60  ;;  %189 = vmatmul.f32.gmra.mxu1 %v70_v61  ;;  %v401_v61 = vld [vmem:[%s1731_s2 + $0x30] sm:$0xff] }
  0x5b   :  { %286 = vmatmul.f32.gmra.mxu2 %v231_v62  ;;  %351 = vmatmul.f32.gmra.mxu3 %v232_v63  ;;  %v402_v62 = vld [vmem:[%s1731_s2 + $0x38] sm:$0xff]  ;;  %v579_v63 = vld [vmem:[%s1732_s3 + $0x30] sm:$0xff] }
  0x62   :  { %127 = vmatmul.f32.gmra.mxu0 %v71_v0  ;;  %192 = vmatmul.f32.gmra.mxu1 %v72_v1  ;;  %v580_v0 = vld [vmem:[%s1732_s3 + $0x38] sm:$0xff] }
  0x63   :  { %289 = vmatmul.f32.gmra.mxu2 %v233_v2  ;;  %354 = vmatmul.f32.gmra.mxu3 %v234_v3 }
  0x6a   :  { %130 = vmatmul.f32.gmra.mxu0 %v73_v4  ;;  %195 = vmatmul.f32.gmra.mxu1 %v74_v5 }
  0x6b   :  { %292 = vmatmul.f32.gmra.mxu2 %v235_v6  ;;  %357 = vmatmul.f32.gmra.mxu3 %v236_v7  ;;  %v403_v6 = vld [vmem:[%s1731_s2 + $0x40] sm:$0xff]  ;;  %v404_v7 = vld [vmem:[%s1731_s2 + $0x48] sm:$0xff] }
  0x72   :  { %133 = vmatmul.f32.gmra.mxu0 %v75_v8  ;;  %198 = vmatmul.f32.gmra.mxu1 %v76_v9  ;;  %v581_v8 = vld [vmem:[%s1732_s3 + $0x40] sm:$0xff]  ;;  %v582_v9 = vld [vmem:[%s1732_s3 + $0x48] sm:$0xff] }
  0x73   :  { %295 = vmatmul.f32.gmra.mxu2 %v237_v10  ;;  %360 = vmatmul.f32.gmra.mxu3 %v238_v11 }
  0x7a   :  { %136 = vmatmul.f32.gmra.mxu0 %v77_v12  ;;  %201 = vmatmul.f32.gmra.mxu1 %v78_v13 }
  0x7b   :  { %298 = vmatmul.f32.gmra.mxu2 %v239_v14  ;;  %363 = vmatmul.f32.gmra.mxu3 %v240_v15  ;;  %v405_v15 = vld [vmem:[%s1731_s2 + $0x50] sm:$0xff] }
  0x82   :  { %139 = vmatmul.f32.gmra.mxu0 %v79_v16  ;;  %204 = vmatmul.f32.gmra.mxu1 %v80_v17  ;;  %v406_v16 = vld [vmem:[%s1731_s2 + $0x58] sm:$0xff]  ;;  %v583_v17 = vld [vmem:[%s1732_s3 + $0x50] sm:$0xff] }
  0x83   :  { %301 = vmatmul.f32.gmra.mxu2 %v241_v18  ;;  %366 = vmatmul.f32.gmra.mxu3 %v242_v19  ;;  %v584_v18 = vld [vmem:[%s1732_s3 + $0x58] sm:$0xff] }
  0x8a   :  { %142 = vmatmul.f32.gmra.mxu0 %v81_v20  ;;  %207 = vmatmul.f32.gmra.mxu1 %v82_v21 }
  0x8b   :  { %304 = vmatmul.f32.gmra.mxu2 %v243_v22  ;;  %369 = vmatmul.f32.gmra.mxu3 %v244_v23 }
  0x92   :  { %145 = vmatmul.f32.gmra.mxu0 %v83_v24  ;;  %210 = vmatmul.f32.gmra.mxu1 %v84_v25  ;;  %v407_v24 = vld [vmem:[%s1731_s2 + $0x60] sm:$0xff]  ;;  %v408_v25 = vld [vmem:[%s1731_s2 + $0x68] sm:$0xff] }
  0x93   :  { %307 = vmatmul.f32.gmra.mxu2 %v245_v26  ;;  %372 = vmatmul.f32.gmra.mxu3 %v246_v27  ;;  %v585_v26 = vld [vmem:[%s1732_s3 + $0x60] sm:$0xff]  ;;  %v586_v27 = vld [vmem:[%s1732_s3 + $0x68] sm:$0xff] }
  0x9a   :  { %148 = vmatmul.f32.gmra.mxu0 %v85_v28  ;;  %213 = vmatmul.f32.gmra.mxu1 %v86_v29 }
  0x9b   :  { %310 = vmatmul.f32.gmra.mxu2 %v247_v30  ;;  %375 = vmatmul.f32.gmra.mxu3 %v248_v31 }
  0x9f   :  { %v1323_v32 = vpop.f32.mrf.mxu0  ;;  %v1325_v33 = vpop.f32.mrf.mxu1 }
  0xa2   :  { %443 = vmatmul.f32.vlgmr.msrb.gmra.mxu0 %v395_v34  ;;  %508 = vmatmul.f32.vlgmr.msrb.gmra.mxu1 %v396_v35  ;;  %v409_v35 = vld [vmem:[%s1731_s2 + $0x70] sm:$0xff] }
  0xa3   :  { %621 = vmatmul.f32.vlgmr.msrb.gmra.mxu2 %v573_v36  ;;  %686 = vmatmul.f32.vlgmr.msrb.gmra.mxu3 %v574_v37  ;;  %v410_v36 = vld [vmem:[%s1731_s2 + $0x78] sm:$0xff]  ;;  %v587_v37 = vld [vmem:[%s1732_s3 + $0x70] sm:$0xff] }
  0xa6   :  { %v266_v38 = vpop.f32.mrf.mxu2  ;;  %v331_v39 = vpop.f32.mrf.mxu3 }
  0xa7   :  { %v1339_v40 = vadd.f32 %v331_v39, %v266_v38  ;;  %v1341_v41 = vpop.f32.mrf.mxu0  ;;  %v1343_v42 = vpop.f32.mrf.mxu1  ;;  %v588_v38 = vld [vmem:[%s1732_s3 + $0x78] sm:$0xff] }
  0xaa   :  { %446 = vmatmul.f32.gmra.mxu0 %v397_v43  ;;  %511 = vmatmul.f32.gmra.mxu1 %v398_v44 }
  0xab   :  { %624 = vmatmul.f32.gmra.mxu2 %v575_v45  ;;  %689 = vmatmul.f32.gmra.mxu3 %v576_v46 }
  0xae   :  { %v269_v47 = vpop.f32.mrf.mxu2  ;;  %v334_v48 = vpop.f32.mrf.mxu3 }
  0xaf   :  { %v1357_v49 = vadd.f32 %v334_v48, %v269_v47  ;;  %v1359_v50 = vpop.f32.mrf.mxu0  ;;  %v1361_v51 = vpop.f32.mrf.mxu1  ;;  %v411_v47 = vld [vmem:[%s1731_s2 + $0x80] sm:$0xff]  ;;  %v412_v48 = vld [vmem:[%s1731_s2 + $0x88] sm:$0xff] }
  0xb2   :  { %449 = vmatmul.f32.gmra.mxu0 %v399_v52  ;;  %514 = vmatmul.f32.gmra.mxu1 %v400_v53  ;;  %v589_v53 = vld [vmem:[%s1732_s3 + $0x80] sm:$0xff] }
  0xb3   :  { %627 = vmatmul.f32.gmra.mxu2 %v577_v54  ;;  %692 = vmatmul.f32.gmra.mxu3 %v578_v55  ;;  %v590_v54 = vld [vmem:[%s1732_s3 + $0x88] sm:$0xff] }
  0xb6   :  { %v272_v56 = vpop.f32.mrf.mxu2  ;;  %v337_v57 = vpop.f32.mrf.mxu3 }
  0xb7   :  { %v1375_v58 = vadd.f32 %v337_v57, %v272_v56  ;;  %v1377_v59 = vpop.f32.mrf.mxu0  ;;  %v1379_v60 = vpop.f32.mrf.mxu1 }
  0xba   :  { %452 = vmatmul.f32.gmra.mxu0 %v401_v61  ;;  %517 = vmatmul.f32.gmra.mxu1 %v402_v62 }
  0xbb   :  { %630 = vmatmul.f32.gmra.mxu2 %v579_v63  ;;  %695 = vmatmul.f32.gmra.mxu3 %v580_v0  ;;  %v413_v63 = vld [vmem:[%s1731_s2 + $0x90] sm:$0xff]  ;;  %v414_v0 = vld [vmem:[%s1731_s2 + $0x98] sm:$0xff] }
  0xbe   :  { %v275_v1 = vpop.f32.mrf.mxu2  ;;  %v340_v2 = vpop.f32.mrf.mxu3 }
  0xbf   :  { %v1393_v3 = vadd.f32 %v340_v2, %v275_v1  ;;  %v1395_v4 = vpop.f32.mrf.mxu0  ;;  %v1397_v5 = vpop.f32.mrf.mxu1  ;;  %v591_v2 = vld [vmem:[%s1732_s3 + $0x90] sm:$0xff] }
  0xc2   :  { %455 = vmatmul.f32.gmra.mxu0 %v403_v6  ;;  %520 = vmatmul.f32.gmra.mxu1 %v404_v7  ;;  %v592_v6 = vld [vmem:[%s1732_s3 + $0x98] sm:$0xff] }
  0xc3   :  { %633 = vmatmul.f32.gmra.mxu2 %v581_v8  ;;  %698 = vmatmul.f32.gmra.mxu3 %v582_v9 }
  0xc6   :  { %v278_v10 = vpop.f32.mrf.mxu2  ;;  %v343_v11 = vpop.f32.mrf.mxu3 }
  0xc7   :  { %v1411_v12 = vadd.f32 %v343_v11, %v278_v10  ;;  %v1413_v13 = vpop.f32.mrf.mxu0  ;;  %v1415_v14 = vpop.f32.mrf.mxu1 }
  0xca   :  { %458 = vmatmul.f32.gmra.mxu0 %v405_v15  ;;  %523 = vmatmul.f32.gmra.mxu1 %v406_v16  ;;  %v415_v16 = vld [vmem:[%s1731_s2 + $0xa0] sm:$0xff] }
  0xcb   :  { %636 = vmatmul.f32.gmra.mxu2 %v583_v17  ;;  %701 = vmatmul.f32.gmra.mxu3 %v584_v18  ;;  %v416_v17 = vld [vmem:[%s1731_s2 + $0xa8] sm:$0xff] }
  0xce   :  { %v281_v19 = vpop.f32.mrf.mxu2  ;;  %v346_v20 = vpop.f32.mrf.mxu3 }
  0xcf   :  { %v1429_v21 = vadd.f32 %v346_v20, %v281_v19  ;;  %v1431_v22 = vpop.f32.mrf.mxu0  ;;  %v1433_v23 = vpop.f32.mrf.mxu1  ;;  %v593_v19 = vld [vmem:[%s1732_s3 + $0xa0] sm:$0xff]  ;;  %v594_v20 = vld [vmem:[%s1732_s3 + $0xa8] sm:$0xff] }
  0xd2   :  { %461 = vmatmul.f32.gmra.mxu0 %v407_v24  ;;  %526 = vmatmul.f32.gmra.mxu1 %v408_v25 }
  0xd3   :  { %639 = vmatmul.f32.gmra.mxu2 %v585_v26  ;;  %704 = vmatmul.f32.gmra.mxu3 %v586_v27 }
  0xd6   :  { %v284_v28 = vpop.f32.mrf.mxu2  ;;  %v349_v29 = vpop.f32.mrf.mxu3 }
  0xd7   :  { %v1447_v30 = vadd.f32 %v349_v29, %v284_v28  ;;  %v1449_v31 = vpop.f32.mrf.mxu0  ;;  %v1451_v34 = vpop.f32.mrf.mxu1 }
  0xda   :  { %464 = vmatmul.f32.gmra.mxu0 %v409_v35  ;;  %529 = vmatmul.f32.gmra.mxu1 %v410_v36  ;;  %v417_v35 = vld [vmem:[%s1731_s2 + $0xb0] sm:$0xff]  ;;  %v418_v36 = vld [vmem:[%s1731_s2 + $0xb8] sm:$0xff] }
  0xdb   :  { %642 = vmatmul.f32.gmra.mxu2 %v587_v37  ;;  %707 = vmatmul.f32.gmra.mxu3 %v588_v38  ;;  %v595_v38 = vld [vmem:[%s1732_s3 + $0xb0] sm:$0xff] }
  0xde   :  { %v287_v39 = vpop.f32.mrf.mxu2  ;;  %v352_v43 = vpop.f32.mrf.mxu3 }
  0xdf   :  { %v1465_v44 = vadd.f32 %v352_v43, %v287_v39  ;;  %v128_v45 = vpop.f32.mrf.mxu0  ;;  %v193_v46 = vpop.f32.mrf.mxu1  ;;  %v596_v39 = vld [vmem:[%s1732_s3 + $0xb8] sm:$0xff] }
  0xe0   :  { %v1473_v52 = vadd.f32 %v193_v46, %v128_v45 }
  0xe2   :  { %467 = vmatmul.f32.gmra.mxu0 %v411_v47  ;;  %532 = vmatmul.f32.gmra.mxu1 %v412_v48 }
  0xe3   :  { %645 = vmatmul.f32.gmra.mxu2 %v589_v53  ;;  %710 = vmatmul.f32.gmra.mxu3 %v590_v54  ;;  %v419_v54 = vld [vmem:[%s1731_s2 + $0xc0] sm:$0xff] }
  0xe6   :  { %v290_v55 = vpop.f32.mrf.mxu2  ;;  %v355_v56 = vpop.f32.mrf.mxu3 }
  0xe7   :  { %v1481_v57 = vadd.f32 %v355_v56, %v290_v55  ;;  %v131_v61 = vpop.f32.mrf.mxu0  ;;  %v196_v62 = vpop.f32.mrf.mxu1  ;;  %v420_v55 = vld [vmem:[%s1731_s2 + $0xc8] sm:$0xff] }
  0xe8   :  { %v1489_v1 = vadd.f32 %v196_v62, %v131_v61  ;;  %v597_v61 = vld [vmem:[%s1732_s3 + $0xc0] sm:$0xff]  ;;  %v598_v62 = vld [vmem:[%s1732_s3 + $0xc8] sm:$0xff] }
  0xe9   :  { %v387_v7 = vmax.f32 %v1473_v52, %v1481_v57 }
  0xea   :  { %470 = vmatmul.f32.gmra.mxu0 %v413_v63  ;;  %535 = vmatmul.f32.gmra.mxu1 %v414_v0 }
  0xeb   :  { %648 = vmatmul.f32.gmra.mxu2 %v591_v2  ;;  %713 = vmatmul.f32.gmra.mxu3 %v592_v6 }
  0xee   :  { %v293_v8 = vpop.f32.mrf.mxu2  ;;  %v358_v9 = vpop.f32.mrf.mxu3 }
  0xef   :  { %v1499_v10 = vadd.f32 %v358_v9, %v293_v8  ;;  %v134_v11 = vpop.f32.mrf.mxu0  ;;  %v199_v15 = vpop.f32.mrf.mxu1 }
  0xf0   :  { %v1507_v18 = vadd.f32 %v199_v15, %v134_v11  ;;  %v421_v11 = vld [vmem:[%s1731_s2 + $0xd0] sm:$0xff]  ;;  %v422_v15 = vld [vmem:[%s1731_s2 + $0xd8] sm:$0xff] }
  0xf1   :  { %v388_v24 = vmax.f32 %v1489_v1, %v1499_v10 }
  0xf2   :  { %473 = vmatmul.f32.gmra.mxu0 %v415_v16  ;;  %538 = vmatmul.f32.gmra.mxu1 %v416_v17  ;;  %v599_v17 = vld [vmem:[%s1732_s3 + $0xd0] sm:$0xff] }
  0xf3   :  { %651 = vmatmul.f32.gmra.mxu2 %v593_v19  ;;  %716 = vmatmul.f32.gmra.mxu3 %v594_v20  ;;  %v600_v19 = vld [vmem:[%s1732_s3 + $0xd8] sm:$0xff] }
  0xf6   :  { %v296_v25 = vpop.f32.mrf.mxu2  ;;  %v361_v26 = vpop.f32.mrf.mxu3 }
  0xf7   :  { %v1517_v27 = vadd.f32 %v361_v26, %v296_v25  ;;  %v137_v28 = vpop.f32.mrf.mxu0  ;;  %v202_v29 = vpop.f32.mrf.mxu1 }
  0xf8   :  { %v1525_v37 = vadd.f32 %v202_v29, %v137_v28 }
  0xf9   :  { %v389_v43 = vmax.f32 %v1507_v18, %v1517_v27 }
  0xfa   :  { %476 = vmatmul.f32.gmra.mxu0 %v417_v35  ;;  %541 = vmatmul.f32.gmra.mxu1 %v418_v36  ;;  %v423_v36 = vld [vmem:[%s1731_s2 + $0xe0] sm:$0xff] }
  0xfb   :  { %654 = vmatmul.f32.gmra.mxu2 %v595_v38  ;;  %719 = vmatmul.f32.gmra.mxu3 %v596_v39  ;;  %v424_v38 = vld [vmem:[%s1731_s2 + $0xe8] sm:$0xff] }
  0xfe   :  { %v299_v45 = vpop.f32.mrf.mxu2  ;;  %v364_v46 = vpop.f32.mrf.mxu3 }
  0xff   :  { %v1535_v47 = vadd.f32 %v364_v46, %v299_v45  ;;  %v140_v48 = vpop.f32.mrf.mxu0  ;;  %v205_v53 = vpop.f32.mrf.mxu1  ;;  %v601_v45 = vld [vmem:[%s1732_s3 + $0xe0] sm:$0xff]  ;;  %v602_v46 = vld [vmem:[%s1732_s3 + $0xe8] sm:$0xff] }
 0x100   :  { %v1543_v56 = vadd.f32 %v205_v53, %v140_v48 }
 0x101   :  { %v390_v63 = vmax.f32 %v1525_v37, %v1535_v47 }
 0x102   :  { %479 = vmatmul.f32.gmra.mxu0 %v419_v54  ;;  %544 = vmatmul.f32.gmra.mxu1 %v420_v55 }
 0x103   :  { %657 = vmatmul.f32.gmra.mxu2 %v597_v61  ;;  %722 = vmatmul.f32.gmra.mxu3 %v598_v62 }
 0x106   :  { %v302_v0 = vpop.f32.mrf.mxu2  ;;  %v367_v2 = vpop.f32.mrf.mxu3 }
 0x107   :  { %v1553_v6 = vadd.f32 %v367_v2, %v302_v0  ;;  %v143_v8 = vpop.f32.mrf.mxu0  ;;  %v208_v9 = vpop.f32.mrf.mxu1  ;;  %v425_v0 = vld [vmem:[%s1731_s2 + $0xf0] sm:$0xff]  ;;  %v426_v2 = vld [vmem:[%s1731_s2 + $0xf8] sm:$0xff] }
 0x108   :  { %v1561_v16 = vadd.f32 %v208_v9, %v143_v8  ;;  %v603_v9 = vld [vmem:[%s1732_s3 + $0xf0] sm:$0xff] }
 0x109   :  { %v391_v20 = vmax.f32 %v1543_v56, %v1553_v6 }
 0x10a   :  { %482 = vmatmul.f32.gmra.mxu0 %v421_v11  ;;  %547 = vmatmul.f32.gmra.mxu1 %v422_v15  ;;  %v604_v11 = vld [vmem:[%s1732_s3 + $0xf8] sm:$0xff] }
 0x10b   :  { %660 = vmatmul.f32.gmra.mxu2 %v599_v17  ;;  %725 = vmatmul.f32.gmra.mxu3 %v600_v19 }
 0x10e   :  { %v305_v25 = vpop.f32.mrf.mxu2  ;;  %v370_v26 = vpop.f32.mrf.mxu3 }
 0x10f   :  { %v1571_v28 = vadd.f32 %v370_v26, %v305_v25  ;;  %v146_v29 = vpop.f32.mrf.mxu0  ;;  %v211_v35 = vpop.f32.mrf.mxu1 }
 0x110   :  { %v1579_v39 = vadd.f32 %v211_v35, %v146_v29 }
 0x111   :  { %v392_v48 = vmax.f32 %v1561_v16, %v1571_v28 }
 0x112   :  { %485 = vmatmul.f32.gmra.mxu0 %v423_v36  ;;  %550 = vmatmul.f32.gmra.mxu1 %v424_v38  ;;  %v170_v36 = vadd.f32 %v1325_v33, %v1323_v32 }
 0x113   :  { %663 = vmatmul.f32.gmra.mxu2 %v601_v45  ;;  %728 = vmatmul.f32.gmra.mxu3 %v602_v46 }
 0x114   :  { %v379_v45 = vmax.f32 %v170_v36, %v1339_v40 }
 0x116   :  { %v308_v53 = vpop.f32.mrf.mxu2  ;;  %v373_v54 = vpop.f32.mrf.mxu3 }
 0x117   :  { %v1589_v55 = vadd.f32 %v373_v54, %v308_v53  ;;  %v149_v61 = vpop.f32.mrf.mxu0  ;;  %v214_v62 = vpop.f32.mrf.mxu1 }
 0x118   :  { %v1597_v8 = vadd.f32 %v214_v62, %v149_v61  ;;  %v1617_v62 = vld [vmem:[%s1733_s5] ss:$0 sm:$0xff] }
 0x119   :  { %v393_v15 = vmax.f32 %v1579_v39, %v1589_v55 }
 0x11a   :  { %488 = vmatmul.f32.gmra.mxu0 %v425_v0  ;;  %553 = vmatmul.f32.gmra.mxu1 %v426_v2 }
 0x11b   :  { %666 = vmatmul.f32.gmra.mxu2 %v603_v9  ;;  %731 = vmatmul.f32.gmra.mxu3 %v604_v11  ;;  %v173_v11 = vadd.f32 %v1343_v42, %v1341_v41  ;;  %v176_v41 = vadd.f32 %v1361_v51, %v1359_v50  ;;  %v179_v50 = vadd.f32 %v1379_v60, %v1377_v59 }
 0x11c   :  { %v182_v59 = vadd.f32 %v1397_v5, %v1395_v4  ;;  %v185_v4 = vadd.f32 %v1415_v14, %v1413_v13  ;;  %v188_v13 = vadd.f32 %v1433_v23, %v1431_v22  ;;  %v191_v22 = vadd.f32 %v1451_v34, %v1449_v31 }
 0x11d   :  { %v380_v40 = vmax.f32 %v173_v11, %v1357_v49  ;;  %v381_v49 = vmax.f32 %v176_v41, %v1375_v58  ;;  %v382_v58 = vmax.f32 %v179_v50, %v1393_v3 }
 0x11e   :  { %v311_v17 = vpop.f32.mrf.mxu2  ;;  %v376_v19 = vpop.f32.mrf.mxu3  ;;  %v383_v3 = vmax.f32 %v182_v59, %v1411_v12  ;;  %v384_v12 = vmax.f32 %v185_v4, %v1429_v21  ;;  %v385_v21 = vmax.f32 %v188_v13, %v1447_v30  ;;  %v386_v30 = vmax.f32 %v191_v22, %v1465_v44 }
 0x11f   :  { %v1607_v25 = vadd.f32 %v376_v19, %v311_v17  ;;  %v444_v26 = vpop.f32.mrf.mxu0  ;;  %v509_v29 = vpop.f32.mrf.mxu1 }
 0x120   :  { %v510_v38 = vadd.f32 %v509_v29, %v444_v26 }
 0x121   :  { %v394_v35 = vmax.f32 %v1597_v8, %v1607_v25 }
 0x122   :  { %v557_v54 = vmax.f32 %v379_v45, %v510_v38 }
 0x126   :  { %v622_v46 = vpop.f32.mrf.mxu2  ;;  %v687_v53 = vpop.f32.mrf.mxu3 }
 0x127   :  { %v688_v61 = vadd.f32 %v687_v53, %v622_v46  ;;  %v447_v0 = vpop.f32.mrf.mxu0  ;;  %v512_v2 = vpop.f32.mrf.mxu1 }
 0x128   :  { %v513_v33 = vadd.f32 %v512_v2, %v447_v0 }
 0x129   :  { %v735_v9 = vmax.f32 %v557_v54, %v688_v61 }
 0x12a   :  { %v558_v29 = vmax.f32 %v380_v40, %v513_v33 }
 0x12b   :  { %v755_v32 = vadd.f32 %v1617_v62, %v735_v9 }
 0x12d   :  { %v771_v17 = vmax.f32 %v755_v32, 0.0 }
 0x12e   :  { %v625_v19 = vpop.f32.mrf.mxu2  ;;  %v690_v26 = vpop.f32.mrf.mxu3 }
 0x12f   :  { %787 = vst [vmem:[%s1734_s6] sm:$0xff] %v771_v17  ;;  %v691_v36 = vadd.f32 %v690_v26, %v625_v19  ;;  %v450_v38 = vpop.f32.mrf.mxu0  ;;  %v515_v45 = vpop.f32.mrf.mxu1 }
 0x130   :  { %v516_v53 = vadd.f32 %v515_v45, %v450_v38 }
 0x131   :  { %v736_v46 = vmax.f32 %v558_v29, %v691_v36 }
 0x132   :  { %v559_v2 = vmax.f32 %v381_v49, %v516_v53 }
 0x133   :  { %v756_v42 = vadd.f32 %v1617_v62, %v736_v46 }
 0x135   :  { %v772_v54 = vmax.f32 %v756_v42, 0.0 }
 0x136   :  { %v628_v61 = vpop.f32.mrf.mxu2  ;;  %v693_v0 = vpop.f32.mrf.mxu3 }
 0x137   :  { %788 = vst [vmem:[%s1734_s6 + $0x8] sm:$0xff] %v772_v54  ;;  %v694_v9 = vadd.f32 %v693_v0, %v628_v61  ;;  %v453_v11 = vpop.f32.mrf.mxu0  ;;  %v518_v32 = vpop.f32.mrf.mxu1 }
 0x138   :  { %v519_v40 = vadd.f32 %v518_v32, %v453_v11 }
 0x139   :  { %v737_v33 = vmax.f32 %v559_v2, %v694_v9 }
 0x13a   :  { %v560_v29 = vmax.f32 %v382_v58, %v519_v40 }
 0x13b   :  { %v757_v51 = vadd.f32 %v1617_v62, %v737_v33 }
 0x13d   :  { %v773_v17 = vmax.f32 %v757_v51, 0.0 }
 0x13e   :  { %v631_v19 = vpop.f32.mrf.mxu2  ;;  %v696_v26 = vpop.f32.mrf.mxu3 }
 0x13f   :  { %789 = vst [vmem:[%s1734_s6 + $0x10] sm:$0xff] %v773_v17  ;;  %v697_v36 = vadd.f32 %v696_v26, %v631_v19  ;;  %v456_v38 = vpop.f32.mrf.mxu0  ;;  %v521_v45 = vpop.f32.mrf.mxu1 }
 0x140   :  { %v522_v41 = vadd.f32 %v521_v45, %v456_v38 }
 0x141   :  { %v738_v46 = vmax.f32 %v560_v29, %v697_v36 }
 0x142   :  { %v561_v54 = vmax.f32 %v383_v3, %v522_v41 }
 0x143   :  { %v758_v60 = vadd.f32 %v1617_v62, %v738_v46 }
 0x145   :  { %v774_v42 = vmax.f32 %v758_v60, 0.0 }
 0x146   :  { %v634_v53 = vpop.f32.mrf.mxu2  ;;  %v699_v49 = vpop.f32.mrf.mxu3 }
 0x147   :  { %790 = vst [vmem:[%s1734_s6 + $0x18] sm:$0xff] %v774_v42  ;;  %v700_v61 = vadd.f32 %v699_v49, %v634_v53  ;;  %v459_v0 = vpop.f32.mrf.mxu0  ;;  %v524_v2 = vpop.f32.mrf.mxu1 }
 0x148   :  { %v525_v11 = vadd.f32 %v524_v2, %v459_v0 }
 0x149   :  { %v739_v9 = vmax.f32 %v561_v54, %v700_v61 }
 0x14a   :  { %v562_v51 = vmax.f32 %v384_v12, %v525_v11 }
 0x14b   :  { %v759_v5 = vadd.f32 %v1617_v62, %v739_v9 }
 0x14d   :  { %v775_v32 = vmax.f32 %v759_v5, 0.0 }
 0x14e   :  { %v637_v33 = vpop.f32.mrf.mxu2  ;;  %v702_v50 = vpop.f32.mrf.mxu3 }
 0x14f   :  { %791 = vst [vmem:[%s1734_s6 + $0x20] sm:$0xff] %v775_v32  ;;  %v703_v40 = vadd.f32 %v702_v50, %v637_v33  ;;  %v462_v58 = vpop.f32.mrf.mxu0  ;;  %v527_v17 = vpop.f32.mrf.mxu1 }
 0x150   :  { %v528_v26 = vadd.f32 %v527_v17, %v462_v58 }
 0x151   :  { %v740_v19 = vmax.f32 %v562_v51, %v703_v40 }
 0x152   :  { %v563_v45 = vmax.f32 %v385_v21, %v528_v26 }
 0x153   :  { %v760_v14 = vadd.f32 %v1617_v62, %v740_v19 }
 0x155   :  { %v776_v29 = vmax.f32 %v760_v14, 0.0 }
 0x156   :  { %v640_v36 = vpop.f32.mrf.mxu2  ;;  %v705_v38 = vpop.f32.mrf.mxu3 }
 0x157   :  { %792 = vst [vmem:[%s1734_s6 + $0x28] sm:$0xff] %v776_v29  ;;  %v706_v46 = vadd.f32 %v705_v38, %v640_v36  ;;  %v465_v59 = vpop.f32.mrf.mxu0  ;;  %v530_v60 = vpop.f32.mrf.mxu1 }
 0x158   :  { %v531_v3 = vadd.f32 %v530_v60, %v465_v59 }
 0x159   :  { %v741_v41 = vmax.f32 %v563_v45, %v706_v46 }
 0x15a   :  { %v564_v54 = vmax.f32 %v386_v30, %v531_v3 }
 0x15b   :  { %v761_v23 = vadd.f32 %v1617_v62, %v741_v41 }
 0x15d   :  { %v777_v42 = vmax.f32 %v761_v23, 0.0 }
 0x15e   :  { %v643_v53 = vpop.f32.mrf.mxu2  ;;  %v708_v49 = vpop.f32.mrf.mxu3 }
 0x15f   :  { %793 = vst [vmem:[%s1734_s6 + $0x30] sm:$0xff] %v777_v42  ;;  %v709_v61 = vadd.f32 %v708_v49, %v643_v53  ;;  %v468_v0 = vpop.f32.mrf.mxu0  ;;  %v533_v2 = vpop.f32.mrf.mxu1 }
 0x160   :  { %v534_v31 = vadd.f32 %v533_v2, %v468_v0 }
 0x161   :  { %v742_v9 = vmax.f32 %v564_v54, %v709_v61 }
 0x162   :  { %v565_v44 = vmax.f32 %v387_v7, %v534_v31 }
 0x163   :  { %v762_v4 = vadd.f32 %v1617_v62, %v742_v9 }
 0x165   :  { %v778_v34 = vmax.f32 %v762_v4, 0.0 }
 0x166   :  { %v646_v5 = vpop.f32.mrf.mxu2  ;;  %v711_v11 = vpop.f32.mrf.mxu3 }
 0x167   :  { %794 = vst [vmem:[%s1734_s6 + $0x38] sm:$0xff] %v778_v34  ;;  %v712_v12 = vadd.f32 %v711_v11, %v646_v5  ;;  %v471_v32 = vpop.f32.mrf.mxu0  ;;  %v536_v33 = vpop.f32.mrf.mxu1 }
 0x168   :  { %v537_v40 = vadd.f32 %v536_v33, %v471_v32 }
 0x169   :  { %v743_v50 = vmax.f32 %v565_v44, %v712_v12 }
 0x16a   :  { %v566_v13 = vmax.f32 %v388_v24, %v537_v40 }
 0x16b   :  { %v763_v51 = vadd.f32 %v1617_v62, %v743_v50 }
 0x16d   :  { %v779_v58 = vmax.f32 %v763_v51, 0.0 }
 0x16e   :  { %v649_v17 = vpop.f32.mrf.mxu2  ;;  %v714_v19 = vpop.f32.mrf.mxu3 }
 0x16f   :  { %795 = vst [vmem:[%s1734_s6 + $0x40] sm:$0xff] %v779_v58  ;;  %v715_v52 = vadd.f32 %v714_v19, %v649_v17  ;;  %v474_v57 = vpop.f32.mrf.mxu0  ;;  %v539_v7 = vpop.f32.mrf.mxu1 }
 0x170   :  { %v540_v21 = vadd.f32 %v539_v7, %v474_v57 }
 0x171   :  { %v744_v14 = vmax.f32 %v566_v13, %v715_v52 }
 0x172   :  { %v567_v45 = vmax.f32 %v389_v43, %v540_v21 }
 0x173   :  { %v764_v26 = vadd.f32 %v1617_v62, %v744_v14 }
 0x175   :  { %v780_v29 = vmax.f32 %v764_v26, 0.0 }
 0x176   :  { %v652_v36 = vpop.f32.mrf.mxu2  ;;  %v717_v38 = vpop.f32.mrf.mxu3 }
 0x177   :  { %796 = vst [vmem:[%s1734_s6 + $0x48] sm:$0xff] %v780_v29  ;;  %v718_v1 = vadd.f32 %v717_v38, %v652_v36  ;;  %v477_v10 = vpop.f32.mrf.mxu0  ;;  %v542_v24 = vpop.f32.mrf.mxu1 }
 0x178   :  { %v543_v60 = vadd.f32 %v542_v24, %v477_v10 }
 0x179   :  { %v745_v46 = vmax.f32 %v567_v45, %v718_v1 }
 0x17a   :  { %v568_v3 = vmax.f32 %v390_v63, %v543_v60 }
 0x17b   :  { %v765_v59 = vadd.f32 %v1617_v62, %v745_v46 }
 0x17d   :  { %v781_v41 = vmax.f32 %v765_v59, 0.0 }
 0x17e   :  { %v655_v22 = vpop.f32.mrf.mxu2  ;;  %v720_v23 = vpop.f32.mrf.mxu3 }
 0x17f   :  { %797 = vst [vmem:[%s1734_s6 + $0x50] sm:$0xff] %v781_v41  ;;  %v721_v18 = vadd.f32 %v720_v23, %v655_v22  ;;  %v480_v27 = vpop.f32.mrf.mxu0  ;;  %v545_v43 = vpop.f32.mrf.mxu1 }
 0x180   :  { %v546_v53 = vadd.f32 %v545_v43, %v480_v27 }
 0x181   :  { %v746_v30 = vmax.f32 %v568_v3, %v721_v18 }
 0x182   :  { %v569_v0 = vmax.f32 %v391_v20, %v546_v53 }
 0x183   :  { %v766_v42 = vadd.f32 %v1617_v62, %v746_v30 }
 0x185   :  { %v782_v49 = vmax.f32 %v766_v42, 0.0 }
 0x186   :  { %v658_v54 = vpop.f32.mrf.mxu2  ;;  %v723_v61 = vpop.f32.mrf.mxu3 }
 0x187   :  { %798 = vst [vmem:[%s1734_s6 + $0x58] sm:$0xff] %v782_v49  ;;  %v724_v37 = vadd.f32 %v723_v61, %v658_v54  ;;  %v483_v47 = vpop.f32.mrf.mxu0  ;;  %v548_v63 = vpop.f32.mrf.mxu1 }
 0x188   :  { %v549_v4 = vadd.f32 %v548_v63, %v483_v47 }
 0x189   :  { %v747_v2 = vmax.f32 %v569_v0, %v724_v37 }
 0x18a   :  { %v570_v11 = vmax.f32 %v392_v48, %v549_v4 }
 0x18b   :  { %v767_v9 = vadd.f32 %v1617_v62, %v747_v2 }
 0x18d   :  { %v783_v31 = vmax.f32 %v767_v9, 0.0 }
 0x18e   :  { %v661_v34 = vpop.f32.mrf.mxu2  ;;  %v726_v5 = vpop.f32.mrf.mxu3 }
 0x18f   :  { %799 = vst [vmem:[%s1734_s6 + $0x60] sm:$0xff] %v783_v31  ;;  %v727_v56 = vadd.f32 %v726_v5, %v661_v34  ;;  %v486_v6 = vpop.f32.mrf.mxu0  ;;  %v551_v20 = vpop.f32.mrf.mxu1 }
 0x190   :  { %v552_v32 = vadd.f32 %v551_v20, %v486_v6 }
 0x191   :  { %v748_v44 = vmax.f32 %v570_v11, %v727_v56 }
 0x192   :  { %v571_v40 = vmax.f32 %v393_v15, %v552_v32 }
 0x193   :  { %v768_v12 = vadd.f32 %v1617_v62, %v748_v44 }
 0x195   :  { %v784_v33 = vmax.f32 %v768_v12, 0.0 }
 0x196   :  { %v664_v50 = vpop.f32.mrf.mxu2  ;;  %v729_v51 = vpop.f32.mrf.mxu3 }
 0x197   :  { %800 = vst [vmem:[%s1734_s6 + $0x68] sm:$0xff] %v784_v33  ;;  %v730_v16 = vadd.f32 %v729_v51, %v664_v50  ;;  %v489_v28 = vpop.f32.mrf.mxu0  ;;  %v554_v48 = vpop.f32.mrf.mxu1 }
 0x198   :  { %v555_v19 = vadd.f32 %v554_v48, %v489_v28 }
 0x199   :  { %v749_v58 = vmax.f32 %v571_v40, %v730_v16 }
 0x19a   :  { %v572_v7 = vmax.f32 %v394_v35, %v555_v19 }
 0x19b   :  { %v769_v17 = vadd.f32 %v1617_v62, %v749_v58 }
 0x19d   :  { %v785_v13 = vmax.f32 %v769_v17, 0.0 }
 0x19e   :  { %v667_v52 = vpop.f32.mrf.mxu2  ;;  %v732_v57 = vpop.f32.mrf.mxu3 }
 0x19f   :  { %801 = vst [vmem:[%s1734_s6 + $0x70] sm:$0xff] %v785_v13  ;;  %v733_v39 = vadd.f32 %v732_v57, %v667_v52 }
 0x1a1   :  { %v750_v55 = vmax.f32 %v572_v7, %v733_v39 }
 0x1a3   :  { %v770_v15 = vadd.f32 %v1617_v62, %v750_v55 }
 0x1a5   :  { %v786_v14 = vmax.f32 %v770_v15, 0.0 }
 0x1a7   :  { %802 = vst [vmem:[%s1734_s6 + $0x78] sm:$0xff] %v786_v14 }

// kernel: lenet_forward.5
= control target key start
LH: loop header
LB: loop body
LE: loop exit
PB: predicated region body
PF: predicated region fallthrough
CT: control target
= control target key end

     0   :  { %s620_s1 = inlined_call_operand.vmem [shape: f32[512,128], index: 1, kind: input, shape index: {}]   ;;  %s621_s2 = inlined_call_operand.vmem [shape: f32[1,128], index: 2, kind: input, shape index: {}]   ;;  %s622_s0 = inlined_call_operand.vmem [shape: f32[8,512], index: 0, kind: input, shape index: {}]   ;;  %s623_s3 = inlined_call_operand.vmem [shape: f32[128,128], index: 3, kind: input, shape index: {}]   ;;  %s624_s4 = inlined_call_operand.vmem [shape: f32[1,128], index: 4, kind: input, shape index: {}]   ;;  %s625_s5 = inlined_call_operand.vmem [shape: f32[128,128], index: 5, kind: input, shape index: {}]   ;;  %s626_s6 = inlined_call_operand.vmem [shape: f32[1,128], index: 6, kind: input, shape index: {}]   ;;  %s627_s7 = inlined_call_operand.vmem [shape: f32[8,128], index: 7, kind: output, shape index: {}]  }
   0x1   :  { %v77_v0 = vld [vmem:[%s620_s1 + $0x178] sm:$0xff]  ;;  %v76_v2 = vld [vmem:[%s620_s1 + $0x170] sm:$0xff]  ;;  %v75_v6 = vld [vmem:[%s620_s1 + $0x168] sm:$0xff] }
   0x2   :  { %v45_v1 = vld [vmem:[%s620_s1 + $0x78] sm:$0xff]  ;;  %138 = vmatpush.msra.mxu2 %v77_v0  ;;  %v44_v4 = vld [vmem:[%s620_s1 + $0x70] sm:$0xff]  ;;  %v43_v8 = vld [vmem:[%s620_s1 + $0x68] sm:$0xff] }
   0x3   :  { %98 = vmatpush.msra.mxu0 %v45_v1  ;;  %v93_v3 = vld [vmem:[%s620_s1 + $0x1f8] sm:$0xff]  ;;  %v92_v7 = vld [vmem:[%s620_s1 + $0x1f0] sm:$0xff]  ;;  %v91_v10 = vld [vmem:[%s620_s1 + $0x1e8] sm:$0xff] }
   0x4   :  { %v61_v5 = vld [vmem:[%s620_s1 + $0xf8] sm:$0xff]  ;;  %158 = vmatpush.msra.mxu3 %v93_v3  ;;  %139 = vmatpush.msra.mxu2 %v76_v2  ;;  %v60_v9 = vld [vmem:[%s620_s1 + $0xf0] sm:$0xff]  ;;  %v74_v11 = vld [vmem:[%s620_s1 + $0x160] sm:$0xff] }
   0x5   :  { %118 = vmatpush.msra.mxu1 %v61_v5  ;;  %99 = vmatpush.msra.mxu0 %v44_v4  ;;  %v42_v12 = vld [vmem:[%s620_s1 + $0x60] sm:$0xff]  ;;  %v59_v13 = vld [vmem:[%s620_s1 + $0xe8] sm:$0xff]  ;;  %v73_v16 = vld [vmem:[%s620_s1 + $0x158] sm:$0xff] }
   0x6   :  { %159 = vmatpush.msra.mxu3 %v92_v7  ;;  %140 = vmatpush.msra.mxu2 %v75_v6  ;;  %v90_v14 = vld [vmem:[%s620_s1 + $0x1e0] sm:$0xff]  ;;  %v41_v17 = vld [vmem:[%s620_s1 + $0x58] sm:$0xff]  ;;  %v72_v20 = vld [vmem:[%s620_s1 + $0x150] sm:$0xff] }
   0x7   :  { %119 = vmatpush.msra.mxu1 %v60_v9  ;;  %100 = vmatpush.msra.mxu0 %v43_v8  ;;  %v58_v15 = vld [vmem:[%s620_s1 + $0xe0] sm:$0xff]  ;;  %v89_v18 = vld [vmem:[%s620_s1 + $0x1d8] sm:$0xff]  ;;  %v40_v21 = vld [vmem:[%s620_s1 + $0x50] sm:$0xff] }
   0x8   :  { %160 = vmatpush.msra.mxu3 %v91_v10  ;;  %141 = vmatpush.msra.mxu2 %v74_v11  ;;  %v57_v19 = vld [vmem:[%s620_s1 + $0xd8] sm:$0xff]  ;;  %v88_v22 = vld [vmem:[%s620_s1 + $0x1d0] sm:$0xff]  ;;  %v71_v24 = vld [vmem:[%s620_s1 + $0x148] sm:$0xff] }
   0x9   :  { %120 = vmatpush.msra.mxu1 %v59_v13  ;;  %101 = vmatpush.msra.mxu0 %v42_v12  ;;  %v56_v23 = vld [vmem:[%s620_s1 + $0xd0] sm:$0xff]  ;;  %v39_v25 = vld [vmem:[%s620_s1 + $0x48] sm:$0xff]  ;;  %v70_v28 = vld [vmem:[%s620_s1 + $0x140] sm:$0xff] }
   0xa   :  { %161 = vmatpush.msra.mxu3 %v90_v14  ;;  %142 = vmatpush.msra.mxu2 %v73_v16  ;;  %v87_v26 = vld [vmem:[%s620_s1 + $0x1c8] sm:$0xff]  ;;  %v38_v29 = vld [vmem:[%s620_s1 + $0x40] sm:$0xff]  ;;  %v69_v32 = vld [vmem:[%s620_s1 + $0x138] sm:$0xff] }
   0xb   :  { %121 = vmatpush.msra.mxu1 %v58_v15  ;;  %102 = vmatpush.msra.mxu0 %v41_v17  ;;  %v55_v27 = vld [vmem:[%s620_s1 + $0xc8] sm:$0xff]  ;;  %v86_v30 = vld [vmem:[%s620_s1 + $0x1c0] sm:$0xff]  ;;  %v37_v33 = vld [vmem:[%s620_s1 + $0x38] sm:$0xff] }
   0xc   :  { %162 = vmatpush.msra.mxu3 %v89_v18  ;;  %143 = vmatpush.msra.mxu2 %v72_v20  ;;  %v54_v31 = vld [vmem:[%s620_s1 + $0xc0] sm:$0xff]  ;;  %v85_v34 = vld [vmem:[%s620_s1 + $0x1b8] sm:$0xff]  ;;  %v68_v36 = vld [vmem:[%s620_s1 + $0x130] sm:$0xff] }
   0xd   :  { %122 = vmatpush.msra.mxu1 %v57_v19  ;;  %103 = vmatpush.msra.mxu0 %v40_v21  ;;  %v53_v35 = vld [vmem:[%s620_s1 + $0xb8] sm:$0xff]  ;;  %v36_v37 = vld [vmem:[%s620_s1 + $0x30] sm:$0xff]  ;;  %v67_v40 = vld [vmem:[%s620_s1 + $0x128] sm:$0xff] }
   0xe   :  { %163 = vmatpush.msra.mxu3 %v88_v22  ;;  %144 = vmatpush.msra.mxu2 %v71_v24  ;;  %v84_v38 = vld [vmem:[%s620_s1 + $0x1b0] sm:$0xff]  ;;  %v35_v41 = vld [vmem:[%s620_s1 + $0x28] sm:$0xff]  ;;  %v66_v44 = vld [vmem:[%s620_s1 + $0x120] sm:$0xff] }
   0xf   :  { %123 = vmatpush.msra.mxu1 %v56_v23  ;;  %104 = vmatpush.msra.mxu0 %v39_v25  ;;  %v52_v39 = vld [vmem:[%s620_s1 + $0xb0] sm:$0xff]  ;;  %v83_v42 = vld [vmem:[%s620_s1 + $0x1a8] sm:$0xff]  ;;  %v34_v45 = vld [vmem:[%s620_s1 + $0x20] sm:$0xff] }
  0x10   :  { %164 = vmatpush.msra.mxu3 %v87_v26  ;;  %145 = vmatpush.msra.mxu2 %v70_v28  ;;  %v51_v43 = vld [vmem:[%s620_s1 + $0xa8] sm:$0xff]  ;;  %v82_v46 = vld [vmem:[%s620_s1 + $0x1a0] sm:$0xff]  ;;  %v65_v48 = vld [vmem:[%s620_s1 + $0x118] sm:$0xff] }
  0x11   :  { %124 = vmatpush.msra.mxu1 %v55_v27  ;;  %105 = vmatpush.msra.mxu0 %v38_v29  ;;  %v50_v47 = vld [vmem:[%s620_s1 + $0xa0] sm:$0xff]  ;;  %v33_v49 = vld [vmem:[%s620_s1 + $0x18] sm:$0xff]  ;;  %v64_v52 = vld [vmem:[%s620_s1 + $0x110] sm:$0xff] }
  0x12   :  { %165 = vmatpush.msra.mxu3 %v86_v30  ;;  %146 = vmatpush.msra.mxu2 %v69_v32  ;;  %v81_v50 = vld [vmem:[%s620_s1 + $0x198] sm:$0xff]  ;;  %v32_v53 = vld [vmem:[%s620_s1 + $0x10] sm:$0xff]  ;;  %v63_v56 = vld [vmem:[%s620_s1 + $0x108] sm:$0xff] }
  0x13   :  { %125 = vmatpush.msra.mxu1 %v54_v31  ;;  %106 = vmatpush.msra.mxu0 %v37_v33  ;;  %v49_v51 = vld [vmem:[%s620_s1 + $0x98] sm:$0xff]  ;;  %v80_v54 = vld [vmem:[%s620_s1 + $0x190] sm:$0xff]  ;;  %v31_v57 = vld [vmem:[%s620_s1 + $0x8] sm:$0xff] }
  0x14   :  { %166 = vmatpush.msra.mxu3 %v85_v34  ;;  %147 = vmatpush.msra.mxu2 %v68_v36  ;;  %v48_v55 = vld [vmem:[%s620_s1 + $0x90] sm:$0xff]  ;;  %v79_v58 = vld [vmem:[%s620_s1 + $0x188] sm:$0xff]  ;;  %v62_v60 = vld [vmem:[%s620_s1 + $0x100] sm:$0xff] }
  0x15   :  { %126 = vmatpush.msra.mxu1 %v53_v35  ;;  %107 = vmatpush.msra.mxu0 %v36_v37  ;;  %v47_v59 = vld [vmem:[%s620_s1 + $0x88] sm:$0xff]  ;;  %v30_v61 = vld [vmem:[%s620_s1] sm:$0xff]  ;;  %v28_v62 = vld [vmem:[%s622_s0 + $0x10] sm:$0xff] }
  0x16   :  { %167 = vmatpush.msra.mxu3 %v84_v38  ;;  %148 = vmatpush.msra.mxu2 %v67_v40  ;;  %v78_v63 = vld [vmem:[%s620_s1 + $0x180] sm:$0xff]  ;;  %v29_v1 = vld [vmem:[%s622_s0 + $0x18] sm:$0xff]  ;;  %v27_v4 = vld [vmem:[%s622_s0 + $0x8] sm:$0xff] }
  0x17   :  { %127 = vmatpush.msra.mxu1 %v52_v39  ;;  %108 = vmatpush.msra.mxu0 %v35_v41  ;;  %v26_v0 = vld [vmem:[%s622_s0] sm:$0xff]  ;;  %v194_v3 = vld [vmem:[%s623_s3 + $0x78] sm:$0xff]  ;;  %v193_v5 = vld [vmem:[%s623_s3 + $0x70] sm:$0xff] }
  0x18   :  { %168 = vmatpush.msra.mxu3 %v83_v42  ;;  %149 = vmatpush.msra.mxu2 %v66_v44  ;;  %v46_v2 = vld [vmem:[%s620_s1 + $0x80] sm:$0xff]  ;;  %v192_v6 = vld [vmem:[%s623_s3 + $0x68] sm:$0xff]  ;;  %v190_v8 = vld [vmem:[%s623_s3 + $0x58] sm:$0xff] }
  0x19   :  { %128 = vmatpush.msra.mxu1 %v51_v43  ;;  %109 = vmatpush.msra.mxu0 %v34_v45  ;;  %v191_v7 = vld [vmem:[%s623_s3 + $0x60] sm:$0xff]  ;;  %v189_v9 = vld [vmem:[%s623_s3 + $0x50] sm:$0xff]  ;;  %v188_v10 = vld [vmem:[%s623_s3 + $0x48] sm:$0xff] }
  0x1a   :  { %169 = vmatpush.msra.mxu3 %v82_v46  ;;  %150 = vmatpush.msra.mxu2 %v65_v48  ;;  %v187_v11 = vld [vmem:[%s623_s3 + $0x40] sm:$0xff]  ;;  %v186_v12 = vld [vmem:[%s623_s3 + $0x38] sm:$0xff]  ;;  %v185_v13 = vld [vmem:[%s623_s3 + $0x30] sm:$0xff] }
  0x1b   :  { %129 = vmatpush.msra.mxu1 %v50_v47  ;;  %110 = vmatpush.msra.mxu0 %v33_v49  ;;  %v184_v14 = vld [vmem:[%s623_s3 + $0x28] sm:$0xff]  ;;  %v183_v15 = vld [vmem:[%s623_s3 + $0x20] sm:$0xff]  ;;  %v182_v16 = vld [vmem:[%s623_s3 + $0x18] sm:$0xff] }
  0x1c   :  { %170 = vmatpush.msra.mxu3 %v81_v50  ;;  %151 = vmatpush.msra.mxu2 %v64_v52  ;;  %v181_v17 = vld [vmem:[%s623_s3 + $0x10] sm:$0xff]  ;;  %v180_v18 = vld [vmem:[%s623_s3 + $0x8] sm:$0xff]  ;;  %v179_v19 = vld [vmem:[%s623_s3] sm:$0xff] }
  0x1d   :  { %130 = vmatpush.msra.mxu1 %v49_v51  ;;  %111 = vmatpush.msra.mxu0 %v32_v53  ;;  %v235_v20 = vld [vmem:[%s625_s5 + $0x78] sm:$0xff]  ;;  %v234_v21 = vld [vmem:[%s625_s5 + $0x70] sm:$0xff]  ;;  %v233_v22 = vld [vmem:[%s625_s5 + $0x68] sm:$0xff] }
  0x1e   :  { %171 = vmatpush.msra.mxu3 %v80_v54  ;;  %152 = vmatpush.msra.mxu2 %v63_v56  ;;  %v232_v23 = vld [vmem:[%s625_s5 + $0x60] sm:$0xff]  ;;  %v231_v24 = vld [vmem:[%s625_s5 + $0x58] sm:$0xff]  ;;  %v230_v25 = vld [vmem:[%s625_s5 + $0x50] sm:$0xff] }
  0x1f   :  { %131 = vmatpush.msra.mxu1 %v48_v55  ;;  %112 = vmatpush.msra.mxu0 %v31_v57  ;;  %v229_v26 = vld [vmem:[%s625_s5 + $0x48] sm:$0xff]  ;;  %v228_v27 = vld [vmem:[%s625_s5 + $0x40] sm:$0xff]  ;;  %v227_v28 = vld [vmem:[%s625_s5 + $0x38] sm:$0xff] }
  0x20   :  { %172 = vmatpush.msra.mxu3 %v79_v58  ;;  %153 = vmatpush.msra.mxu2 %v62_v60  ;;  %v226_v29 = vld [vmem:[%s625_s5 + $0x30] sm:$0xff]  ;;  %v265_v30 = vld [vmem:[%s621_s2] ss:$0 sm:$0xff]  ;;  %v225_v31 = vld [vmem:[%s625_s5 + $0x28] sm:$0xff] }
  0x21   :  { %132 = vmatpush.msra.mxu1 %v47_v59  ;;  %113 = vmatpush.msra.mxu0 %v30_v61  ;;  %v224_v33 = vld [vmem:[%s625_s5 + $0x20] sm:$0xff]  ;;  %v223_v36 = vld [vmem:[%s625_s5 + $0x18] sm:$0xff]  ;;  %v222_v43 = vld [vmem:[%s625_s5 + $0x10] sm:$0xff] }
  0x22   :  { %154 = vmatmul.f32.vlgmr.msra.gmra.mxu2 %v28_v62  ;;  %173 = vmatpush.msra.mxu3 %v78_v63  ;;  %v221_v44 = vld [vmem:[%s625_s5 + $0x8] sm:$0xff]  ;;  %v220_v45 = vld [vmem:[%s625_s5] sm:$0xff] }
  0x23   :  { %114 = vmatmul.f32.vlgmr.msra.gmra.mxu0 %v26_v0  ;;  %174 = vmatmul.f32.vlgmr.msra.gmra.mxu3 %v29_v1  ;;  %v266_v46 = vld [vmem:[%s624_s4] ss:$0 sm:$0xff] }
  0x24   :  { %133 = vmatpush.msra.mxu1 %v46_v2  ;;  %199 = vmatpush.msrb.mxu0 %v194_v3  ;;  %v267_v50 = vld [vmem:[%s626_s6] ss:$0 sm:$0xff] }
  0x25   :  { %134 = vmatmul.f32.vlgmr.msra.gmra.mxu1 %v27_v4 }
  0x26   :  { %200 = vmatpush.msrb.mxu0 %v193_v5  ;;  %240 = vmatpush.msrb.mxu1 %v235_v20 }
  0x28   :  { %201 = vmatpush.msrb.mxu0 %v192_v6  ;;  %241 = vmatpush.msrb.mxu1 %v234_v21 }
  0x2a   :  { %202 = vmatpush.msrb.mxu0 %v191_v7  ;;  %242 = vmatpush.msrb.mxu1 %v233_v22 }
  0x2c   :  { %203 = vmatpush.msrb.mxu0 %v190_v8  ;;  %243 = vmatpush.msrb.mxu1 %v232_v23 }
  0x2e   :  { %204 = vmatpush.msrb.mxu0 %v189_v9  ;;  %244 = vmatpush.msrb.mxu1 %v231_v24 }
  0x30   :  { %205 = vmatpush.msrb.mxu0 %v188_v10  ;;  %245 = vmatpush.msrb.mxu1 %v230_v25 }
  0x32   :  { %206 = vmatpush.msrb.mxu0 %v187_v11  ;;  %246 = vmatpush.msrb.mxu1 %v229_v26 }
  0x34   :  { %207 = vmatpush.msrb.mxu0 %v186_v12  ;;  %247 = vmatpush.msrb.mxu1 %v228_v27 }
  0x36   :  { %208 = vmatpush.msrb.mxu0 %v185_v13  ;;  %248 = vmatpush.msrb.mxu1 %v227_v28 }
  0x38   :  { %209 = vmatpush.msrb.mxu0 %v184_v14  ;;  %249 = vmatpush.msrb.mxu1 %v226_v29 }
  0x3a   :  { %210 = vmatpush.msrb.mxu0 %v183_v15  ;;  %250 = vmatpush.msrb.mxu1 %v225_v31 }
  0x3c   :  { %211 = vmatpush.msrb.mxu0 %v182_v16  ;;  %251 = vmatpush.msrb.mxu1 %v224_v33 }
  0x3e   :  { %212 = vmatpush.msrb.mxu0 %v181_v17  ;;  %252 = vmatpush.msrb.mxu1 %v223_v36 }
  0x40   :  { %213 = vmatpush.msrb.mxu0 %v180_v18  ;;  %253 = vmatpush.msrb.mxu1 %v222_v43 }
  0x42   :  { %214 = vmatpush.msrb.mxu0 %v179_v19  ;;  %254 = vmatpush.msrb.mxu1 %v221_v44 }
  0x44   :  { %255 = vmatpush.msrb.mxu1 %v220_v45 }
  0xa0   :  { %v115_v32 = vpop.f32.mrf.mxu0 }
  0xa1   :  { %v116_v34 = vadd.f32 %v265_v30, %v115_v32 }
  0xa2   :  { %v135_v35 = vpop.f32.mrf.mxu1 }
  0xa3   :  { %v136_v37 = vadd.f32 %v135_v35, %v116_v34 }
  0xa5   :  { %v155_v38 = vpop.f32.mrf.mxu2 }
  0xa6   :  { %v156_v39 = vadd.f32 %v155_v38, %v136_v37  ;;  %v175_v40 = vpop.f32.mrf.mxu3 }
  0xa8   :  { %v176_v41 = vadd.f32 %v175_v40, %v156_v39 }
  0xaa   :  { %v178_v42 = vmax.f32 %v176_v41, 0.0 }
  0xac   :  { %215 = vmatmul.f32.vlgmr.msrb.gmra.mxu0 %v178_v42 }
 0x129   :  { %v216_v47 = vpop.f32.mrf.mxu0 }
 0x12a   :  { %v217_v48 = vadd.f32 %v266_v46, %v216_v47 }
 0x12c   :  { %v219_v49 = vmax.f32 %v217_v48, 0.0 }
 0x12e   :  { %256 = vmatmul.f32.vlgmr.msrb.gmra.mxu1 %v219_v49 }
 0x1ab   :  { %v257_v51 = vpop.f32.mrf.mxu1 }
 0x1ac   :  { %v258_v52 = vadd.f32 %v267_v50, %v257_v51 }
 0x1ae   :  { %260 = vst [vmem:[%s627_s7] sm:$0xff] %v258_v52 }

</bundles_post_ra>
